<compile_context>
chip_gen: v5e
topology: v5e:2x2
jax: 0.10.0
libtpu: 0.0.40
codegen_flags: <defaults>
</compile_context>

<pallas_src>
import functools

import jax
import jax.numpy as jnp
import numpy as np
from jax.experimental import pallas as pl
from jax.experimental.pallas import tpu as pltpu


# ---------------------------------------------------------------------------
# Kernel: one grid step == `nb` images, activations laid out as (C, nb*H*W)
# ---------------------------------------------------------------------------
def _basic_block_kernel(x_ref, w1_ref, b1_ref, w2_ref, b2_ref, m_ref,
                        out_ref, xs_ref, xim_ref, *, W, pad):
    C, Mb = x_ref.shape
    L = xs_ref.shape[1]
    cdt = xs_ref.dtype

    # Halo lanes of the activation slab never hold real data; clear them so the
    # multiplicative edge masks can never pick up stale-VMEM garbage (NaN/Inf).
    # Done every step (not once at program_id==0) because with a "parallel"
    # grid axis each TensorCore owns its own scratch; cost is two (C, 128)
    # stores (~16 KB), negligible.
    xs_ref[:, :pad] = jnp.zeros((C, pad), cdt)
    xs_ref[:, pad + Mb:] = jnp.zeros((C, L - pad - Mb), cdt)

    def conv3x3(w_ref, b_ref):
        # K-folded im2col: 9 lane-shifted, edge-masked copies of the slab
        # interior are stacked along the contraction dim, then one
        # (Cout, 9*Cin) x (9*Cin, Mb) MXU dot with f32 accumulation.
        for di in range(3):
            for dj in range(3):
                t = di * 3 + dj
                s = pad + (di - 1) * W + (dj - 1)          # static lane offset
                xim_ref[t * C:(t + 1) * C, :] = (
                    xs_ref[:, s:s + Mb] * m_ref[t:t + 1, :])
        return jnp.dot(w_ref[...], xim_ref[...],
                       preferred_element_type=jnp.float32) + b_ref[...]

    # ---- conv1 -> bn1 (folded) -> relu --------------------------------------
    xs_ref[:, pad:pad + Mb] = x_ref[...]
    y = jnp.maximum(conv3x3(w1_ref, b1_ref), 0.0)

    # ---- conv2 -> bn2 (folded) -> +identity -> relu (stays in VMEM) ---------
    xs_ref[:, pad:pad + Mb] = y.astype(cdt)                # cast once per conv
    out = conv3x3(w2_ref, b2_ref) + x_ref[...].astype(jnp.float32)
    out_ref[...] = jnp.maximum(out, 0.0).astype(out_ref.dtype)


# ---------------------------------------------------------------------------
# Host helpers
# ---------------------------------------------------------------------------
def _edge_masks(H, W, nb):
    """{0,1} per-tap lane masks that kill neighbour reads crossing an image edge."""
    idx = np.arange(nb * H * W)
    y = (idx % (H * W)) // W
    x = idx % W
    rows = []
    for di in range(3):
        for dj in range(3):
            oy, ox = di - 1, dj - 1
            ok = (y + oy >= 0) & (y + oy < H) & (x + ox >= 0) & (x + ox < W)
            rows.append(ok)
    return jnp.asarray(np.stack(rows).astype(np.float32))          # (9, nb*H*W)


def prepare_params(raw, C, compute_dtype=jnp.bfloat16, eps=1e-5):
    """Fold eval-mode BN into the conv weights; lay weights out as (Cout, 9*Cin)."""
    def fold(w, gamma, beta, mean, var):
        scale = gamma / jnp.sqrt(var + eps)
        bias = beta - mean * scale
        wf = w * scale[:, None, None, None]                        # (Cout, Cin, 3, 3)
        # (Cout, Cin, 3, 3) -> (Cout, 3, 3, Cin) -> (Cout, 9*Cin): K is tap-major,
        # matching the order the kernel stacks shifted copies into the im2col slab.
        wf = jnp.transpose(wf, (0, 2, 3, 1)).reshape(C, 9 * C)
        return wf.astype(compute_dtype), bias.reshape(C, 1).astype(jnp.float32)

    w1, b1 = fold(raw["w1"], raw["g1"], raw["beta1"], raw["m1"], raw["v1"])
    w2, b2 = fold(raw["w2"], raw["g2"], raw["beta2"], raw["m2"], raw["v2"])
    return dict(w1=w1, b1=b1, w2=w2, b2=b2, C=C, compute_dtype=compute_dtype)


# ---------------------------------------------------------------------------
# Forward: NCHW in -> NCHW out (single pallas_call)
# ---------------------------------------------------------------------------
def basic_block_forward(x_nchw, p, nb=8):
    N, C, H, W = x_nchw.shape
    assert C == p["C"]
    HW = H * W
    cdt = p["compute_dtype"]

    nb = max(1, min(nb, N))
    num_blocks = pl.cdiv(N, nb)
    Npad = num_blocks * nb
    Mb = nb * HW
    if num_blocks > 1 and Mb % 128 != 0:
        raise ValueError("nb*H*W must be a multiple of 128 when using >1 grid step")

    pad = 128                     # halo >= W+1; 128 keeps the interior store aligned
    L = pad + Mb + pad            # halo-padded slab length (multiple of 128)

    x = x_nchw
    if Npad != N:
        x = jnp.pad(x, ((0, Npad - N), (0, 0), (0, 0), (0, 0)))
    # NCHW -> (C, Npad*H*W): channels in sublanes, flattened batch*spatial in lanes.
    x2d = jnp.transpose(x, (1, 0, 2, 3)).reshape(C, Npad * HW).astype(cdt)

    masks = _edge_masks(H, W, nb).astype(cdt)                      # (9, Mb)

    kernel = functools.partial(_basic_block_kernel, W=W, pad=pad)
    out2d = pl.pallas_call(
        kernel,
        out_shape=jax.ShapeDtypeStruct((C, Npad * HW), cdt),
        grid=(num_blocks,),
        in_specs=[
            pl.BlockSpec((C, Mb), lambda n: (0, n)),               # activations
            pl.BlockSpec((C, 9 * C), lambda n: (0, 0)),            # w1 (resident)
            pl.BlockSpec((C, 1), lambda n: (0, 0)),                # b1
            pl.BlockSpec((C, 9 * C), lambda n: (0, 0)),            # w2 (resident)
            pl.BlockSpec((C, 1), lambda n: (0, 0)),                # b2
            pl.BlockSpec((9, Mb), lambda n: (0, 0)),               # edge masks
        ],
        out_specs=pl.BlockSpec((C, Mb), lambda n: (0, n)),
        scratch_shapes=[
            pltpu.VMEM((C, L), cdt),          # halo-padded activation slab
            pltpu.VMEM((9 * C, Mb), cdt),     # K-folded im2col buffer
        ],
        compiler_params=pltpu.CompilerParams(
            dimension_semantics=("parallel",)),
        # NOTE: set vmem_limit_bytes here if scaling to real ResNet widths.
    )(x2d, p["w1"], p["b1"], p["w2"], p["b2"], masks)

    out = out2d.reshape(C, Npad, H, W).transpose(1, 0, 2, 3)[:N]   # back to NCHW
    return out.astype(jnp.float32)


# ---------------------------------------------------------------------------
# Pure-JAX reference (lax.conv, eval-mode BN) for correctness checking
# ---------------------------------------------------------------------------
def _conv_ref(x, w, pad):
    return jax.lax.conv_general_dilated(
        x, w, (1, 1), [(pad, pad), (pad, pad)],
        dimension_numbers=("NCHW", "OIHW", "NCHW"))


def basic_block_ref(x, raw, eps=1e-5):
    def bn(t, g, b, m, v):
        s = g / jnp.sqrt(v + eps)
        return t * s[None, :, None, None] + (b - m * s)[None, :, None, None]

    out = jnp.maximum(
        bn(_conv_ref(x, raw["w1"], 1), raw["g1"], raw["beta1"], raw["m1"], raw["v1"]), 0.0)
    out = bn(_conv_ref(out, raw["w2"], 1), raw["g2"], raw["beta2"], raw["m2"], raw["v2"]) + x
    return jnp.maximum(out, 0.0)


# ---------------------------------------------------------------------------
if __name__ == "__main__":
    # BasicBlock(in_channel=32, out_channel=32, stride=1, shortcut=None)
    N, C, H, W = 2, 32, 16, 16

    key = jax.random.PRNGKey(0)
    ks = jax.random.split(key, 8)

    def bn_raw(k, ch):
        g = 1.0 + 0.1 * jax.random.normal(jax.random.fold_in(k, 0), (ch,), jnp.float32)
        b = 0.1 * jax.random.normal(jax.random.fold_in(k, 1), (ch,), jnp.float32)
        m = 0.05 * jax.random.normal(jax.random.fold_in(k, 2), (ch,), jnp.float32)
        v = 1.0 + 0.1 * jnp.abs(jax.random.normal(jax.random.fold_in(k, 3), (ch,), jnp.float32))
        return g, b, m, v

    w1 = 0.1 * jax.random.normal(ks[0], (C, C, 3, 3), jnp.float32)   # OIHW, bias=False
    w2 = 0.1 * jax.random.normal(ks[1], (C, C, 3, 3), jnp.float32)
    g1, beta1, m1, v1 = bn_raw(ks[2], C)
    g2, beta2, m2, v2 = bn_raw(ks[3], C)
    raw = dict(w1=w1, w2=w2, g1=g1, beta1=beta1, m1=m1, v1=v1,
               g2=g2, beta2=beta2, m2=m2, v2=v2)

    x = jax.random.normal(ks[4], (N, C, H, W), jnp.float32)

    ref = jax.block_until_ready(basic_block_ref(x, raw))

    # f32 MXU path: should match the lax.conv reference closely.
    p_f32 = prepare_params(raw, C, compute_dtype=jnp.float32)
    out_f32 = jax.block_until_ready(basic_block_forward(x, p_f32))
    assert out_f32.shape == (N, C, H, W), out_f32.shape
    err_f32 = float(jnp.max(jnp.abs(out_f32 - ref)))
    assert jnp.allclose(out_f32, ref, atol=5e-4, rtol=5e-4), err_f32

    # bf16 MXU path (default): bf16 weights/activations, f32 accumulation.
    p_bf16 = prepare_params(raw, C)                                  # bf16 by default
    out_bf16 = jax.block_until_ready(basic_block_forward(x, p_bf16))
    err_bf16 = float(jnp.max(jnp.abs(out_bf16 - ref)))
    assert jnp.allclose(out_bf16, ref, atol=1e-1, rtol=1e-1), err_bf16

    print("KERNEL_OK")
</pallas_src>

<mosaic_0001>
module attributes {stable_mosaic.version = 11 : i64} {
  func.func @_basic_block_kernel(%arg0: i32, %arg1: memref<32x512xf32, #tpu.memory_space<vmem>>, %arg2: memref<32x288xf32, #tpu.memory_space<vmem>>, %arg3: memref<32x1xf32, #tpu.memory_space<vmem>>, %arg4: memref<32x288xf32, #tpu.memory_space<vmem>>, %arg5: memref<32x1xf32, #tpu.memory_space<vmem>>, %arg6: memref<9x512xf32, #tpu.memory_space<vmem>>, %arg7: memref<32x512xf32, #tpu.memory_space<vmem>>, %arg8: memref<32x768xf32, #tpu.memory_space<vmem>>, %arg9: memref<288x512xf32, #tpu.memory_space<vmem>>) attributes {dimension_semantics = [#tpu.dimension_semantics<parallel>], iteration_bounds = array<i64: 1>, scalar_prefetch = 0 : i64, scratch_operands = 2 : i64, tpu.core_type = #tpu.core_type<tc>, window_params = [{transform_indices = @transform_0, window_bounds = array<i64: 32, 512>}, {pipeline_mode = #tpu.pipeline_mode<synchronous>, transform_indices = @transform_1, window_bounds = array<i64: 32, 288>}, {pipeline_mode = #tpu.pipeline_mode<synchronous>, transform_indices = @transform_2, window_bounds = array<i64: 32, 1>}, {pipeline_mode = #tpu.pipeline_mode<synchronous>, transform_indices = @transform_3, window_bounds = array<i64: 32, 288>}, {pipeline_mode = #tpu.pipeline_mode<synchronous>, transform_indices = @transform_4, window_bounds = array<i64: 32, 1>}, {pipeline_mode = #tpu.pipeline_mode<synchronous>, transform_indices = @transform_5, window_bounds = array<i64: 9, 512>}, {transform_indices = @transform_6, window_bounds = array<i64: 32, 512>}]} {
    %cst = arith.constant 0.000000e+00 : f32
    %0 = vector.broadcast %cst : f32 to vector<32x128xf32>
    %c0 = arith.constant 0 : index
    %c0_0 = arith.constant 0 : index
    %1 = vector.load %arg8[%c0, %c0_0] : memref<32x768xf32, #tpu.memory_space<vmem>>, vector<32x128xf32>
    tpu.vector_store %arg8[%c0, %c0_0], %0 {strides = array<i32>} : memref<32x768xf32, #tpu.memory_space<vmem>>, vector<32x128xf32>,
    %cst_1 = arith.constant 0.000000e+00 : f32
    %2 = vector.broadcast %cst_1 : f32 to vector<32x128xf32>
    %c0_2 = arith.constant 0 : index
    %c640 = arith.constant 640 : index
    %3 = vector.load %arg8[%c0_2, %c640] : memref<32x768xf32, #tpu.memory_space<vmem>>, vector<32x128xf32>
    tpu.vector_store %arg8[%c0_2, %c640], %2 {strides = array<i32>} : memref<32x768xf32, #tpu.memory_space<vmem>>, vector<32x128xf32>,
    %c0_3 = arith.constant 0 : index
    %c0_4 = arith.constant 0 : index
    %4 = vector.load %arg1[%c0_3, %c0_4] : memref<32x512xf32, #tpu.memory_space<vmem>>, vector<32x512xf32>
    %c0_5 = arith.constant 0 : index
    %c128 = arith.constant 128 : index
    %5 = vector.load %arg8[%c0_5, %c128] : memref<32x768xf32, #tpu.memory_space<vmem>>, vector<32x512xf32>
    tpu.vector_store %arg8[%c0_5, %c128], %4 {strides = array<i32>} : memref<32x768xf32, #tpu.memory_space<vmem>>, vector<32x512xf32>,
    %c0_6 = arith.constant 0 : index
    %c111 = arith.constant 111 : index
    %6 = vector.load %arg8[%c0_6, %c111] : memref<32x768xf32, #tpu.memory_space<vmem>>, vector<32x512xf32>
    %c0_7 = arith.constant 0 : index
    %c0_8 = arith.constant 0 : index
    %7 = vector.load %arg6[%c0_7, %c0_8] : memref<9x512xf32, #tpu.memory_space<vmem>>, vector<1x512xf32>
    %8 = vector.broadcast %7 : vector<1x512xf32> to vector<32x512xf32>
    %9 = arith.mulf %6, %8 : vector<32x512xf32>
    %c0_9 = arith.constant 0 : index
    %c0_10 = arith.constant 0 : index
    %10 = vector.load %arg9[%c0_9, %c0_10] : memref<288x512xf32, #tpu.memory_space<vmem>>, vector<32x512xf32>
    tpu.vector_store %arg9[%c0_9, %c0_10], %9 {strides = array<i32>} : memref<288x512xf32, #tpu.memory_space<vmem>>, vector<32x512xf32>,
    %c0_11 = arith.constant 0 : index
    %c112 = arith.constant 112 : index
    %11 = vector.load %arg8[%c0_11, %c112] : memref<32x768xf32, #tpu.memory_space<vmem>>, vector<32x512xf32>
    %c1 = arith.constant 1 : index
    %c0_12 = arith.constant 0 : index
    %12 = vector.load %arg6[%c1, %c0_12] : memref<9x512xf32, #tpu.memory_space<vmem>>, vector<1x512xf32>
    %13 = vector.broadcast %12 : vector<1x512xf32> to vector<32x512xf32>
    %14 = arith.mulf %11, %13 : vector<32x512xf32>
    %c32 = arith.constant 32 : index
    %c0_13 = arith.constant 0 : index
    %15 = vector.load %arg9[%c32, %c0_13] : memref<288x512xf32, #tpu.memory_space<vmem>>, vector<32x512xf32>
    tpu.vector_store %arg9[%c32, %c0_13], %14 {strides = array<i32>} : memref<288x512xf32, #tpu.memory_space<vmem>>, vector<32x512xf32>,
    %c0_14 = arith.constant 0 : index
    %c113 = arith.constant 113 : index
    %16 = vector.load %arg8[%c0_14, %c113] : memref<32x768xf32, #tpu.memory_space<vmem>>, vector<32x512xf32>
    %c2 = arith.constant 2 : index
    %c0_15 = arith.constant 0 : index
    %17 = vector.load %arg6[%c2, %c0_15] : memref<9x512xf32, #tpu.memory_space<vmem>>, vector<1x512xf32>
    %18 = vector.broadcast %17 : vector<1x512xf32> to vector<32x512xf32>
    %19 = arith.mulf %16, %18 : vector<32x512xf32>
    %c64 = arith.constant 64 : index
    %c0_16 = arith.constant 0 : index
    %20 = vector.load %arg9[%c64, %c0_16] : memref<288x512xf32, #tpu.memory_space<vmem>>, vector<32x512xf32>
    tpu.vector_store %arg9[%c64, %c0_16], %19 {strides = array<i32>} : memref<288x512xf32, #tpu.memory_space<vmem>>, vector<32x512xf32>,
    %c0_17 = arith.constant 0 : index
    %c127 = arith.constant 127 : index
    %21 = vector.load %arg8[%c0_17, %c127] : memref<32x768xf32, #tpu.memory_space<vmem>>, vector<32x512xf32>
    %c3 = arith.constant 3 : index
    %c0_18 = arith.constant 0 : index
    %22 = vector.load %arg6[%c3, %c0_18] : memref<9x512xf32, #tpu.memory_space<vmem>>, vector<1x512xf32>
    %23 = vector.broadcast %22 : vector<1x512xf32> to vector<32x512xf32>
    %24 = arith.mulf %21, %23 : vector<32x512xf32>
    %c96 = arith.constant 96 : index
    %c0_19 = arith.constant 0 : index
    %25 = vector.load %arg9[%c96, %c0_19] : memref<288x512xf32, #tpu.memory_space<vmem>>, vector<32x512xf32>
    tpu.vector_store %arg9[%c96, %c0_19], %24 {strides = array<i32>} : memref<288x512xf32, #tpu.memory_space<vmem>>, vector<32x512xf32>,
    %c0_20 = arith.constant 0 : index
    %c128_21 = arith.constant 128 : index
    %26 = vector.load %arg8[%c0_20, %c128_21] : memref<32x768xf32, #tpu.memory_space<vmem>>, vector<32x512xf32>
    %c4 = arith.constant 4 : index
    %c0_22 = arith.constant 0 : index
    %27 = vector.load %arg6[%c4, %c0_22] : memref<9x512xf32, #tpu.memory_space<vmem>>, vector<1x512xf32>
    %28 = vector.broadcast %27 : vector<1x512xf32> to vector<32x512xf32>
    %29 = arith.mulf %26, %28 : vector<32x512xf32>
    %c128_23 = arith.constant 128 : index
    %c0_24 = arith.constant 0 : index
    %30 = vector.load %arg9[%c128_23, %c0_24] : memref<288x512xf32, #tpu.memory_space<vmem>>, vector<32x512xf32>
    tpu.vector_store %arg9[%c128_23, %c0_24], %29 {strides = array<i32>} : memref<288x512xf32, #tpu.memory_space<vmem>>, vector<32x512xf32>,
    %c0_25 = arith.constant 0 : index
    %c129 = arith.constant 129 : index
    %31 = vector.load %arg8[%c0_25, %c129] : memref<32x768xf32, #tpu.memory_space<vmem>>, vector<32x512xf32>
    %c5 = arith.constant 5 : index
    %c0_26 = arith.constant 0 : index
    %32 = vector.load %arg6[%c5, %c0_26] : memref<9x512xf32, #tpu.memory_space<vmem>>, vector<1x512xf32>
    %33 = vector.broadcast %32 : vector<1x512xf32> to vector<32x512xf32>
    %34 = arith.mulf %31, %33 : vector<32x512xf32>
    %c160 = arith.constant 160 : index
    %c0_27 = arith.constant 0 : index
    %35 = vector.load %arg9[%c160, %c0_27] : memref<288x512xf32, #tpu.memory_space<vmem>>, vector<32x512xf32>
    tpu.vector_store %arg9[%c160, %c0_27], %34 {strides = array<i32>} : memref<288x512xf32, #tpu.memory_space<vmem>>, vector<32x512xf32>,
    %c0_28 = arith.constant 0 : index
    %c143 = arith.constant 143 : index
    %36 = vector.load %arg8[%c0_28, %c143] : memref<32x768xf32, #tpu.memory_space<vmem>>, vector<32x512xf32>
    %c6 = arith.constant 6 : index
    %c0_29 = arith.constant 0 : index
    %37 = vector.load %arg6[%c6, %c0_29] : memref<9x512xf32, #tpu.memory_space<vmem>>, vector<1x512xf32>
    %38 = vector.broadcast %37 : vector<1x512xf32> to vector<32x512xf32>
    %39 = arith.mulf %36, %38 : vector<32x512xf32>
    %c192 = arith.constant 192 : index
    %c0_30 = arith.constant 0 : index
    %40 = vector.load %arg9[%c192, %c0_30] : memref<288x512xf32, #tpu.memory_space<vmem>>, vector<32x512xf32>
    tpu.vector_store %arg9[%c192, %c0_30], %39 {strides = array<i32>} : memref<288x512xf32, #tpu.memory_space<vmem>>, vector<32x512xf32>,
    %c0_31 = arith.constant 0 : index
    %c144 = arith.constant 144 : index
    %41 = vector.load %arg8[%c0_31, %c144] : memref<32x768xf32, #tpu.memory_space<vmem>>, vector<32x512xf32>
    %c7 = arith.constant 7 : index
    %c0_32 = arith.constant 0 : index
    %42 = vector.load %arg6[%c7, %c0_32] : memref<9x512xf32, #tpu.memory_space<vmem>>, vector<1x512xf32>
    %43 = vector.broadcast %42 : vector<1x512xf32> to vector<32x512xf32>
    %44 = arith.mulf %41, %43 : vector<32x512xf32>
    %c224 = arith.constant 224 : index
    %c0_33 = arith.constant 0 : index
    %45 = vector.load %arg9[%c224, %c0_33] : memref<288x512xf32, #tpu.memory_space<vmem>>, vector<32x512xf32>
    tpu.vector_store %arg9[%c224, %c0_33], %44 {strides = array<i32>} : memref<288x512xf32, #tpu.memory_space<vmem>>, vector<32x512xf32>,
    %c0_34 = arith.constant 0 : index
    %c145 = arith.constant 145 : index
    %46 = vector.load %arg8[%c0_34, %c145] : memref<32x768xf32, #tpu.memory_space<vmem>>, vector<32x512xf32>
    %c8 = arith.constant 8 : index
    %c0_35 = arith.constant 0 : index
    %47 = vector.load %arg6[%c8, %c0_35] : memref<9x512xf32, #tpu.memory_space<vmem>>, vector<1x512xf32>
    %48 = vector.broadcast %47 : vector<1x512xf32> to vector<32x512xf32>
    %49 = arith.mulf %46, %48 : vector<32x512xf32>
    %c256 = arith.constant 256 : index
    %c0_36 = arith.constant 0 : index
    %50 = vector.load %arg9[%c256, %c0_36] : memref<288x512xf32, #tpu.memory_space<vmem>>, vector<32x512xf32>
    tpu.vector_store %arg9[%c256, %c0_36], %49 {strides = array<i32>} : memref<288x512xf32, #tpu.memory_space<vmem>>, vector<32x512xf32>,
    %c0_37 = arith.constant 0 : index
    %c0_38 = arith.constant 0 : index
    %51 = vector.load %arg2[%c0_37, %c0_38] : memref<32x288xf32, #tpu.memory_space<vmem>>, vector<32x288xf32>
    %c0_39 = arith.constant 0 : index
    %c0_40 = arith.constant 0 : index
    %52 = vector.load %arg9[%c0_39, %c0_40] : memref<288x512xf32, #tpu.memory_space<vmem>>, vector<288x512xf32>
    %cst_41 = arith.constant dense<0.000000e+00> : vector<32x512xf32>
    %53 = tpu.matmul %51, %52, %cst_41 {dimension_numbers = #tpu.dot_dimension_numbers<[1], [0], [0], [1], [0, 0, 1, 1], [], []>} : vector<32x288xf32>, vector<288x512xf32>, vector<32x512xf32> -> vector<32x512xf32>
    %c0_42 = arith.constant 0 : index
    %c0_43 = arith.constant 0 : index
    %54 = vector.load %arg3[%c0_42, %c0_43] : memref<32x1xf32, #tpu.memory_space<vmem>>, vector<32x1xf32>
    %55 = vector.broadcast %54 : vector<32x1xf32> to vector<32x512xf32>
    %56 = arith.addf %53, %55 : vector<32x512xf32>
    %cst_44 = arith.constant 0.000000e+00 : f32
    %57 = vector.broadcast %cst_44 : f32 to vector<32x512xf32>
    %58 = arith.maximumf %56, %57 : vector<32x512xf32>
    %c0_45 = arith.constant 0 : index
    %c128_46 = arith.constant 128 : index
    %59 = vector.load %arg8[%c0_45, %c128_46] : memref<32x768xf32, #tpu.memory_space<vmem>>, vector<32x512xf32>
    tpu.vector_store %arg8[%c0_45, %c128_46], %58 {strides = array<i32>} : memref<32x768xf32, #tpu.memory_space<vmem>>, vector<32x512xf32>,
    %c0_47 = arith.constant 0 : index
    %c111_48 = arith.constant 111 : index
    %60 = vector.load %arg8[%c0_47, %c111_48] : memref<32x768xf32, #tpu.memory_space<vmem>>, vector<32x512xf32>
    %c0_49 = arith.constant 0 : index
    %c0_50 = arith.constant 0 : index
    %61 = vector.load %arg6[%c0_49, %c0_50] : memref<9x512xf32, #tpu.memory_space<vmem>>, vector<1x512xf32>
    %62 = vector.broadcast %61 : vector<1x512xf32> to vector<32x512xf32>
    %63 = arith.mulf %60, %62 : vector<32x512xf32>
    %c0_51 = arith.constant 0 : index
    %c0_52 = arith.constant 0 : index
    %64 = vector.load %arg9[%c0_51, %c0_52] : memref<288x512xf32, #tpu.memory_space<vmem>>, vector<32x512xf32>
    tpu.vector_store %arg9[%c0_51, %c0_52], %63 {strides = array<i32>} : memref<288x512xf32, #tpu.memory_space<vmem>>, vector<32x512xf32>,
    %c0_53 = arith.constant 0 : index
    %c112_54 = arith.constant 112 : index
    %65 = vector.load %arg8[%c0_53, %c112_54] : memref<32x768xf32, #tpu.memory_space<vmem>>, vector<32x512xf32>
    %c1_55 = arith.constant 1 : index
    %c0_56 = arith.constant 0 : index
    %66 = vector.load %arg6[%c1_55, %c0_56] : memref<9x512xf32, #tpu.memory_space<vmem>>, vector<1x512xf32>
    %67 = vector.broadcast %66 : vector<1x512xf32> to vector<32x512xf32>
    %68 = arith.mulf %65, %67 : vector<32x512xf32>
    %c32_57 = arith.constant 32 : index
    %c0_58 = arith.constant 0 : index
    %69 = vector.load %arg9[%c32_57, %c0_58] : memref<288x512xf32, #tpu.memory_space<vmem>>, vector<32x512xf32>
    tpu.vector_store %arg9[%c32_57, %c0_58], %68 {strides = array<i32>} : memref<288x512xf32, #tpu.memory_space<vmem>>, vector<32x512xf32>,
    %c0_59 = arith.constant 0 : index
    %c113_60 = arith.constant 113 : index
    %70 = vector.load %arg8[%c0_59, %c113_60] : memref<32x768xf32, #tpu.memory_space<vmem>>, vector<32x512xf32>
    %c2_61 = arith.constant 2 : index
    %c0_62 = arith.constant 0 : index
    %71 = vector.load %arg6[%c2_61, %c0_62] : memref<9x512xf32, #tpu.memory_space<vmem>>, vector<1x512xf32>
    %72 = vector.broadcast %71 : vector<1x512xf32> to vector<32x512xf32>
    %73 = arith.mulf %70, %72 : vector<32x512xf32>
    %c64_63 = arith.constant 64 : index
    %c0_64 = arith.constant 0 : index
    %74 = vector.load %arg9[%c64_63, %c0_64] : memref<288x512xf32, #tpu.memory_space<vmem>>, vector<32x512xf32>
    tpu.vector_store %arg9[%c64_63, %c0_64], %73 {strides = array<i32>} : memref<288x512xf32, #tpu.memory_space<vmem>>, vector<32x512xf32>,
    %c0_65 = arith.constant 0 : index
    %c127_66 = arith.constant 127 : index
    %75 = vector.load %arg8[%c0_65, %c127_66] : memref<32x768xf32, #tpu.memory_space<vmem>>, vector<32x512xf32>
    %c3_67 = arith.constant 3 : index
    %c0_68 = arith.constant 0 : index
    %76 = vector.load %arg6[%c3_67, %c0_68] : memref<9x512xf32, #tpu.memory_space<vmem>>, vector<1x512xf32>
    %77 = vector.broadcast %76 : vector<1x512xf32> to vector<32x512xf32>
    %78 = arith.mulf %75, %77 : vector<32x512xf32>
    %c96_69 = arith.constant 96 : index
    %c0_70 = arith.constant 0 : index
    %79 = vector.load %arg9[%c96_69, %c0_70] : memref<288x512xf32, #tpu.memory_space<vmem>>, vector<32x512xf32>
    tpu.vector_store %arg9[%c96_69, %c0_70], %78 {strides = array<i32>} : memref<288x512xf32, #tpu.memory_space<vmem>>, vector<32x512xf32>,
    %c0_71 = arith.constant 0 : index
    %c128_72 = arith.constant 128 : index
    %80 = vector.load %arg8[%c0_71, %c128_72] : memref<32x768xf32, #tpu.memory_space<vmem>>, vector<32x512xf32>
    %c4_73 = arith.constant 4 : index
    %c0_74 = arith.constant 0 : index
    %81 = vector.load %arg6[%c4_73, %c0_74] : memref<9x512xf32, #tpu.memory_space<vmem>>, vector<1x512xf32>
    %82 = vector.broadcast %81 : vector<1x512xf32> to vector<32x512xf32>
    %83 = arith.mulf %80, %82 : vector<32x512xf32>
    %c128_75 = arith.constant 128 : index
    %c0_76 = arith.constant 0 : index
    %84 = vector.load %arg9[%c128_75, %c0_76] : memref<288x512xf32, #tpu.memory_space<vmem>>, vector<32x512xf32>
    tpu.vector_store %arg9[%c128_75, %c0_76], %83 {strides = array<i32>} : memref<288x512xf32, #tpu.memory_space<vmem>>, vector<32x512xf32>,
    %c0_77 = arith.constant 0 : index
    %c129_78 = arith.constant 129 : index
    %85 = vector.load %arg8[%c0_77, %c129_78] : memref<32x768xf32, #tpu.memory_space<vmem>>, vector<32x512xf32>
    %c5_79 = arith.constant 5 : index
    %c0_80 = arith.constant 0 : index
    %86 = vector.load %arg6[%c5_79, %c0_80] : memref<9x512xf32, #tpu.memory_space<vmem>>, vector<1x512xf32>
    %87 = vector.broadcast %86 : vector<1x512xf32> to vector<32x512xf32>
    %88 = arith.mulf %85, %87 : vector<32x512xf32>
    %c160_81 = arith.constant 160 : index
    %c0_82 = arith.constant 0 : index
    %89 = vector.load %arg9[%c160_81, %c0_82] : memref<288x512xf32, #tpu.memory_space<vmem>>, vector<32x512xf32>
    tpu.vector_store %arg9[%c160_81, %c0_82], %88 {strides = array<i32>} : memref<288x512xf32, #tpu.memory_space<vmem>>, vector<32x512xf32>,
    %c0_83 = arith.constant 0 : index
    %c143_84 = arith.constant 143 : index
    %90 = vector.load %arg8[%c0_83, %c143_84] : memref<32x768xf32, #tpu.memory_space<vmem>>, vector<32x512xf32>
    %c6_85 = arith.constant 6 : index
    %c0_86 = arith.constant 0 : index
    %91 = vector.load %arg6[%c6_85, %c0_86] : memref<9x512xf32, #tpu.memory_space<vmem>>, vector<1x512xf32>
    %92 = vector.broadcast %91 : vector<1x512xf32> to vector<32x512xf32>
    %93 = arith.mulf %90, %92 : vector<32x512xf32>
    %c192_87 = arith.constant 192 : index
    %c0_88 = arith.constant 0 : index
    %94 = vector.load %arg9[%c192_87, %c0_88] : memref<288x512xf32, #tpu.memory_space<vmem>>, vector<32x512xf32>
    tpu.vector_store %arg9[%c192_87, %c0_88], %93 {strides = array<i32>} : memref<288x512xf32, #tpu.memory_space<vmem>>, vector<32x512xf32>,
    %c0_89 = arith.constant 0 : index
    %c144_90 = arith.constant 144 : index
    %95 = vector.load %arg8[%c0_89, %c144_90] : memref<32x768xf32, #tpu.memory_space<vmem>>, vector<32x512xf32>
    %c7_91 = arith.constant 7 : index
    %c0_92 = arith.constant 0 : index
    %96 = vector.load %arg6[%c7_91, %c0_92] : memref<9x512xf32, #tpu.memory_space<vmem>>, vector<1x512xf32>
    %97 = vector.broadcast %96 : vector<1x512xf32> to vector<32x512xf32>
    %98 = arith.mulf %95, %97 : vector<32x512xf32>
    %c224_93 = arith.constant 224 : index
    %c0_94 = arith.constant 0 : index
    %99 = vector.load %arg9[%c224_93, %c0_94] : memref<288x512xf32, #tpu.memory_space<vmem>>, vector<32x512xf32>
    tpu.vector_store %arg9[%c224_93, %c0_94], %98 {strides = array<i32>} : memref<288x512xf32, #tpu.memory_space<vmem>>, vector<32x512xf32>,
    %c0_95 = arith.constant 0 : index
    %c145_96 = arith.constant 145 : index
    %100 = vector.load %arg8[%c0_95, %c145_96] : memref<32x768xf32, #tpu.memory_space<vmem>>, vector<32x512xf32>
    %c8_97 = arith.constant 8 : index
    %c0_98 = arith.constant 0 : index
    %101 = vector.load %arg6[%c8_97, %c0_98] : memref<9x512xf32, #tpu.memory_space<vmem>>, vector<1x512xf32>
    %102 = vector.broadcast %101 : vector<1x512xf32> to vector<32x512xf32>
    %103 = arith.mulf %100, %102 : vector<32x512xf32>
    %c256_99 = arith.constant 256 : index
    %c0_100 = arith.constant 0 : index
    %104 = vector.load %arg9[%c256_99, %c0_100] : memref<288x512xf32, #tpu.memory_space<vmem>>, vector<32x512xf32>
    tpu.vector_store %arg9[%c256_99, %c0_100], %103 {strides = array<i32>} : memref<288x512xf32, #tpu.memory_space<vmem>>, vector<32x512xf32>,
    %c0_101 = arith.constant 0 : index
    %c0_102 = arith.constant 0 : index
    %105 = vector.load %arg4[%c0_101, %c0_102] : memref<32x288xf32, #tpu.memory_space<vmem>>, vector<32x288xf32>
    %c0_103 = arith.constant 0 : index
    %c0_104 = arith.constant 0 : index
    %106 = vector.load %arg9[%c0_103, %c0_104] : memref<288x512xf32, #tpu.memory_space<vmem>>, vector<288x512xf32>
    %cst_105 = arith.constant dense<0.000000e+00> : vector<32x512xf32>
    %107 = tpu.matmul %105, %106, %cst_105 {dimension_numbers = #tpu.dot_dimension_numbers<[1], [0], [0], [1], [0, 0, 1, 1], [], []>} : vector<32x288xf32>, vector<288x512xf32>, vector<32x512xf32> -> vector<32x512xf32>
    %c0_106 = arith.constant 0 : index
    %c0_107 = arith.constant 0 : index
    %108 = vector.load %arg5[%c0_106, %c0_107] : memref<32x1xf32, #tpu.memory_space<vmem>>, vector<32x1xf32>
    %109 = vector.broadcast %108 : vector<32x1xf32> to vector<32x512xf32>
    %110 = arith.addf %107, %109 : vector<32x512xf32>
    %c0_108 = arith.constant 0 : index
    %c0_109 = arith.constant 0 : index
    %111 = vector.load %arg1[%c0_108, %c0_109] : memref<32x512xf32, #tpu.memory_space<vmem>>, vector<32x512xf32>
    %112 = arith.addf %110, %111 : vector<32x512xf32>
    %cst_110 = arith.constant 0.000000e+00 : f32
    %113 = vector.broadcast %cst_110 : f32 to vector<32x512xf32>
    %114 = arith.maximumf %112, %113 : vector<32x512xf32>
    %c0_111 = arith.constant 0 : index
    %c0_112 = arith.constant 0 : index
    %115 = vector.load %arg7[%c0_111, %c0_112] : memref<32x512xf32, #tpu.memory_space<vmem>>, vector<32x512xf32>
    tpu.vector_store %arg7[%c0_111, %c0_112], %114 {strides = array<i32>} : memref<32x512xf32, #tpu.memory_space<vmem>>, vector<32x512xf32>,
    return
  }
  func.func @transform_0(%arg0: i32) -> (i32, i32) {
    %c0_i32 = arith.constant 0 : i32
    %c0_i32_0 = arith.constant 0 : i32
    return %c0_i32, %arg0 : i32, i32
  }
  func.func @transform_1(%arg0: i32) -> (i32, i32) {
    %c0_i32 = arith.constant 0 : i32
    %c0_i32_0 = arith.constant 0 : i32
    %c0_i32_1 = arith.constant 0 : i32
    return %c0_i32, %c0_i32_0 : i32, i32
  }
  func.func @transform_2(%arg0: i32) -> (i32, i32) {
    %c0_i32 = arith.constant 0 : i32
    %c0_i32_0 = arith.constant 0 : i32
    %c0_i32_1 = arith.constant 0 : i32
    return %c0_i32, %c0_i32_0 : i32, i32
  }
  func.func @transform_3(%arg0: i32) -> (i32, i32) {
    %c0_i32 = arith.constant 0 : i32
    %c0_i32_0 = arith.constant 0 : i32
    %c0_i32_1 = arith.constant 0 : i32
    return %c0_i32, %c0_i32_0 : i32, i32
  }
  func.func @transform_4(%arg0: i32) -> (i32, i32) {
    %c0_i32 = arith.constant 0 : i32
    %c0_i32_0 = arith.constant 0 : i32
    %c0_i32_1 = arith.constant 0 : i32
    return %c0_i32, %c0_i32_0 : i32, i32
  }
  func.func @transform_5(%arg0: i32) -> (i32, i32) {
    %c0_i32 = arith.constant 0 : i32
    %c0_i32_0 = arith.constant 0 : i32
    %c0_i32_1 = arith.constant 0 : i32
    return %c0_i32, %c0_i32_0 : i32, i32
  }
  func.func @transform_6(%arg0: i32) -> (i32, i32) {
    %c0_i32 = arith.constant 0 : i32
    %c0_i32_0 = arith.constant 0 : i32
    return %c0_i32, %arg0 : i32, i32
  }
}

</mosaic_0001>

<bundles_post_ra>
// kernel: tpu_custom_call.1
= control target key start
LH: loop header
LB: loop body
LE: loop exit
PB: predicated region body
PF: predicated region fallthrough
CT: control target
= control target key end

     0   :  { %11 = vsyncpa [#allocation5], 0  ;;  %s8199_s0 = inlined_call_operand.hbm [shape: f32[32,512], index: 0, kind: input, shape index: {}]   ;;  %s8200_s1 = inlined_call_operand.hbm [shape: f32[32,288], index: 1, kind: input, shape index: {}]   ;;  %s8201_s2 = inlined_call_operand.vmem [shape: f32[32,1], index: 2, kind: input, shape index: {}]   ;;  %s8202_s3 = inlined_call_operand.hbm [shape: f32[32,288], index: 3, kind: input, shape index: {}]   ;;  %s8203_s4 = inlined_call_operand.vmem [shape: f32[32,1], index: 4, kind: input, shape index: {}]   ;;  %s8204_s5 = inlined_call_operand.vmem [shape: f32[9,512], index: 5, kind: input, shape index: {}]   ;;  %s8205_s6 = inlined_call_operand.hbm [shape: f32[32,512], index: 6, kind: output, shape index: {}]  }
   0x1   :  { %12 = vsyncpa [#allocation8], 0  ;;  %s31_s23 = sshll.u32 %s8200_s1, 4  ;;  %s32_s23 = int_to_ptr.hbm [resolvable:$true] %s31_s23 }
   0x2   :  { %13 = vsyncpa [#allocation6], 0  ;;  %s5147_s24 = smov [#allocation7]   ;;  %s18_s28 = sshll.u32 %s8199_s0, 4  ;;  %s19_s28 = int_to_ptr.hbm [resolvable:$true] %s18_s28 }
   0x3   :  { %s33_s25 = sshll.u32 %s5147_s24, 4  ;;  %s5148_s29 = smov 384   ;;  %s34_s25 = int_to_ptr.vmem [resolvable:$true] %s33_s25 }
   0x4   :  { %s5149_s30 = smov 24   ;;  %s5150_s7 = smov [#allocation4]  }
   0x5   :  { %39 = dma.hbm_to_vmem [thread:$0]  %s32_s23, 1536, %s34_s25, [#allocation8], %s5148_s29, %s5148_s29, %s5149_s30  }
   0x6   :  { %s20_s8 = sshll.u32 %s5150_s7, 4  ;;  %s5151_s9 = smov 512   ;;  %s21_s8 = int_to_ptr.vmem [resolvable:$true] %s20_s8 }
   0x7   :  { %s5152_s10 = smov 32   ;;  %s46_s12 = sshll.u32 %s8202_s3, 4  ;;  %s47_s12 = int_to_ptr.hbm [resolvable:$true] %s46_s12 }
   0x8   :  { %26 = dma.hbm_to_vmem [thread:$0]  %s19_s28, 2048, %s21_s8, [#allocation5], %s5151_s9, %s5151_s9, %s5152_s10  }
   0x9   :  { %s5153_s13 = smov [#allocation9]  }
   0xa   :  { %s48_s0 = sshll.u32 %s5153_s13, 4  ;;  %s49_s0 = int_to_ptr.vmem [resolvable:$true] %s48_s0 }
   0xb   :  { %54 = dma.hbm_to_vmem [thread:$0]  %s47_s12, 1536, %s49_s0, [#allocation8], %s5148_s29, %s5148_s29, %s5149_s30  }
   0xc   :  { %5141 = dma.done.wait [#allocation5], 2048  }
   0xd   :  { %5142 = vsyncadd [#allocation5], 4294965248 }
   0xe   :  { %5143 = dma.done.wait [#allocation8], 3072  }
   0xf   :  { %5144 = vsyncadd [#allocation8], 4294964224  ;;  %v131_v0 = vld [vmem:[%s8204_s5] ss:$8 sm:$0xf]  ;;  %s5154_s3 = smov 111  }
  0x10   :  { %v135_v1 = vperm.slane %v131_v0, 2  ;;  %v133_v2 = vperm.slane %v131_v0, 0  ;;  %v4160_v3 = vld [vmem:[%s8204_s5 + $0x1] ss:$8 sm:$0xf]  ;;  %s5155_s18 = smov 112  }
  0x11   :  { %v306_v4 = vperm.slane %v4160_v3, 0  ;;  %v136_v5 = vperm.slane %v131_v0, 3  ;;  %v134_v6 = vperm.slane %v131_v0, 1  ;;  %v309_v7 = vperm.slane %v4160_v3, 3  ;;  %s5156_s21 = smov 113   ;;  %s5157_s24 = smov 127  }
  0x12   :  { %141 = vrot.lane.b32.xlu1 %v135_v1, %s5154_s3  ;;  %137 = vrot.lane.b32.xlu0 %v133_v2, %s5154_s3  ;;  %v308_v8 = vperm.slane %v4160_v3, 2  ;;  %v307_v9 = vperm.slane %v4160_v3, 1  ;;  %v4161_v10 = vld [vmem:[%s8204_s5 + $0x2] ss:$8 sm:$0xf]  ;;  %s5158_s25 = smov 16  }
  0x13   :  { %310 = vrot.lane.b32.xlu2 %v306_v4, %s5155_s18  ;;  %v480_v11 = vperm.slane %v4161_v10, 1  ;;  %v479_v12 = vperm.slane %v4161_v10, 0  ;;  %v481_v13 = vperm.slane %v4161_v10, 2  ;;  %v4162_v14 = vld [vmem:[%s8204_s5 + $0x3] ss:$8 sm:$0xf] }
  0x14   :  { %v654_v15 = vperm.slane %v4162_v14, 2  ;;  %v482_v16 = vperm.slane %v4161_v10, 3  ;;  %v652_v17 = vperm.slane %v4162_v14, 0  ;;  %v653_v18 = vperm.slane %v4162_v14, 1  ;;  %v5244_v22 = vld [vmem:[#allocation4 + $0x58] sm:$0xff]  ;;  %s5159_s26 = smov 17  }
  0x15   :  { %v655_v19 = vperm.slane %v4162_v14, 3  ;;  %v5252_v28 = vld [vmem:[#allocation4 + $0x18] sm:$0xff]  ;;  %vm145_vm0 = vcmask 908288   ;;  %v5276_v41 = vld [vmem:[#allocation4] sm:$0xff]  ;;  %v5288_v47 = vld [vmem:[#allocation4 + $0x8] sm:$0xff]  ;;  %s5160_s27 = smov 15  }
  0x16   :  { %v5290_v48 = vld [vmem:[#allocation4 + $0x10] sm:$0xff]  ;;  %v5309_v60 = vld [vmem:[#allocation4 + $0x20] sm:$0xff]  ;;  %v5311_v61 = vld [vmem:[#allocation4 + $0x28] sm:$0xff]  ;;  %vm318_vm1 = vcmask 916480   ;;  %s5161_s28 = smov 1   ;;  %vm491_vm2 = vcmask 924672  }
  0x17   :  { %v5315_v62 = vld [vmem:[#allocation4 + $0x30] sm:$0xff]  ;;  %v5317_v63 = vld [vmem:[#allocation4 + $0x38] sm:$0xff]  ;;  %v5334_v10 = vld [vmem:[#allocation4 + $0x48] sm:$0xff]  ;;  %vm664_vm3 = vcmask 1039360   ;;  %vm753_vm4 = vcmask 7168   ;;  %vm580_vm5 = vcmask 121856  }
  0x18   :  { %vm407_vm6 = vcmask 130048   ;;  %vm234_vm7 = vcmask 138240   ;;  %vm1725_vm8 = vcmask 261120   ;;  %s4146_s11 = sshll.u32 %s8205_s6, 4  ;;  %s4147_s11 = int_to_ptr.hbm [resolvable:$true] %s4146_s11 }
  0x1a   :  { %143 = vrot.lane.b32.xlu1 %v136_v5, %s5154_s3  ;;  %139 = vrot.lane.b32.xlu0 %v134_v6, %s5154_s3 }
  0x1b   :  { %316 = vrot.lane.b32.xlu2 %v309_v7, %s5155_s18 }
  0x22   :  { %314 = vrot.lane.b32.xlu1 %v308_v8, %s5155_s18  ;;  %312 = vrot.lane.b32.xlu0 %v307_v9, %s5155_s18 }
  0x23   :  { %485 = vrot.lane.b32.xlu2 %v480_v11, %s5156_s21  ;;  %v5336_v11 = vld [vmem:[#allocation4 + $0x50] sm:$0xff] }
  0x2a   :  { %483 = vrot.lane.b32.xlu1 %v479_v12, %s5156_s21  ;;  %487 = vrot.lane.b32.xlu0 %v481_v13, %s5156_s21  ;;  %v5338_v12 = vld [vmem:[#allocation4 + $0x40] sm:$0xff] }
  0x2b   :  { %660 = vrot.lane.b32.xlu2 %v654_v15, %s5157_s24 }
  0x32   :  { %489 = vrot.lane.b32.xlu1 %v482_v16, %s5156_s21  ;;  %656 = vrot.lane.b32.xlu0 %v652_v17, %s5157_s24 }
  0x3a   :  { %658 = vrot.lane.b32.xlu1 %v653_v18, %s5157_s24  ;;  %662 = vrot.lane.b32.xlu0 %v655_v19, %s5157_s24 }
  0x6d   :  { %v5239_v20 = vpop.permute.xlu2 %310 }
  0x6e   :  { %v5242_v21 = vmul.f32 0.0, %v5239_v20 }
  0x75   :  { %v5246_v23 = vpop.permute.xlu2 %316 }
  0x76   :  { %v341_v24 = vmul.f32 %v5246_v23, %v5244_v22  ;;  %v331_v36 = vmul.f32 %v5246_v23, %v5252_v28 }
  0x78   :  { %v4240_v25 = vpack.i.bf16 %v5242_v21, %v341_v24  ;;  %v4235_v39 = vpack.i.bf16 %v5242_v21, %v331_v36 }
  0x7a   :  { %4241 = vrot.lane.b32.xlu1 %v4240_v25, %s5158_s25  ;;  %v5355_v25 = vld [vmem:[#allocation4 + $0x78] sm:$0xff] }
  0x84   :  { %v142_v26 = vpop.permute.xlu1 %141  ;;  %v138_v27 = vpop.permute.xlu0 %137 }
  0x85   :  { %v5256_v31 = vmul.f32 0.0, %v138_v27 }
  0x8c   :  { %v5254_v29 = vpop.permute.xlu1 %143  ;;  %v140_v30 = vpop.permute.xlu0 %139 }
  0x8d   :  { %v168_v32 = vmul.f32 %v5254_v29, %v5244_v22  ;;  %v158_v33 = vmul.f32 %v5254_v29, %v5252_v28  ;;  %v5274_v40 = vsel %vm145_vm0, %v138_v27, %v140_v30  ;;  %v147_v46 = vsel %vm145_vm0, %v140_v30, %v142_v26  ;;  %v5359_v27 = vld [vmem:[#allocation4 + $0x68] sm:$0xff] }
  0x8e   :  { %v155_v42 = vmul.f32 %v5274_v40, %v5276_v41  ;;  %v148_v49 = vsel %vm145_vm0, %v142_v26, %v5254_v29  ;;  %v156_v52 = vmul.f32 %v147_v46, %v5288_v47  ;;  %v160_v0 = vmul.f32 %v5274_v40, %v5309_v60  ;;  %v5357_v26 = vld [vmem:[#allocation4 + $0x60] sm:$0xff] }
  0x8f   :  { %v4230_v34 = vpack.i.bf16 %v5256_v31, %v168_v32  ;;  %v4225_v35 = vpack.i.bf16 %v5256_v31, %v158_v33  ;;  %v157_v53 = vmul.f32 %v148_v49, %v5290_v48  ;;  %v161_v1 = vmul.f32 %v147_v46, %v5311_v61 }
  0x90   :  { %v4260_v45 = vpack.i.bf16 %v155_v42, %v5256_v31  ;;  %v162_v3 = vmul.f32 %v148_v49, %v5315_v62  ;;  %v163_v4 = vmul.f32 %v5254_v29, %v5317_v63  ;;  %v166_v14 = vmul.f32 %v147_v46, %v5334_v10 }
  0x91   :  { %4231 = vrot.lane.b32.xlu2 %v4230_v34, %s5159_s26  ;;  %4226 = vrot.lane.b32.xlu0 %v4225_v35, %s5159_s26  ;;  %v4265_v59 = vpack.i.bf16 %v157_v53, %v156_v52  ;;  %v4270_v7 = vpack.i.bf16 %v161_v1, %v160_v0  ;;  %v167_v15 = vmul.f32 %v148_v49, %v5336_v11 }
  0x92   :  { %v4275_v9 = vpack.i.bf16 %v163_v4, %v162_v3  ;;  %v165_v16 = vmul.f32 %v5274_v40, %v5338_v12  ;;  %v173_v32 = vmul.f32 %v5254_v29, %v5355_v25  ;;  %v170_v33 = vmul.f32 %v5274_v40, %v5357_v26 }
  0x93   :  { %v4285_v18 = vpack.i.bf16 %v167_v15, %v166_v14  ;;  %v171_v34 = vmul.f32 %v147_v46, %v5359_v27 }
  0x94   :  { %v5268_v37 = vpop.permute.xlu1 %314  ;;  %v5270_v38 = vpop.permute.xlu0 %312  ;;  %v4280_v19 = vpack.i.bf16 %v165_v16, %v5256_v31 }
  0x95   :  { %v319_v13 = vsel %vm318_vm1, %v5239_v20, %v5270_v38  ;;  %v5352_v20 = vld [vmem:[#allocation4 + $0x70] sm:$0xff]  ;;  %v320_v30 = vsel %vm318_vm1, %v5270_v38, %v5268_v37  ;;  %v486_v38 = vpop.permute.xlu2 %485  ;;  %v4290_v42 = vpack.i.bf16 %v171_v34, %v170_v33 }
  0x96   :  { %v338_v17 = vmul.f32 %v319_v13, %v5338_v12  ;;  %v172_v31 = vmul.f32 %v148_v49, %v5352_v20  ;;  %v343_v35 = vmul.f32 %v319_v13, %v5357_v26  ;;  %v344_v36 = vmul.f32 %v320_v30, %v5359_v27 }
  0x97   :  { %v329_v40 = vmul.f32 %v320_v30, %v5288_v47  ;;  %v328_v52 = vmul.f32 %v319_v13, %v5276_v41 }
  0x98   :  { %v4320_v24 = vpack.i.bf16 %v338_v17, %v5242_v21  ;;  %v4330_v49 = vpack.i.bf16 %v344_v36, %v343_v35 }
  0x99   :  { %4236 = vrot.lane.b32.xlu2 %v4235_v39, %s5158_s25  ;;  %v4295_v39 = vpack.i.bf16 %v173_v32, %v172_v31 }
  0x9c   :  { %v5281_v43 = vpop.permute.xlu1 %483  ;;  %v5283_v44 = vpop.permute.xlu0 %487 }
  0x9d   :  { %v5301_v54 = vmul.f32 0.0, %v5281_v43  ;;  %v492_v29 = vsel %vm491_vm2, %v5281_v43, %v486_v38  ;;  %v493_v43 = vsel %vm491_vm2, %v486_v38, %v5283_v44  ;;  %v661_v33 = vpop.permute.xlu2 %660 }
  0x9e   :  { %v501_v53 = vmul.f32 %v492_v29, %v5276_v41  ;;  %v506_v0 = vmul.f32 %v492_v29, %v5309_v60  ;;  %v507_v1 = vmul.f32 %v493_v43, %v5311_v61  ;;  %v512_v15 = vmul.f32 %v493_v43, %v5334_v10 }
  0xa1   :  { %4261 = vrot.lane.b32.xlu2 %v4260_v45, %s5159_s26  ;;  %v321_v45 = vsel %vm318_vm1, %v5268_v37, %v5246_v23  ;;  %v4300_v37 = vpack.i.bf16 %v328_v52, %v5242_v21  ;;  %v334_v21 = vmul.f32 %v320_v30, %v5311_v61 }
  0xa2   :  { %v330_v46 = vmul.f32 %v321_v45, %v5290_v48 }
  0xa4   :  { %v5294_v50 = vpop.permute.xlu1 %489  ;;  %v5296_v51 = vpop.permute.xlu0 %656 }
  0xa5   :  { %v504_v55 = vmul.f32 %v5294_v50, %v5252_v28  ;;  %v514_v56 = vmul.f32 %v5294_v50, %v5244_v22  ;;  %v5329_v5 = vmul.f32 0.0, %v5296_v51 }
  0xa7   :  { %v4245_v57 = vpack.i.bf16 %v5301_v54, %v504_v55  ;;  %v4250_v58 = vpack.i.bf16 %v5301_v54, %v514_v56  ;;  %v4305_v55 = vpack.i.bf16 %v330_v46, %v329_v40  ;;  %v4340_v56 = vpack.i.bf16 %v501_v53, %v5301_v54 }
  0xa9   :  { %4246 = vrot.lane.b32.xlu1 %v4245_v57, %s5160_s27  ;;  %4251 = vrot.lane.b32.xlu0 %v4250_v58, %s5160_s27  ;;  %v335_v57 = vmul.f32 %v321_v45, %v5315_v62  ;;  %v336_v58 = vmul.f32 %v5246_v23, %v5317_v63 }
  0xaa   :  { %4266 = vrot.lane.b32.xlu2 %v4265_v59, %s5159_s26  ;;  %v333_v59 = vmul.f32 %v319_v13, %v5309_v60  ;;  %v340_v13 = vmul.f32 %v321_v45, %v5336_v11 }
  0xab   :  { %v4315_v3 = vpack.i.bf16 %v336_v58, %v335_v57 }
  0xac   :  { %v5323_v2 = vpop.permute.xlu0 %662  ;;  %v4310_v4 = vpack.i.bf16 %v334_v21, %v333_v59  ;;  %v659_v32 = vpop.permute.xlu1 %658 }
  0xad   :  { %v677_v6 = vmul.f32 %v5323_v2, %v5252_v28  ;;  %v665_v36 = vsel %vm664_vm3, %v5296_v51, %v659_v32  ;;  %v682_v58 = vmul.f32 %v5323_v2, %v5317_v63 }
  0xaf   :  { %v4255_v8 = vpack.i.bf16 %v5329_v5, %v677_v6  ;;  %v4350_v6 = vpack.i.bf16 %v507_v1, %v506_v0 }
  0xb1   :  { %4271 = vrot.lane.b32.xlu1 %v4270_v7, %s5159_s26  ;;  %4256 = vrot.lane.b32.xlu0 %v4255_v8, %s5161_s28  ;;  %v494_v7 = vsel %vm491_vm2, %v5283_v44, %v5294_v50  ;;  %v511_v8 = vmul.f32 %v492_v29, %v5338_v12  ;;  %v516_v44 = vmul.f32 %v492_v29, %v5357_v26 }
  0xb2   :  { %4276 = vrot.lane.b32.xlu2 %v4275_v9, %s5159_s26  ;;  %v339_v9 = vmul.f32 %v320_v30, %v5334_v10  ;;  %v513_v14 = vmul.f32 %v494_v7, %v5336_v11  ;;  %v346_v30 = vmul.f32 %v5246_v23, %v5355_v25  ;;  %v518_v31 = vmul.f32 %v494_v7, %v5352_v20 }
  0xb3   :  { %v4360_v16 = vpack.i.bf16 %v511_v8, %v5301_v54  ;;  %v519_v54 = vmul.f32 %v5294_v50, %v5355_v25  ;;  %v667_v23 = vsel %vm664_vm3, %v661_v33, %v5323_v2  ;;  %v502_v29 = vmul.f32 %v493_v43, %v5288_v47 }
  0xb4   :  { %v4325_v17 = vpack.i.bf16 %v340_v13, %v339_v9  ;;  %v676_v51 = vmul.f32 %v667_v23, %v5290_v48  ;;  %v681_v57 = vmul.f32 %v667_v23, %v5315_v62 }
  0xb5   :  { %v4375_v38 = vpack.i.bf16 %v519_v54, %v518_v31 }
  0xb6   :  { %v4395_v0 = vpack.i.bf16 %v682_v58, %v681_v57 }
  0xb9   :  { %4286 = vrot.lane.b32.xlu1 %v4285_v18, %s5159_s26  ;;  %4281 = vrot.lane.b32.xlu0 %v4280_v19, %s5159_s26  ;;  %v4365_v18 = vpack.i.bf16 %v513_v14, %v512_v15  ;;  %v517_v19 = vmul.f32 %v493_v43, %v5359_v27  ;;  %v509_v43 = vmul.f32 %v5294_v50, %v5317_v63 }
  0xba   :  { %4321 = vrot.lane.b32.xlu2 %v4320_v24, %s5158_s25  ;;  %v345_v24 = vmul.f32 %v321_v45, %v5352_v20  ;;  %v503_v45 = vmul.f32 %v494_v7, %v5290_v48  ;;  %v686_v50 = vmul.f32 %v667_v23, %v5336_v11  ;;  %v691_v14 = vmul.f32 %v667_v23, %v5352_v20 }
  0xbb   :  { %v4370_v34 = vpack.i.bf16 %v517_v19, %v516_v44  ;;  %v692_v15 = vmul.f32 %v5323_v2, %v5355_v25 }
  0xbc   :  { %v4335_v35 = vpack.i.bf16 %v346_v30, %v345_v24  ;;  %v4345_v46 = vpack.i.bf16 %v503_v45, %v502_v29 }
  0xbd   :  { %v4420_v44 = vpack.i.bf16 %v692_v15, %v691_v14 }
  0xc1   :  { %4296 = vrot.lane.b32.xlu1 %v4295_v39, %s5159_s26  ;;  %4291 = vrot.lane.b32.xlu0 %v4290_v42, %s5159_s26  ;;  %v666_v39 = vsel %vm664_vm3, %v659_v32, %v661_v33  ;;  %v674_v42 = vmul.f32 %v665_v36, %v5276_v41 }
  0xc2   :  { %4331 = vrot.lane.b32.xlu2 %v4330_v49, %s5158_s25  ;;  %v675_v49 = vmul.f32 %v666_v39, %v5288_v47 }
  0xc3   :  { %v4380_v40 = vpack.i.bf16 %v674_v42, %v5329_v5 }
  0xc4   :  { %v4385_v52 = vpack.i.bf16 %v676_v51, %v675_v49 }
  0xc9   :  { %4306 = vrot.lane.b32.xlu1 %v4305_v55, %s5158_s25  ;;  %4301 = vrot.lane.b32.xlu0 %v4300_v37, %s5158_s25  ;;  %v679_v55 = vmul.f32 %v665_v36, %v5309_v60  ;;  %v680_v37 = vmul.f32 %v666_v39, %v5311_v61 }
  0xca   :  { %4341 = vrot.lane.b32.xlu2 %v4340_v56, %s5160_s27  ;;  %v508_v56 = vmul.f32 %v494_v7, %v5315_v62 }
  0xcb   :  { %v4390_v59 = vpack.i.bf16 %v680_v37, %v679_v55 }
  0xcc   :  { %v4355_v21 = vpack.i.bf16 %v509_v43, %v508_v56 }
  0xd1   :  { %4316 = vrot.lane.b32.xlu1 %v4315_v3, %s5158_s25  ;;  %4311 = vrot.lane.b32.xlu0 %v4310_v4, %s5158_s25  ;;  %v685_v3 = vmul.f32 %v666_v39, %v5334_v10  ;;  %v684_v4 = vmul.f32 %v665_v36, %v5338_v12 }
  0xd2   :  { %4351 = vrot.lane.b32.xlu2 %v4350_v6, %s5160_s27  ;;  %v687_v6 = vmul.f32 %v5323_v2, %v5244_v22 }
  0xd3   :  { %v4405_v7 = vpack.i.bf16 %v686_v50, %v685_v3  ;;  %v4400_v8 = vpack.i.bf16 %v684_v4, %v5329_v5 }
  0xd4   :  { %v4410_v9 = vpack.i.bf16 %v5329_v5, %v687_v6  ;;  %v4164_v5 = vld [vmem:[%s8204_s5 + $0x5] ss:$8 sm:$0xf] }
  0xd5   :  { %v886_v2 = vperm.slane %v4164_v5, 2  ;;  %v885_v30 = vperm.slane %v4164_v5, 1  ;;  %v887_v31 = vperm.slane %v4164_v5, 3 }
  0xd9   :  { %4361 = vrot.lane.b32.xlu1 %v4360_v16, %s5160_s27  ;;  %4326 = vrot.lane.b32.xlu0 %v4325_v17, %s5158_s25  ;;  %v689_v16 = vmul.f32 %v665_v36, %v5357_v26  ;;  %v690_v17 = vmul.f32 %v666_v39, %v5359_v27 }
  0xda   :  { %4366 = vrot.lane.b32.xlu2 %v4365_v18, %s5160_s27  ;;  %v884_v18 = vperm.slane %v4164_v5, 0 }
  0xdb   :  { %v4415_v19 = vpack.i.bf16 %v690_v17, %v689_v16 }
  0xe1   :  { %4371 = vrot.lane.b32.xlu1 %v4370_v34, %s5160_s27  ;;  %4336 = vrot.lane.b32.xlu0 %v4335_v35, %s5158_s25 }
  0xe2   :  { %4376 = vrot.lane.b32.xlu2 %v4375_v38, %s5160_s27 }
  0xe9   :  { %4381 = vrot.lane.b32.xlu1 %v4380_v40, %s5161_s28  ;;  %4346 = vrot.lane.b32.xlu0 %v4345_v46, %s5160_s27 }
  0xea   :  { %4386 = vrot.lane.b32.xlu2 %v4385_v52, %s5161_s28 }
  0xeb   :  { %v5441_v53 = vpop.permute.xlu2 %4231 }
  0xec   :  { %8351 = vst [vmem:[#allocation14_spill] sm:$0xff] %v5441_v53  ;;  %v5488_v33 = vpop.permute.xlu1 %4241 }
  0xed   :  { %8355 = vst [vmem:[#allocation18_spill] sm:$0xff] %v5488_v33 }
  0xf1   :  { %4391 = vrot.lane.b32.xlu1 %v4390_v59, %s5161_s28  ;;  %4356 = vrot.lane.b32.xlu0 %v4355_v21, %s5160_s27 }
  0xf2   :  { %4396 = vrot.lane.b32.xlu2 %v4395_v0, %s5161_s28 }
  0xf3   :  { %v5454_v1 = vpop.permute.xlu2 %4236 }
  0xf4   :  { %8352 = vst [vmem:[#allocation15_spill] sm:$0xff] %v5454_v1 }
  0xf9   :  { %4406 = vrot.lane.b32.xlu1 %v4405_v7, %s5161_s28  ;;  %4401 = vrot.lane.b32.xlu0 %v4400_v8, %s5161_s28 }
  0xfa   :  { %4411 = vrot.lane.b32.xlu2 %v4410_v9, %s5161_s28 }
  0xfb   :  { %v5466_v13 = vpop.permute.xlu2 %4261 }
 0x101   :  { %4421 = vrot.lane.b32.xlu1 %v4420_v44, %s5161_s28  ;;  %4416 = vrot.lane.b32.xlu0 %v4415_v19, %s5161_s28 }
 0x102   :  { %888 = vrot.lane.b32.xlu2 %v884_v18, %s5161_s28 }
 0x103   :  { %v5486_v32 = vpop.permute.xlu0 %4226 }
 0x104   :  { %v5479_v24 = vpop.permute.xlu2 %4266  ;;  %8354 = vst [vmem:[#allocation17_spill] sm:$0xff] %v5486_v32 }
 0x109   :  { %892 = vrot.lane.b32.xlu1 %v886_v2, %s5161_s28  ;;  %890 = vrot.lane.b32.xlu0 %v885_v30, %s5161_s28 }
 0x10a   :  { %894 = vrot.lane.b32.xlu2 %v887_v31, %s5161_s28 }
 0x10c   :  { %v5484_v54 = vpop.permute.xlu2 %4276 }
 0x10d   :  { %8353 = vst [vmem:[#allocation16_spill] sm:$0xff] %v5484_v54 }
 0x114   :  { %v5490_v34 = vpop.permute.xlu2 %4321 }
 0x11b   :  { %v5492_v35 = vpop.permute.xlu1 %4246  ;;  %v5494_v36 = vpop.permute.xlu0 %4251 }
 0x11c   :  { %8356 = vst [vmem:[#allocation19_spill] sm:$0xff] %v5492_v35  ;;  %v5496_v38 = vpop.permute.xlu2 %4331 }
 0x11d   :  { %8357 = vst [vmem:[#allocation20_spill] sm:$0xff] %v5494_v36 }
 0x123   :  { %v5498_v39 = vpop.permute.xlu1 %4271  ;;  %v5500_v23 = vpop.permute.xlu0 %4256 }
 0x124   :  { %8358 = vst [vmem:[#allocation21_spill] sm:$0xff] %v5498_v39  ;;  %v5502_v42 = vpop.permute.xlu2 %4341 }
 0x125   :  { %8359 = vst [vmem:[#allocation22_spill] sm:$0xff] %v5500_v23 }
 0x12b   :  { %v5504_v45 = vpop.permute.xlu1 %4286  ;;  %v5506_v49 = vpop.permute.xlu0 %4281 }
 0x12c   :  { %v5508_v51 = vpop.permute.xlu2 %4351 }
 0x133   :  { %v5510_v29 = vpop.permute.xlu1 %4296  ;;  %v5512_v40 = vpop.permute.xlu0 %4291 }
 0x134   :  { %8360 = vst [vmem:[#allocation23_spill] sm:$0xff] %v5510_v29  ;;  %v5514_v46 = vpop.permute.xlu2 %4366 }
 0x13b   :  { %v5516_v52 = vpop.permute.xlu1 %4306  ;;  %v5518_v55 = vpop.permute.xlu0 %4301 }
 0x13c   :  { %v5520_v37 = vpop.permute.xlu2 %4376 }
 0x13d   :  { %8361 = vst [vmem:[#allocation24_spill] sm:$0xff] %v5520_v37 }
 0x143   :  { %v5522_v56 = vpop.permute.xlu1 %4316  ;;  %v5524_v43 = vpop.permute.xlu0 %4311 }
 0x144   :  { %8362 = vst [vmem:[#allocation25_spill] sm:$0xff] %v5522_v56  ;;  %v5526_v57 = vpop.permute.xlu2 %4386 }
 0x145   :  { %8363 = vst [vmem:[#allocation26_spill] sm:$0xff] %v5526_v57 }
 0x14b   :  { %v5528_v58 = vpop.permute.xlu1 %4361  ;;  %v5530_v59 = vpop.permute.xlu0 %4326 }
 0x14c   :  { %v5532_v21 = vpop.permute.xlu2 %4396 }
 0x14d   :  { %8364 = vst [vmem:[#allocation27_spill] sm:$0xff] %v5532_v21 }
 0x153   :  { %v5534_v0 = vpop.permute.xlu1 %4371  ;;  %v5536_v3 = vpop.permute.xlu0 %4336 }
 0x154   :  { %8365 = vst [vmem:[#allocation28_spill] sm:$0xff] %v5534_v0  ;;  %v5538_v50 = vpop.permute.xlu2 %4411 }
 0x155   :  { %8366 = vst [vmem:[#allocation29_spill] sm:$0xff] %v5536_v3  ;;  %v4414_v44 = vunpack.i.h.bf16 %v5538_v50 }
 0x156   :  { %8367 = vst [vmem:[#allocation30_spill] sm:$0xff] %v5538_v50 }
 0x15b   :  { %v4382_v4 = vpop.permute.xlu1 %4381  ;;  %v5540_v6 = vpop.permute.xlu0 %4346 }
 0x15c   :  { %v5542_v7 = vpop.permute.xlu2 %888  ;;  %v4384_v50 = vunpack.i.h.bf16 %v4382_v4 }
 0x15d   :  { %v909_v14 = vmul.f32 %v5542_v7, %v5309_v60 }
 0x163   :  { %v5544_v8 = vpop.permute.xlu1 %4391  ;;  %v5546_v9 = vpop.permute.xlu0 %4356 }
 0x164   :  { %8368 = vst [vmem:[#allocation31_spill] sm:$0xff] %v5544_v8  ;;  %v895_v15 = vpop.permute.xlu2 %894 }
 0x165   :  { %8369 = vst [vmem:[#allocation32_spill] sm:$0xff] %v5546_v9  ;;  %v5550_v16 = vmul.f32 0.0, %v895_v15  ;;  %v4383_v9 = vunpack.i.l.bf16 %v4382_v4 }
 0x167   :  { %v4435_v17 = vpack.i.bf16 %v909_v14, %v5550_v16 }
 0x169   :  { %4436 = vrot.lane.b32.xlu2 %v4435_v17, %s5157_s24  ;;  %v4393_v17 = vunpack.i.l.bf16 %v5544_v8 }
 0x16b   :  { %v5554_v5 = vpop.permute.xlu1 %4406  ;;  %v4402_v18 = vpop.permute.xlu0 %4401 }
 0x16c   :  { %v4404_v31 = vunpack.i.h.bf16 %v4402_v18  ;;  %v4403_v54 = vunpack.i.l.bf16 %v4402_v18  ;;  %v4259_v18 = vunpack.i.h.bf16 %v5500_v23  ;;  %v8371_v21 = vunpack.i.l.bf16 %v5554_v5 }
 0x16e   :  { %v762_v37 = vsel %vm753_vm4, %v4403_v54, %v4404_v31  ;;  %v763_v14 = vsel %vm753_vm4, %v4404_v31, %v8371_v21  ;;  %v758_v4 = vsel %vm753_vm4, %v4259_v18, %v4393_v17 }
 0x173   :  { %v5558_v2 = vpop.permute.xlu1 %4421  ;;  %v5560_v30 = vpop.permute.xlu0 %4416 }
 0x174   :  { %8370 = vst [vmem:[#allocation33_spill] sm:$0xff] %v5558_v2  ;;  %v8215_v29 = vunpack.i.h.bf16 %v5560_v30  ;;  %v4418_v56 = vunpack.i.l.bf16 %v5560_v30  ;;  %v4254_v2 = vunpack.i.h.bf16 %v5494_v36 }
 0x176   :  { %v766_v3 = vsel %vm753_vm4, %v4414_v44, %v4418_v56  ;;  %v767_v19 = vsel %vm753_vm4, %v4418_v56, %v8215_v29  ;;  %v8218_v44 = vunpack.i.l.bf16 %v5526_v57  ;;  %v4364_v29 = vunpack.i.h.bf16 %v5528_v58 }
 0x177   :  { %1738 = vmatpush.msra.mxu0 %v766_v3  ;;  %1825 = vmatpush.msra.mxu3 %v767_v19  ;;  %v4373_v3 = vunpack.i.l.bf16 %v5534_v0  ;;  %v8372_v19 = vunpack.i.h.bf16 %v5544_v8  ;;  %v914_v56 = vmul.f32 %v5542_v7, %v5338_v12  ;;  %v8233_v8 = vunpack.i.l.bf16 %v5514_v46 }
 0x179   :  { %1739 = vmatpush.msra.mxu0 %v762_v37  ;;  %1826 = vmatpush.msra.mxu3 %v763_v14  ;;  %v759_v54 = vsel %vm753_vm4, %v4393_v17, %v8372_v19  ;;  %v754_v37 = vsel %vm753_vm4, %v4383_v9, %v4384_v50  ;;  %v904_v14 = vmul.f32 %v5542_v7, %v5276_v41  ;;  %v4363_v9 = vunpack.i.l.bf16 %v5528_v58 }
 0x17a   :  { %v593_v23 = vsel %vm580_vm5, %v4254_v2, %v4373_v3  ;;  %v4353_v58 = vunpack.i.l.bf16 %v5508_v51  ;;  %v4249_v2 = vunpack.i.h.bf16 %v5492_v35 }
 0x17b   :  { %v893_v21 = vpop.permute.xlu1 %892  ;;  %v891_v31 = vpop.permute.xlu0 %890  ;;  %1740 = vmatpush.msra.mxu0 %v758_v4  ;;  %1827 = vmatpush.msra.mxu3 %v759_v54  ;;  %v755_v4 = vsel %vm753_vm4, %v4384_v50, %v8218_v44  ;;  %v8223_v44 = vunpack.i.h.bf16 %v5508_v51 }
 0x17c   :  { %v5590_v18 = vsel %vm753_vm4, %v893_v21, %v895_v15  ;;  %v896_v17 = vsel %vm753_vm4, %v5542_v7, %v891_v31  ;;  %v5595_v19 = vsel %vm753_vm4, %v891_v31, %v893_v21  ;;  %v8373_v21 = vunpack.i.h.bf16 %v5534_v0 }
 0x17d   :  { %1741 = vmatpush.msra.mxu0 %v754_v37  ;;  %1828 = vmatpush.msra.mxu3 %v755_v4  ;;  %v905_v54 = vmul.f32 %v896_v17, %v5288_v47  ;;  %v915_v36 = vmul.f32 %v896_v17, %v5334_v10  ;;  %v906_v15 = vmul.f32 %v5595_v19, %v5290_v48  ;;  %v4344_v0 = vunpack.i.h.bf16 %v5502_v42 }
 0x17e   :  { %v594_v31 = vsel %vm580_vm5, %v4373_v3, %v8373_v21  ;;  %v907_v50 = vmul.f32 %v5590_v18, %v5252_v28  ;;  %v4343_v3 = vunpack.i.l.bf16 %v5502_v42  ;;  %v585_v42 = vsel %vm580_vm5, %v4249_v2, %v4353_v58 }
 0x17f   :  { %1742 = vmatpush.msra.mxu0 %v593_v23  ;;  %1829 = vmatpush.msra.mxu3 %v594_v31  ;;  %v4425_v37 = vpack.i.bf16 %v905_v54, %v904_v14  ;;  %v4450_v4 = vpack.i.bf16 %v915_v36, %v914_v56  ;;  %v589_v23 = vsel %vm580_vm5, %v4363_v9, %v4364_v29  ;;  %v8231_v14 = vunpack.i.h.bf16 %v5496_v38 }
 0x180   :  { %v4430_v57 = vpack.i.bf16 %v907_v50, %v906_v15  ;;  %v8232_v36 = vunpack.i.l.bf16 %v5540_v6  ;;  %v590_v56 = vsel %vm580_vm5, %v4364_v29, %v8233_v8  ;;  %v4333_v54 = vunpack.i.l.bf16 %v5496_v38 }
 0x181   :  { %4426 = vrot.lane.b32.xlu0 %v4425_v37, %s5157_s24  ;;  %4451 = vrot.lane.b32.xlu2 %v4450_v4, %s5157_s24  ;;  %v910_v15 = vmul.f32 %v896_v17, %v5311_v61  ;;  %v911_v9 = vmul.f32 %v5595_v19, %v5315_v62  ;;  %v920_v21 = vmul.f32 %v896_v17, %v5359_v27  ;;  %v4244_v50 = vunpack.i.h.bf16 %v5488_v33 }
 0x182   :  { %4431 = vrot.lane.b32.xlu1 %v4430_v57, %s5157_s24  ;;  %1743 = vmatpush.msra.mxu0 %v589_v23  ;;  %v586_v57 = vsel %vm580_vm5, %v4353_v58, %v8223_v44  ;;  %v921_v29 = vmul.f32 %v5595_v19, %v5352_v20  ;;  %v912_v31 = vmul.f32 %v5590_v18, %v5317_v63  ;;  %v4324_v37 = vunpack.i.h.bf16 %v5490_v34 }
 0x183   :  { %1830 = vmatpush.msra.mxu3 %v590_v56  ;;  %v4323_v4 = vunpack.i.l.bf16 %v5490_v34  ;;  %v581_v2 = vsel %vm580_vm5, %v4343_v3, %v4344_v0  ;;  %v8230_v23 = vunpack.i.l.bf16 %v5530_v59  ;;  %v582_v17 = vsel %vm580_vm5, %v4344_v0, %v8232_v36 }
 0x184   :  { %1744 = vmatpush.msra.mxu0 %v585_v42  ;;  %v4313_v58 = vunpack.i.l.bf16 %v5524_v43  ;;  %v420_v56 = vsel %vm407_vm6, %v4244_v50, %v4333_v54  ;;  %v4440_v42 = vpack.i.bf16 %v911_v9, %v910_v15  ;;  %v8229_v44 = vunpack.i.h.bf16 %v5524_v43 }
 0x185   :  { %1831 = vmatpush.msra.mxu3 %v586_v57  ;;  %v421_v34 = vsel %vm407_vm6, %v4333_v54, %v8231_v14  ;;  %v4465_v3 = vpack.i.bf16 %v921_v29, %v920_v21  ;;  %v4445_v57 = vpack.i.bf16 %v5550_v16, %v912_v31  ;;  %v416_v0 = vsel %vm407_vm6, %v4323_v4, %v4324_v37 }
 0x186   :  { %1745 = vmatpush.msra.mxu0 %v581_v2  ;;  %v4239_v2 = vunpack.i.h.bf16 %v5454_v1  ;;  %v8228_v50 = vunpack.i.l.bf16 %v5516_v52  ;;  %v4304_v15 = vunpack.i.h.bf16 %v5518_v55  ;;  %v4303_v9 = vunpack.i.l.bf16 %v5518_v55 }
 0x187   :  { %1832 = vmatpush.msra.mxu3 %v582_v17  ;;  %v417_v54 = vsel %vm407_vm6, %v4324_v37, %v8230_v23  ;;  %v8227_v21 = vunpack.i.h.bf16 %v5512_v40  ;;  %v4293_v29 = vunpack.i.l.bf16 %v5512_v40  ;;  %v413_v55 = vsel %vm407_vm6, %v4313_v58, %v8229_v44 }
 0x188   :  { %1746 = vmatpush.msra.mxu0 %v420_v56  ;;  %v412_v31 = vsel %vm407_vm6, %v4239_v2, %v4313_v58  ;;  %v916_v4 = vmul.f32 %v5595_v19, %v5336_v11  ;;  %v917_v17 = vmul.f32 %v5590_v18, %v5244_v22  ;;  %v919_v37 = vmul.f32 %v5542_v7, %v5357_v26 }
 0x189   :  { %1833 = vmatpush.msra.mxu3 %v421_v34  ;;  %4441 = vrot.lane.b32.xlu0 %v4440_v42, %s5157_s24  ;;  %v4234_v56 = vunpack.i.h.bf16 %v5441_v53  ;;  %v8226_v42 = vunpack.i.l.bf16 %v5504_v45  ;;  %v4284_v34 = vunpack.i.h.bf16 %v5506_v49  ;;  %v4283_v58 = vunpack.i.l.bf16 %v5506_v49 }
 0x18a   :  { %4466 = vrot.lane.b32.xlu2 %v4465_v3, %s5157_s24  ;;  %4446 = vrot.lane.b32.xlu1 %v4445_v57, %s5157_s24  ;;  %v408_v3 = vsel %vm407_vm6, %v4303_v9, %v4304_v15  ;;  %v409_v19 = vsel %vm407_vm6, %v4304_v15, %v8228_v50  ;;  %v8225_v57 = vunpack.i.h.bf16 %v5498_v39  ;;  %v4273_v7 = vunpack.i.l.bf16 %v5498_v39 }
 0x18b   :  { %1747 = vmatpush.msra.mxu0 %v416_v0  ;;  %1834 = vmatpush.msra.mxu3 %v417_v54  ;;  %v247_v2 = vsel %vm234_vm7, %v4234_v56, %v4293_v29  ;;  %v4165_v0 = vld [vmem:[%s8204_s5 + $0x6] ss:$8 sm:$0xf]  ;;  %v248_v49 = vsel %vm234_vm7, %v4293_v29, %v8227_v21  ;;  %v4455_v9 = vpack.i.bf16 %v917_v17, %v916_v4  ;;  %v4229_v56 = vunpack.i.h.bf16 %v5486_v32 }
 0x18c   :  { %v4460_v54 = vpack.i.bf16 %v919_v37, %v5550_v16  ;;  %v1056_v15 = vperm.slane %v4165_v0, 1  ;;  %v243_v29 = vsel %vm234_vm7, %v4283_v58, %v4284_v34  ;;  %v244_v4 = vsel %vm234_vm7, %v4284_v34, %v8226_v42 }
 0x18d   :  { %1748 = vmatpush.msra.mxu0 %v412_v31  ;;  %1835 = vmatpush.msra.mxu3 %v413_v55  ;;  %v4264_v31 = vunpack.i.h.bf16 %v5466_v13  ;;  %v4263_v55 = vunpack.i.l.bf16 %v5466_v13  ;;  %v239_v13 = vsel %vm234_vm7, %v4229_v56, %v4273_v7  ;;  %v240_v17 = vsel %vm234_vm7, %v4273_v7, %v8225_v57 }
 0x18e   :  { %v922_v37 = vmul.f32 %v5590_v18, %v5355_v25  ;;  %v1057_v18 = vperm.slane %v4165_v0, 2  ;;  %v1058_v7 = vperm.slane %v4165_v0, 3 }
 0x18f   :  { %1749 = vmatpush.msra.mxu0 %v408_v3  ;;  %1836 = vmatpush.msra.mxu3 %v409_v19  ;;  %v8224_v3 = vunpack.i.l.bf16 %v5479_v24  ;;  %v235_v58 = vsel %vm234_vm7, %v4263_v55, %v4264_v31  ;;  %v1055_v19 = vperm.slane %v4165_v0, 0 }
 0x191   :  { %1750 = vmatpush.msra.mxu0 %v247_v2  ;;  %1837 = vmatpush.msra.mxu3 %v248_v49  ;;  %v236_v34 = vsel %vm234_vm7, %v4264_v31, %v8224_v3  ;;  %v4470_v2 = vpack.i.bf16 %v5550_v16, %v922_v37 }
 0x192   :  { %4456 = vrot.lane.b32.xlu0 %v4455_v9, %s5157_s24  ;;  %4461 = vrot.lane.b32.xlu1 %v4460_v54, %s5157_s24 }
 0x193   :  { %1751 = vmatpush.msra.mxu0 %v243_v29  ;;  %1838 = vmatpush.msra.mxu3 %v244_v4 }
 0x194   :  { %1061 = vrot.lane.b32.xlu2 %v1056_v15, %s5160_s27 }
 0x195   :  { %1752 = vmatpush.msra.mxu0 %v239_v13  ;;  %1839 = vmatpush.msra.mxu3 %v240_v17 }
 0x197   :  { %1753 = vmatpush.msra.mxu0 %v235_v58  ;;  %1840 = vmatpush.msra.mxu3 %v236_v34 }
 0x19a   :  { %4471 = vrot.lane.b32.xlu0 %v4470_v2, %s5157_s24  ;;  %1059 = vrot.lane.b32.xlu1 %v1055_v19, %s5160_s27 }
 0x1a2   :  { %1063 = vrot.lane.b32.xlu0 %v1057_v18, %s5160_s27  ;;  %1065 = vrot.lane.b32.xlu1 %v1058_v7, %s5160_s27 }
 0x1c3   :  { %v5721_v49 = vpop.permute.xlu2 %4436 }
 0x1db   :  { %v5723_v9 = vpop.permute.xlu2 %4451 }
 0x1dc   :  { %v8239_v18 = vunpack.i.h.bf16 %v5723_v9 }
 0x1e4   :  { %v5725_v54 = vpop.permute.xlu2 %4466 }
 0x1e5   :  { %v8240_v15 = vunpack.i.h.bf16 %v5725_v54  ;;  %v8241_v16 = vunpack.i.l.bf16 %v5725_v54 }
 0x1e7   :  { %v5734_v0 = vsel %vm664_vm3, %v8241_v16, %v8240_v15 }
 0x1e8   :  { %8374 = vst [vmem:[#allocation34_spill] sm:$0xff] %v5734_v0 }
 0x1ee   :  { %v1062_v57 = vpop.permute.xlu2 %1061 }
 0x1f3   :  { %v5736_v31 = vpop.permute.xlu0 %4426 }
 0x1f4   :  { %v8235_v55 = vunpack.i.h.bf16 %v5736_v31  ;;  %v5739_v56 = vpop.permute.xlu1 %4431 }
 0x1f5   :  { %v8234_v29 = vunpack.i.l.bf16 %v5739_v56 }
 0x1f7   :  { %v5747_v4 = vsel %vm664_vm3, %v8235_v55, %v8234_v29 }
 0x1f8   :  { %8375 = vst [vmem:[#allocation35_spill] sm:$0xff] %v5747_v4 }
 0x1fb   :  { %v5749_v13 = vpop.permute.xlu0 %4441 }
 0x1fc   :  { %v8236_v17 = vunpack.i.h.bf16 %v5749_v13  ;;  %v8237_v37 = vunpack.i.l.bf16 %v5749_v13  ;;  %v5753_v58 = vpop.permute.xlu1 %4446 }
 0x1fe   :  { %v5760_v34 = vsel %vm664_vm3, %v8237_v37, %v8236_v17 }
 0x1ff   :  { %8376 = vst [vmem:[#allocation36_spill] sm:$0xff] %v5760_v34 }
 0x204   :  { %v5762_v19 = vpop.permute.xlu0 %4456  ;;  %v5764_v2 = vpop.permute.xlu1 %4461 }
 0x205   :  { %v8238_v7 = vunpack.i.l.bf16 %v5762_v19 }
 0x207   :  { %v5773_v3 = vsel %vm664_vm3, %v8239_v18, %v8238_v7 }
 0x208   :  { %8377 = vst [vmem:[#allocation37_spill] sm:$0xff] %v5773_v3 }
 0x20c   :  { %v5775_v42 = vpop.permute.xlu0 %4471  ;;  %v1060_v21 = vpop.permute.xlu1 %1059 }
 0x20d   :  { %v1067_v50 = vsel %vm580_vm5, %v1060_v21, %v1062_v57  ;;  %v1075_v44 = vmul.f32 %v1060_v21, %v5276_v41  ;;  %v1080_v37 = vmul.f32 %v1060_v21, %v5309_v60 }
 0x20e   :  { %v1076_v23 = vmul.f32 %v1067_v50, %v5288_v47  ;;  %v1081_v7 = vmul.f32 %v1067_v50, %v5311_v61 }
 0x210   :  { %v4475_v14 = vpack.i.bf16 %v1076_v23, %v1075_v44 }
 0x212   :  { %4476 = vrot.lane.b32.xlu2 %v4475_v14, %s5156_s21 }
 0x214   :  { %v1064_v36 = vpop.permute.xlu0 %1063  ;;  %v1066_v8 = vpop.permute.xlu1 %1065 }
 0x215   :  { %v1068_v29 = vsel %vm580_vm5, %v1062_v57, %v1064_v36  ;;  %v1069_v55 = vsel %vm580_vm5, %v1064_v36, %v1066_v8  ;;  %v1079_v17 = vmul.f32 0.0, %v1066_v8  ;;  %v1085_v8 = vmul.f32 %v1060_v21, %v5338_v12 }
 0x216   :  { %v1082_v18 = vmul.f32 %v1068_v29, %v5315_v62  ;;  %v1077_v15 = vmul.f32 %v1068_v29, %v5290_v48  ;;  %v1078_v16 = vmul.f32 %v1069_v55, %v5252_v28  ;;  %v1086_v36 = vmul.f32 %v1067_v50, %v5334_v10 }
 0x217   :  { %v4485_v44 = vpack.i.bf16 %v1080_v37, %v1079_v17  ;;  %v1087_v57 = vmul.f32 %v1068_v29, %v5336_v11  ;;  %v1088_v32 = vmul.f32 %v1069_v55, %v5244_v22  ;;  %v1083_v4 = vmul.f32 %v1069_v55, %v5317_v63 }
 0x218   :  { %v4490_v23 = vpack.i.bf16 %v1082_v18, %v1081_v7  ;;  %v4480_v14 = vpack.i.bf16 %v1078_v16, %v1077_v15  ;;  %v4500_v28 = vpack.i.bf16 %v1086_v36, %v1085_v8  ;;  %v1092_v15 = vmul.f32 %v1068_v29, %v5352_v20 }
 0x219   :  { %4486 = vrot.lane.b32.xlu1 %v4485_v44, %s5156_s21  ;;  %v4505_v37 = vpack.i.bf16 %v1088_v32, %v1087_v57  ;;  %v4495_v18 = vpack.i.bf16 %v1079_v17, %v1083_v4  ;;  %v1093_v16 = vmul.f32 %v1069_v55, %v5355_v25  ;;  %v1091_v7 = vmul.f32 %v1067_v50, %v5359_v27  ;;  %v4166_v32 = vld [vmem:[%s8204_s5 + $0x7] ss:$8 sm:$0xf] }
 0x21a   :  { %4491 = vrot.lane.b32.xlu2 %v4490_v23, %s5156_s21  ;;  %4481 = vrot.lane.b32.xlu0 %v4480_v14, %s5156_s21  ;;  %v1090_v44 = vmul.f32 %v1060_v21, %v5357_v26  ;;  %v1227_v29 = vperm.slane %v4166_v32, 1  ;;  %v1226_v4 = vperm.slane %v4166_v32, 0  ;;  %v1228_v55 = vperm.slane %v4166_v32, 2 }
 0x21b   :  { %v4515_v22 = vpack.i.bf16 %v1092_v15, %v1091_v7  ;;  %v4520_v23 = vpack.i.bf16 %v1079_v17, %v1093_v16  ;;  %v1229_v50 = vperm.slane %v4166_v32, 3 }
 0x21c   :  { %v4510_v14 = vpack.i.bf16 %v1090_v44, %v1079_v17 }
 0x221   :  { %4501 = vrot.lane.b32.xlu1 %v4500_v28, %s5156_s21 }
 0x222   :  { %4506 = vrot.lane.b32.xlu2 %v4505_v37, %s5156_s21  ;;  %4496 = vrot.lane.b32.xlu0 %v4495_v18, %s5156_s21 }
 0x229   :  { %4516 = vrot.lane.b32.xlu1 %v4515_v22, %s5156_s21 }
 0x22a   :  { %4521 = vrot.lane.b32.xlu2 %v4520_v23, %s5156_s21  ;;  %4511 = vrot.lane.b32.xlu0 %v4510_v14, %s5156_s21 }
 0x231   :  { %1232 = vrot.lane.b32.xlu1 %v1227_v29, %s5158_s25 }
 0x232   :  { %1230 = vrot.lane.b32.xlu0 %v1226_v4, %s5158_s25  ;;  %1234 = vrot.lane.b32.xlu2 %v1228_v55, %s5158_s25 }
 0x23a   :  { %1236 = vrot.lane.b32.xlu0 %v1229_v50, %s5158_s25 }
 0x26c   :  { %v5813_v21 = vpop.permute.xlu2 %4476 }
 0x26d   :  { %v8244_v18 = vunpack.i.h.bf16 %v5813_v21 }
 0x274   :  { %v5815_v17 = vpop.permute.xlu2 %4491 }
 0x275   :  { %v8245_v8 = vunpack.i.h.bf16 %v5815_v17  ;;  %v8246_v36 = vunpack.i.l.bf16 %v5815_v17 }
 0x277   :  { %v5824_v57 = vsel %vm491_vm2, %v8246_v36, %v8245_v8 }
 0x278   :  { %8378 = vst [vmem:[#allocation38_spill] sm:$0xff] %v5824_v57 }
 0x27c   :  { %v5839_v7 = vpop.permute.xlu2 %4506 }
 0x27d   :  { %v8247_v22 = vunpack.i.l.bf16 %v5839_v7 }
 0x28b   :  { %v5826_v28 = vpop.permute.xlu1 %4486 }
 0x28c   :  { %v5828_v37 = vpop.permute.xlu0 %4481 }
 0x28d   :  { %v8243_v15 = vunpack.i.l.bf16 %v5828_v37 }
 0x28f   :  { %v5837_v16 = vsel %vm491_vm2, %v8244_v18, %v8243_v15  ;;  %v5860_v15 = vpop.permute.xlu2 %4521 }
 0x290   :  { %8379 = vst [vmem:[#allocation39_spill] sm:$0xff] %v5837_v16 }
 0x293   :  { %v5841_v44 = vpop.permute.xlu1 %4501 }
 0x294   :  { %v8248_v23 = vunpack.i.h.bf16 %v5841_v44  ;;  %v5845_v14 = vpop.permute.xlu0 %4496 }
 0x296   :  { %v5852_v32 = vsel %vm491_vm2, %v8248_v23, %v8247_v22 }
 0x297   :  { %8380 = vst [vmem:[#allocation40_spill] sm:$0xff] %v5852_v32  ;;  %v1235_v22 = vpop.permute.xlu2 %1234 }
 0x29b   :  { %v5854_v29 = vpop.permute.xlu1 %4516 }
 0x29c   :  { %v8251_v4 = vunpack.i.h.bf16 %v5854_v29  ;;  %v8252_v55 = vunpack.i.l.bf16 %v5854_v29  ;;  %v5858_v50 = vpop.permute.xlu0 %4511 }
 0x29e   :  { %v5867_v18 = vsel %vm491_vm2, %v8252_v55, %v8251_v4 }
 0x29f   :  { %8381 = vst [vmem:[#allocation41_spill] sm:$0xff] %v5867_v18 }
 0x2a3   :  { %v1233_v8 = vpop.permute.xlu1 %1232 }
 0x2a4   :  { %v1231_v36 = vpop.permute.xlu0 %1230  ;;  %v1239_v3 = vsel %vm407_vm6, %v1233_v8, %v1235_v22 }
 0x2a5   :  { %v1238_v23 = vsel %vm407_vm6, %v1231_v36, %v1233_v8  ;;  %v1246_v53 = vmul.f32 %v1231_v36, %v5276_v41  ;;  %v1253_v0 = vmul.f32 %v1239_v3, %v5315_v62  ;;  %v1251_v33 = vmul.f32 %v1231_v36, %v5309_v60  ;;  %v5879_v41 = vld [vmem:[#allocation4 + $0x18] sm:$0xff] }
 0x2a6   :  { %v1247_v34 = vmul.f32 %v1238_v23, %v5288_v47  ;;  %v1252_v57 = vmul.f32 %v1238_v23, %v5311_v61  ;;  %v1248_v32 = vmul.f32 %v1239_v3, %v5290_v48  ;;  %v1256_v62 = vmul.f32 %v1231_v36, %v5338_v12  ;;  %v5888_v48 = vld [vmem:[#allocation4 + $0x58] sm:$0xff] }
 0x2a7   :  { %v1257_v60 = vmul.f32 %v1238_v23, %v5334_v10  ;;  %v1262_v10 = vmul.f32 %v1238_v23, %v5359_v27  ;;  %v1261_v12 = vmul.f32 %v1231_v36, %v5357_v26 }
 0x2a8   :  { %v4525_v1 = vpack.i.bf16 %v1247_v34, %v1246_v53 }
 0x2aa   :  { %4526 = vrot.lane.b32.xlu1 %v4525_v1, %s5155_s18  ;;  %v4540_v1 = vpack.i.bf16 %v1253_v0, %v1252_v57  ;;  %v1263_v57 = vmul.f32 %v1239_v3, %v5352_v20 }
 0x2ac   :  { %v1237_v16 = vpop.permute.xlu0 %1236 }
 0x2ad   :  { %v1240_v4 = vsel %vm407_vm6, %v1235_v22, %v1237_v16  ;;  %v1250_v55 = vmul.f32 0.0, %v1237_v16  ;;  %v4550_v16 = vpack.i.bf16 %v1257_v60, %v1256_v62 }
 0x2ae   :  { %v1249_v47 = vmul.f32 %v5879_v41, %v1240_v4  ;;  %v1254_v61 = vmul.f32 %v1240_v4, %v5317_v63  ;;  %v1259_v34 = vmul.f32 %v5888_v48, %v1240_v4  ;;  %v1264_v63 = vmul.f32 %v1240_v4, %v5355_v25 }
 0x2af   :  { %v4535_v8 = vpack.i.bf16 %v1251_v33, %v1250_v55  ;;  %v1258_v33 = vmul.f32 %v1239_v3, %v5336_v11 }
 0x2b0   :  { %v4530_v53 = vpack.i.bf16 %v1249_v47, %v1248_v32  ;;  %v4545_v22 = vpack.i.bf16 %v1250_v55, %v1254_v61  ;;  %v4565_v32 = vpack.i.bf16 %v1263_v57, %v1262_v10  ;;  %v4560_v47 = vpack.i.bf16 %v1261_v12, %v1250_v55 }
 0x2b1   :  { %4536 = vrot.lane.b32.xlu0 %v4535_v8, %s5155_s18  ;;  %v4555_v0 = vpack.i.bf16 %v1259_v34, %v1258_v33  ;;  %v4570_v11 = vpack.i.bf16 %v1250_v55, %v1264_v63  ;;  %v4167_v8 = vld [vmem:[%s8204_s5 + $0x20] ss:$8 sm:$0xf] }
 0x2b2   :  { %4531 = vrot.lane.b32.xlu2 %v4530_v53, %s5155_s18  ;;  %4541 = vrot.lane.b32.xlu1 %v4540_v1, %s5155_s18  ;;  %v1398_v20 = vperm.slane %v4167_v8, 1  ;;  %v1397_v3 = vperm.slane %v4167_v8, 0  ;;  %v1399_v27 = vperm.slane %v4167_v8, 2  ;;  %v1400_v25 = vperm.slane %v4167_v8, 3 }
 0x2b9   :  { %4551 = vrot.lane.b32.xlu0 %v4550_v16, %s5155_s18 }
 0x2ba   :  { %4546 = vrot.lane.b32.xlu2 %v4545_v22, %s5155_s18  ;;  %4556 = vrot.lane.b32.xlu1 %v4555_v0, %s5155_s18 }
 0x2c1   :  { %4566 = vrot.lane.b32.xlu0 %v4565_v32, %s5155_s18 }
 0x2c2   :  { %4561 = vrot.lane.b32.xlu2 %v4560_v47, %s5155_s18  ;;  %4571 = vrot.lane.b32.xlu1 %v4570_v11, %s5155_s18  ;;  %v5929_v47 = vld [vmem:[#allocation4 + $0x20] sm:$0xff] }
 0x2c9   :  { %1403 = vrot.lane.b32.xlu0 %v1398_v20, %s5159_s26 }
 0x2ca   :  { %1401 = vrot.lane.b32.xlu2 %v1397_v3, %s5159_s26  ;;  %1405 = vrot.lane.b32.xlu1 %v1399_v27, %s5159_s26 }
 0x2d2   :  { %1407 = vrot.lane.b32.xlu2 %v1400_v25, %s5159_s26 }
 0x30c   :  { %v5909_v26 = vpop.permute.xlu2 %4531 }
 0x30d   :  { %v8254_v62 = vunpack.i.l.bf16 %v5909_v26  ;;  %v4534_v33 = vunpack.i.h.bf16 %v5909_v26 }
 0x314   :  { %v4547_v36 = vpop.permute.xlu2 %4546 }
 0x315   :  { %v4549_v23 = vunpack.i.h.bf16 %v4547_v36  ;;  %v4548_v4 = vunpack.i.l.bf16 %v4547_v36 }
 0x317   :  { %v5912_v55 = vsel %vm318_vm1, %v4548_v4, %v4549_v23 }
 0x318   :  { %8382 = vst [vmem:[#allocation42_spill] sm:$0xff] %v5912_v55 }
 0x31c   :  { %v4562_v53 = vpop.permute.xlu2 %4561  ;;  %v4527_v1 = vpop.permute.xlu1 %4526 }
 0x31d   :  { %v4529_v60 = vunpack.i.h.bf16 %v4527_v1  ;;  %v4563_v25 = vunpack.i.l.bf16 %v4562_v53  ;;  %v4564_v18 = vunpack.i.h.bf16 %v4562_v53 }
 0x31f   :  { %v5918_v61 = vsel %vm318_vm1, %v4529_v60, %v8254_v62 }
 0x320   :  { %8383 = vst [vmem:[#allocation43_spill] sm:$0xff] %v5918_v61 }
 0x323   :  { %v4537_v34 = vpop.permute.xlu0 %4536 }
 0x324   :  { %v4538_v16 = vunpack.i.l.bf16 %v4537_v34  ;;  %v5921_v22 = vpop.permute.xlu2 %1401  ;;  %v4542_v0 = vpop.permute.xlu1 %4541  ;;  %v4539_v39 = vunpack.i.h.bf16 %v4537_v34 }
 0x325   :  { %v4544_v57 = vunpack.i.h.bf16 %v4542_v0  ;;  %v4543_v10 = vunpack.i.l.bf16 %v4542_v0  ;;  %v1422_v11 = vmul.f32 %v5929_v47, %v5921_v22 }
 0x326   :  { %v5924_v63 = vsel %vm318_vm1, %v4534_v33, %v4538_v16 }
 0x327   :  { %8384 = vst [vmem:[#allocation44_spill] sm:$0xff] %v5924_v63  ;;  %v5927_v12 = vsel %vm318_vm1, %v4543_v10, %v4544_v57 }
 0x328   :  { %8385 = vst [vmem:[#allocation45_spill] sm:$0xff] %v5927_v12 }
 0x32b   :  { %v4552_v32 = vpop.permute.xlu0 %4551 }
 0x32c   :  { %v4554_v8 = vunpack.i.h.bf16 %v4552_v32  ;;  %v1408_v20 = vpop.permute.xlu2 %1407  ;;  %v4557_v3 = vpop.permute.xlu1 %4556  ;;  %v4553_v61 = vunpack.i.l.bf16 %v4552_v32  ;;  %v4528_v32 = vunpack.i.l.bf16 %v4527_v1  ;;  %v1332_v1 = vsel %vm318_vm1, %v4544_v57, %v4548_v4 }
 0x32d   :  { %v5933_v27 = vmul.f32 0.0, %v1408_v20  ;;  %v4559_v36 = vunpack.i.h.bf16 %v4557_v3  ;;  %v4558_v23 = vunpack.i.l.bf16 %v4557_v3  ;;  %v8390_v4 = vunpack.i.l.bf16 %v5909_v26 }
 0x32e   :  { %v1334_v53 = vsel %vm318_vm1, %v4553_v61, %v4554_v8  ;;  %v4503_v61 = vunpack.i.l.bf16 %v5841_v44 }
 0x32f   :  { %v4585_v16 = vpack.i.bf16 %v1422_v11, %v5933_v27  ;;  %v5937_v0 = vsel %vm318_vm1, %v4559_v36, %v4563_v25  ;;  %v5940_v62 = vsel %vm318_vm1, %v4554_v8, %v4558_v23  ;;  %v1336_v34 = vsel %vm318_vm1, %v4558_v23, %v4559_v36  ;;  %v5963_v8 = vld [vmem:[#allocation4 + $0x8] sm:$0xff] }
 0x330   :  { %8386 = vst [vmem:[#allocation46_spill] sm:$0xff] %v5940_v62  ;;  %v1330_v62 = vsel %vm318_vm1, %v4539_v39, %v4543_v10  ;;  %v5966_v23 = vld [vmem:[#allocation4 + $0x48] sm:$0xff]  ;;  %v1326_v10 = vsel %vm318_vm1, %v4528_v32, %v4529_v60  ;;  %v1328_v57 = vsel %vm318_vm1, %v8390_v4, %v4534_v33 }
 0x331   :  { %4586 = vrot.lane.b32.xlu2 %v4585_v16, %s5154_s3  ;;  %8388 = vst [vmem:[#allocation48_spill] sm:$0xff] %v5963_v8 }
 0x332   :  { %8389 = vst [vmem:[#allocation49_spill] sm:$0xff] %v5966_v23 }
 0x333   :  { %v4567_v35 = vpop.permute.xlu0 %4566 }
 0x334   :  { %v4569_v12 = vunpack.i.h.bf16 %v4567_v35  ;;  %v4568_v63 = vunpack.i.l.bf16 %v4567_v35  ;;  %v5943_v55 = vpop.permute.xlu1 %4571  ;;  %v4514_v35 = vunpack.i.h.bf16 %v5858_v50 }
 0x335   :  { %v8257_v3 = vunpack.i.l.bf16 %v5943_v55 }
 0x336   :  { %v1338_v11 = vsel %vm318_vm1, %v4564_v18, %v4568_v63  ;;  %v5948_v25 = vsel %vm318_vm1, %v4568_v63, %v4569_v12  ;;  %v5982_v63 = vld [vmem:[#allocation4 + $0x10] sm:$0xff] }
 0x337   :  { %1767 = vmatpush.msra.mxu1 %v1338_v11  ;;  %8387 = vst [vmem:[#allocation47_spill] sm:$0xff] %v5948_v25  ;;  %v1340_v16 = vsel %vm318_vm1, %v4569_v12, %v8257_v3  ;;  %v8261_v11 = vunpack.i.l.bf16 %v5860_v15  ;;  %v4478_v25 = vunpack.i.l.bf16 %v5813_v21 }
 0x338   :  { %1941 = vmatpush.msrb.mxu3 %v1340_v16 }
 0x339   :  { %1768 = vmatpush.msra.mxu1 %v1334_v53 }
 0x33a   :  { %1942 = vmatpush.msrb.mxu3 %v1336_v34  ;;  %v8391_v34 = vunpack.i.l.bf16 %v5854_v29 }
 0x33b   :  { %v1404_v18 = vpop.permute.xlu0 %1403  ;;  %1769 = vmatpush.msra.mxu1 %v1330_v62 }
 0x33c   :  { %v1409_v12 = vsel %vm234_vm7, %v5921_v22, %v1404_v18  ;;  %v1406_v62 = vpop.permute.xlu1 %1405  ;;  %1943 = vmatpush.msrb.mxu3 %v1332_v1  ;;  %v1167_v3 = vsel %vm491_vm2, %v4514_v35, %v8391_v34  ;;  %v4489_v35 = vunpack.i.h.bf16 %v5826_v28  ;;  %v8393_v34 = vunpack.i.h.bf16 %v5841_v44 }
 0x33d   :  { %v1418_v36 = vmul.f32 %v5963_v8, %v1409_v12  ;;  %v1428_v39 = vmul.f32 %v5966_v23, %v1409_v12  ;;  %v5971_v16 = vsel %vm234_vm7, %v1404_v18, %v1406_v62  ;;  %v5974_v53 = vsel %vm234_vm7, %v1406_v62, %v1408_v20  ;;  %1770 = vmatpush.msra.mxu1 %v1326_v10  ;;  %v5988_v20 = vld [vmem:[#allocation4] sm:$0xff] }
 0x33e   :  { %v1419_v60 = vmul.f32 %v5982_v63, %v5971_v16  ;;  %v1420_v32 = vmul.f32 %v5879_v41, %v5974_v53  ;;  %1944 = vmatpush.msrb.mxu3 %v1328_v57  ;;  %v1417_v26 = vmul.f32 %v5988_v20, %v5921_v22  ;;  %v5992_v18 = vld [vmem:[#allocation4 + $0x40] sm:$0xff]  ;;  %v8392_v62 = vunpack.i.h.bf16 %v5854_v29 }
 0x33f   :  { %v1427_v33 = vmul.f32 %v5992_v18, %v5921_v22  ;;  %1771 = vmatpush.msra.mxu1 %v1167_v3  ;;  %v1163_v8 = vsel %vm491_vm2, %v4503_v61, %v8393_v34  ;;  %v8260_v1 = vunpack.i.h.bf16 %v5828_v37  ;;  %v8394_v29 = vunpack.i.h.bf16 %v5839_v7  ;;  %v6040_v34 = vld [vmem:[#allocation4 + $0x38] sm:$0xff] }
 0x340   :  { %v1169_v10 = vsel %vm491_vm2, %v8392_v62, %v8261_v11  ;;  %v4575_v4 = vpack.i.bf16 %v1418_v36, %v1417_v26  ;;  %v4580_v23 = vpack.i.bf16 %v1420_v32, %v1419_v60  ;;  %v8395_v3 = vunpack.i.l.bf16 %v5839_v7 }
 0x341   :  { %1945 = vmatpush.msrb.mxu3 %v1169_v10  ;;  %v4600_v57 = vpack.i.bf16 %v1428_v39, %v1427_v33  ;;  %1772 = vmatpush.msra.mxu1 %v1163_v8  ;;  %v4464_v44 = vunpack.i.h.bf16 %v5764_v2  ;;  %v4473_v61 = vunpack.i.l.bf16 %v5775_v42  ;;  %v8396_v8 = vunpack.i.l.bf16 %v5815_v17  ;;  %v6026_v33 = vld [vmem:[#allocation4 + $0x28] sm:$0xff] }
 0x342   :  { %4576 = vrot.lane.b32.xlu0 %v4575_v4, %s5154_s3  ;;  %v1165_v36 = vsel %vm491_vm2, %v8395_v3, %v8394_v29  ;;  %4581 = vrot.lane.b32.xlu1 %v4580_v23, %s5154_s3  ;;  %v8397_v60 = vunpack.i.l.bf16 %v5845_v14  ;;  %v8398_v32 = vunpack.i.h.bf16 %v5815_v17  ;;  %v1423_v62 = vmul.f32 %v6026_v33, %v1409_v12  ;;  %v6029_v10 = vld [vmem:[#allocation4 + $0x68] sm:$0xff]  ;;  %v6032_v23 = vld [vmem:[#allocation4 + $0x30] sm:$0xff] }
 0x343   :  { %4601 = vrot.lane.b32.xlu2 %v4600_v57, %s5154_s3  ;;  %1946 = vmatpush.msrb.mxu3 %v1165_v36  ;;  %v1159_v39 = vsel %vm491_vm2, %v4489_v35, %v8396_v8  ;;  %v1433_v4 = vmul.f32 %v6029_v10, %v1409_v12  ;;  %v1424_v57 = vmul.f32 %v6032_v23, %v5971_v16  ;;  %v6036_v35 = vld [vmem:[#allocation4 + $0x70] sm:$0xff]  ;;  %v8399_v3 = vunpack.i.h.bf16 %v5813_v21 }
 0x344   :  { %v1161_v26 = vsel %vm491_vm2, %v8398_v32, %v8397_v60  ;;  %v1434_v17 = vmul.f32 %v6036_v35, %v5971_v16  ;;  %1773 = vmatpush.msra.mxu1 %v1159_v39  ;;  %v1425_v29 = vmul.f32 %v6040_v34, %v5974_v53  ;;  %v4453_v36 = vunpack.i.l.bf16 %v5723_v9  ;;  %v6056_v39 = vld [vmem:[%s8204_s5 + $0x4] ss:$8 sm:$0xf] }
 0x345   :  { %1947 = vmatpush.msrb.mxu3 %v1161_v26  ;;  %v1155_v12 = vsel %vm491_vm2, %v4478_v25, %v8399_v3  ;;  %v8400_v8 = vunpack.i.l.bf16 %v5828_v37  ;;  %v8401_v21 = vunpack.i.l.bf16 %v5725_v54  ;;  %v8402_v26 = vunpack.i.h.bf16 %v5725_v54 }
 0x346   :  { %1774 = vmatpush.msra.mxu1 %v1155_v12  ;;  %v4590_v12 = vpack.i.bf16 %v1424_v57, %v1423_v62  ;;  %v4595_v11 = vpack.i.bf16 %v5933_v27, %v1425_v29  ;;  %v4439_v32 = vunpack.i.h.bf16 %v5721_v49  ;;  %v8403_v54 = vunpack.i.h.bf16 %v5723_v9 }
 0x347   :  { %v1157_v60 = vsel %vm491_vm2, %v8400_v8, %v8260_v1  ;;  %v996_v25 = vsel %vm664_vm3, %v4464_v44, %v8401_v21  ;;  %v998_v3 = vsel %vm664_vm3, %v8402_v26, %v4473_v61  ;;  %v4615_v8 = vpack.i.bf16 %v1434_v17, %v1433_v4  ;;  %v6084_v21 = vld [vmem:[#allocation4 + $0x50] sm:$0xff] }
 0x348   :  { %1948 = vmatpush.msrb.mxu3 %v1157_v60  ;;  %1775 = vmatpush.msra.mxu1 %v996_v25  ;;  %v4448_v1 = vunpack.i.l.bf16 %v5753_v58  ;;  %v821_v60 = vperm.slane %v6056_v39, 0  ;;  %v4428_v44 = vunpack.i.l.bf16 %v5736_v31  ;;  %v992_v62 = vsel %vm664_vm3, %v4453_v36, %v8403_v54 }
 0x349   :  { %v4434_v4 = vunpack.i.h.bf16 %v5739_v56  ;;  %v8404_v57 = vunpack.i.h.bf16 %v5762_v19  ;;  %v8405_v17 = vunpack.i.l.bf16 %v5762_v19  ;;  %v1429_v25 = vmul.f32 %v6084_v21, %v5971_v16 }
 0x34a   :  { %1949 = vmatpush.msrb.mxu3 %v998_v3  ;;  %4591 = vrot.lane.b32.xlu0 %v4590_v12, %s5154_s3  ;;  %v1430_v9 = vmul.f32 %v5888_v48, %v5974_v53  ;;  %v8406_v36 = vunpack.i.l.bf16 %v5749_v13  ;;  %v5042_v12 = vld [vmem:[#allocation4 + $0x60] sm:$0xff]  ;;  %v8408_v16 = vunpack.i.h.bf16 %v5736_v31  ;;  %v8410_v31 = vld [vmem:[#allocation33_spill] sm:$0xff] }
 0x34b   :  { %4616 = vrot.lane.b32.xlu2 %v4615_v8, %s5154_s3  ;;  %1776 = vmatpush.msra.mxu1 %v992_v62  ;;  %v994_v29 = vsel %vm664_vm3, %v8405_v17, %v8404_v57  ;;  %v841_v8 = vmul.f32 %v5042_v12, %v821_v60  ;;  %v1432_v54 = vmul.f32 %v5042_v12, %v5921_v22  ;;  %v8413_v12 = vld [vmem:[#allocation27_spill] sm:$0xff] }
 0x34c   :  { %4596 = vrot.lane.b32.xlu1 %v4595_v11, %s5154_s3  ;;  %1950 = vmatpush.msrb.mxu3 %v994_v29  ;;  %v988_v26 = vsel %vm664_vm3, %v4439_v32, %v8406_v36  ;;  %v8407_v11 = vunpack.i.h.bf16 %v5749_v13  ;;  %v984_v62 = vsel %vm664_vm3, %v4428_v44, %v8408_v16  ;;  %v8409_v32 = vunpack.i.l.bf16 %v5739_v56 }
 0x34d   :  { %1777 = vmatpush.msra.mxu1 %v988_v26  ;;  %v837_v13 = vmul.f32 %v5992_v18, %v821_v60  ;;  %v4605_v17 = vpack.i.bf16 %v1430_v9, %v1429_v25  ;;  %v4610_v29 = vpack.i.bf16 %v1432_v54, %v5933_v27  ;;  %v833_v22 = vmul.f32 %v5929_v47, %v821_v60  ;;  %v6114_v26 = vld [vmem:[#allocation4 + $0x78] sm:$0xff]  ;;  %v6119_v9 = vld [vmem:[#allocation7 + $0x8] sm:$0xff] }
 0x34e   :  { %v990_v3 = vsel %vm664_vm3, %v8407_v11, %v4448_v1  ;;  %v986_v57 = vsel %vm664_vm3, %v8409_v32, %v4434_v4  ;;  %v4423_v44 = vunpack.i.l.bf16 %v8410_v31  ;;  %v829_v36 = vmul.f32 %v5988_v20, %v821_v60  ;;  %v8412_v60 = vld [vmem:[#allocation26_spill] sm:$0xff]  ;;  %v8417_v32 = vld [vmem:[#allocation24_spill] sm:$0xff] }
 0x34f   :  { %1951 = vmatpush.msrb.mxu3 %v990_v3  ;;  %1778 = vmatpush.msra.mxu1 %v984_v62  ;;  %v1435_v18 = vmul.f32 %v6114_v26, %v5974_v53  ;;  %v4409_v25 = vunpack.i.h.bf16 %v5554_v5  ;;  %v8411_v47 = vunpack.i.h.bf16 %v5560_v30  ;;  %v8275_v3 = vunpack.i.h.bf16 %v8412_v60  ;;  %v8415_v30 = vld [vmem:[#allocation31_spill] sm:$0xff] }
 0x350   :  { %v8414_v53 = vunpack.i.l.bf16 %v5554_v5  ;;  %v8416_v16 = vunpack.i.h.bf16 %v8415_v30  ;;  %v8269_v62 = vunpack.i.h.bf16 %v5514_v46 }
 0x351   :  { %1952 = vmatpush.msrb.mxu3 %v986_v57  ;;  %1779 = vmatpush.msra.mxu1 %v841_v8  ;;  %v768_v11 = vsel %vm753_vm4, %v8411_v47, %v4423_v44  ;;  %v4620_v20 = vpack.i.bf16 %v5933_v27, %v1435_v18  ;;  %v4398_v8 = vunpack.i.l.bf16 %v8413_v12  ;;  %v8274_v57 = vunpack.i.l.bf16 %v8417_v32 }
 0x352   :  { %4606 = vrot.lane.b32.xlu0 %v4605_v17, %s5154_s3  ;;  %v764_v54 = vsel %vm753_vm4, %v8414_v53, %v4409_v25 }
 0x353   :  { %1780 = vmatpush.msra.mxu1 %v837_v13  ;;  %v760_v27 = vsel %vm753_vm4, %v8416_v16, %v4398_v8  ;;  %v8418_v13 = vunpack.i.l.bf16 %v8412_v60  ;;  %v8424_v16 = vunpack.i.h.bf16 %v5508_v51 }
 0x354   :  { %4611 = vrot.lane.b32.xlu1 %v4610_v29, %s5154_s3  ;;  %v8419_v29 = vld [vmem:[#allocation32_spill] sm:$0xff] }
 0x355   :  { %1781 = vmatpush.msra.mxu1 %v833_v22  ;;  %v756_v17 = vsel %vm753_vm4, %v8418_v13, %v8275_v3  ;;  %v8264_v22 = vunpack.i.l.bf16 %v8419_v29  ;;  %v8268_v13 = vunpack.i.h.bf16 %v5530_v59 }
 0x357   :  { %1782 = vmatpush.msra.mxu1 %v829_v36  ;;  %v8420_v36 = vld [vmem:[#allocation28_spill] sm:$0xff] }
 0x358   :  { %1783 = vmatmul.f32.vlgmr.msra.gmra.mxu1 %v6119_v9  ;;  %v8421_v18 = vunpack.i.h.bf16 %v8420_v36 }
 0x359   :  { %1912 = vmatpush.msrb.mxu1 %v768_v11  ;;  %v8262_v11 = vunpack.i.h.bf16 %v5540_v6 }
 0x35a   :  { %4621 = vrot.lane.b32.xlu0 %v4620_v20, %s5154_s3  ;;  %v595_v47 = vsel %vm580_vm5, %v8421_v18, %v8274_v57  ;;  %v8422_v20 = vunpack.i.l.bf16 %v5514_v46  ;;  %v8426_v18 = vld [vmem:[#allocation25_spill] sm:$0xff]  ;;  %v4424_v57 = vunpack.i.h.bf16 %v8410_v31 }
 0x35b   :  { %1913 = vmatpush.msrb.mxu1 %v764_v54  ;;  %v8423_v54 = vld [vmem:[#allocation29_spill] sm:$0xff] }
 0x35c   :  { %v591_v53 = vsel %vm580_vm5, %v8422_v20, %v8269_v62  ;;  %v8263_v30 = vunpack.i.l.bf16 %v8423_v54  ;;  %v8427_v20 = vunpack.i.h.bf16 %v5496_v38 }
 0x35d   :  { %1914 = vmatpush.msrb.mxu1 %v760_v27  ;;  %v587_v27 = vsel %vm580_vm5, %v8424_v16, %v8264_v22  ;;  %v8428_v16 = vunpack.i.l.bf16 %v5530_v59  ;;  %v6196_v22 = vld [vmem:[#allocation7] sm:$0xff] }
 0x35e   :  { %v422_v51 = vsel %vm407_vm6, %v8427_v20, %v8263_v30  ;;  %v8273_v20 = vunpack.i.h.bf16 %v5504_v45  ;;  %1841 = vmatmul.f32.vlgmr.msra.gmra.mxu3 %v6196_v22  ;;  %1754 = vmatmul.f32.vlgmr.msra.gmra.mxu0 %v6196_v22 }
 0x35f   :  { %1915 = vmatpush.msrb.mxu1 %v756_v17  ;;  %v8425_v17 = vunpack.i.l.bf16 %v5540_v6 }
 0x361   :  { %1916 = vmatpush.msrb.mxu1 %v595_v47  ;;  %v583_v36 = vsel %vm580_vm5, %v8425_v17, %v8262_v11  ;;  %v8266_v47 = vunpack.i.l.bf16 %v8426_v18  ;;  %v8429_v17 = vld [vmem:[#allocation23_spill] sm:$0xff]  ;;  %v8430_v11 = vunpack.i.h.bf16 %v5524_v43  ;;  %v8432_v43 = vunpack.i.h.bf16 %v5512_v40  ;;  %v8435_v40 = vld [vmem:[#allocation21_spill] sm:$0xff] }
 0x363   :  { %1917 = vmatpush.msrb.mxu1 %v591_v53  ;;  %v8265_v53 = vunpack.i.h.bf16 %v5516_v52  ;;  %v414_v38 = vsel %vm407_vm6, %v8430_v11, %v8266_v47  ;;  %v4574_v47 = vunpack.i.h.bf16 %v5943_v55 }
 0x365   :  { %1918 = vmatpush.msrb.mxu1 %v587_v27  ;;  %v418_v27 = vsel %vm407_vm6, %v8428_v16, %v8268_v13  ;;  %v6198_v16 = vld [vmem:[#allocation7 + $0x20] sm:$0xff]  ;;  %v8437_v13 = vunpack.i.l.bf16 %v5479_v24 }
 0x366   :  { %1786 = vmatmul.f32.gmra.mxu1 %v6198_v16 }
 0x367   :  { %1919 = vmatpush.msrb.mxu1 %v583_v36  ;;  %v8267_v36 = vunpack.i.l.bf16 %v8429_v17 }
 0x369   :  { %1920 = vmatpush.msrb.mxu1 %v422_v51  ;;  %v8431_v51 = vunpack.i.l.bf16 %v5516_v52  ;;  %v249_v11 = vsel %vm234_vm7, %v8432_v43, %v8267_v36  ;;  %v8436_v43 = vunpack.i.h.bf16 %v8435_v40  ;;  %v8439_v40 = vld [vmem:[#allocation42_spill] sm:$0xff] }
 0x36b   :  { %1921 = vmatpush.msrb.mxu1 %v418_v27  ;;  %v410_v30 = vsel %vm407_vm6, %v8431_v51, %v8265_v53  ;;  %v8272_v27 = vunpack.i.h.bf16 %v5479_v24 }
 0x36d   :  { %1922 = vmatpush.msrb.mxu1 %v414_v38  ;;  %v8433_v38 = vld [vmem:[#allocation16_spill] sm:$0xff]  ;;  %v237_v62 = vsel %vm234_vm7, %v8437_v13, %v8272_v27  ;;  %v6243_v13 = vld [vmem:[#allocation7 + $0x38] sm:$0xff] }
 0x36e   :  { %v8270_v51 = vunpack.i.l.bf16 %v8433_v38  ;;  %1789 = vmatmul.f32.gmra.mxu1 %v6243_v13 }
 0x36f   :  { %1923 = vmatpush.msrb.mxu1 %v410_v30  ;;  %v8434_v30 = vunpack.i.l.bf16 %v5504_v45 }
 0x370   :  { %v241_v36 = vsel %vm234_vm7, %v8436_v43, %v8270_v51  ;;  %v4513_v43 = vunpack.i.l.bf16 %v5858_v50  ;;  %v8440_v51 = vld [vmem:[#allocation44_spill] sm:$0xff]  ;;  %v4488_v50 = vunpack.i.l.bf16 %v5826_v28  ;;  %v4463_v28 = vunpack.i.l.bf16 %v5764_v2 }
 0x371   :  { %1924 = vmatpush.msrb.mxu1 %v249_v11  ;;  %v245_v53 = vsel %vm234_vm7, %v8434_v30, %v8273_v20  ;;  %v6221_v11 = vld [vmem:[#allocation7 + $0x18] sm:$0xff]  ;;  %v8438_v30 = vunpack.i.l.bf16 %v5943_v55  ;;  %v1701_v55 = vld [vmem:[%s8201_s2] sm:$0xff] }
 0x372   :  { %1844 = vmatmul.f32.gmra.mxu3 %v6221_v11  ;;  %1757 = vmatmul.f32.gmra.mxu0 %v6221_v11 }
 0x373   :  { %1925 = vmatpush.msrb.mxu1 %v245_v53  ;;  %v1341_v53 = vsel %vm318_vm1, %v8438_v30, %v4574_v47  ;;  %v4499_v47 = vunpack.i.h.bf16 %v5845_v14 }
 0x375   :  { %1926 = vmatpush.msrb.mxu1 %v241_v36  ;;  %v4524_v36 = vunpack.i.h.bf16 %v5860_v15 }
 0x377   :  { %1927 = vmatpush.msrb.mxu1 %v237_v62  ;;  %v6238_v62 = vld [vmem:[#allocation7 + $0x30] sm:$0xff] }
 0x379   :  { %2028 = vmatpush.msra.mxu1 %v1341_v53  ;;  %v5162_v53 = vmov 0  }
 0x37a   :  { %1847 = vmatmul.f32.gmra.mxu3 %v6238_v62  ;;  %4625 = vset.pattern.permute.xlu1 %v5162_v53 }
 0x37b   :  { %2029 = vmatpush.msra.mxu1 %v5937_v0  ;;  %v8441_v0 = vunpack.i.l.bf16 %v5860_v15  ;;  %1707 = vperm.xlu1 %4625, %v1701_v55   ;;  %v4474_v15 = vunpack.i.h.bf16 %v5775_v42  ;;  %v823_v55 = vperm.slane %v6056_v39, 2  ;;  %v1703_v42 = vld [vmem:[%s8201_s2 + $0x10] sm:$0xff] }
 0x37c   :  { %4627 = vset.pattern.permute.xlu0 %v5162_v53  ;;  %4626 = vset.pattern.permute.xlu2 %v5162_v53 }
 0x37d   :  { %2030 = vmatpush.msra.mxu1 %v8439_v40  ;;  %v1170_v30 = vsel %vm491_vm2, %v8441_v0, %v4524_v36  ;;  %v8443_v36 = vunpack.i.l.bf16 %v5845_v14  ;;  %1760 = vmatmul.f32.gmra.mxu0 %v6238_v62  ;;  %v1704_v14 = vld [vmem:[%s8201_s2 + $0x18] sm:$0xff]  ;;  %v999_v53 = vsel %vm664_vm3, %v4473_v61, %v4474_v15  ;;  %v843_v2 = vmul.f32 %v6036_v35, %v823_v55 }
 0x37e   :  { %v2138_v61 = vld [vmem:[%s8204_s5] ss:$8 sm:$0xf]  ;;  %1717 = vperm.xlu0 %4627, %v1703_v42  }
 0x37f   :  { %2031 = vmatpush.msra.mxu1 %v8440_v51  ;;  %v8442_v51 = vunpack.i.h.bf16 %v5839_v7  ;;  %v1162_v0 = vsel %vm491_vm2, %v8443_v36, %v4499_v47  ;;  %v8444_v7 = vunpack.i.h.bf16 %v5828_v37  ;;  %v4449_v47 = vunpack.i.h.bf16 %v5753_v58  ;;  %1953 = vmatpush.msrb.mxu3 %v843_v2 }
 0x380   :  { %v8445_v37 = vunpack.i.h.bf16 %v5762_v19  ;;  %v835_v36 = vmul.f32 %v6032_v23, %v823_v55  ;;  %v4438_v19 = vunpack.i.l.bf16 %v5721_v49  ;;  %v831_v23 = vmul.f32 %v5982_v63, %v823_v55  ;;  %v4184_v63 = vld [vmem:[%s8204_s5 + $0x1] ss:$8 sm:$0xf] }
 0x381   :  { %2032 = vmatpush.msra.mxu1 %v1170_v30  ;;  %v1166_v40 = vsel %vm491_vm2, %v8442_v51, %v4513_v43  ;;  %v1158_v43 = vsel %vm491_vm2, %v8444_v7, %v4488_v50  ;;  %v6265_v30 = vld [vmem:[#allocation7 + $0x48] sm:$0xff]  ;;  %v839_v51 = vmul.f32 %v6084_v21, %v823_v55  ;;  %v991_v35 = vsel %vm664_vm3, %v4448_v1, %v4449_v47 }
 0x382   :  { %1850 = vmatmul.f32.gmra.mxu3 %v6265_v30  ;;  %v995_v50 = vsel %vm664_vm3, %v8445_v37, %v4463_v28  ;;  %v2141_v21 = vperm.slane %v2138_v61, 1  ;;  %v987_v15 = vsel %vm664_vm3, %v4434_v4, %v4438_v19  ;;  %v2143_v58 = vperm.slane %v2138_v61, 3  ;;  %v1702_v4 = vld [vmem:[%s8201_s2 + $0x8] sm:$0xff] }
 0x383   :  { %2033 = vmatpush.msra.mxu1 %v1166_v40  ;;  %1722 = vperm.xlu1 %4625, %v1704_v14   ;;  %v6280_v40 = vld [vmem:[#allocation7 + $0x50] sm:$0xff]  ;;  %v2312_v56 = vperm.slane %v4184_v63, 2  ;;  %v2140_v47 = vperm.slane %v2138_v61, 0 }
 0x384   :  { %1954 = vmatpush.msrb.mxu3 %v839_v51  ;;  %1792 = vmatmul.f32.gmra.mxu1 %v6280_v40  ;;  %v4185_v28 = vld [vmem:[%s8204_s5 + $0x2] ss:$8 sm:$0xf]  ;;  %v2142_v51 = vperm.slane %v2138_v61, 2 }
 0x385   :  { %2034 = vmatpush.msra.mxu1 %v1162_v0  ;;  %1763 = vmatmul.f32.gmra.mxu0 %v6265_v30  ;;  %v2311_v0 = vperm.slane %v4184_v63, 1  ;;  %v2480_v7 = vperm.slane %v4185_v28, 0  ;;  %v2483_v2 = vperm.slane %v4185_v28, 3  ;;  %v6353_v61 = vld [vmem:[%s8204_s5 + $0x7] ss:$8 sm:$0xf] }
 0x386   :  { %1955 = vmatpush.msrb.mxu3 %v835_v36  ;;  %2150 = vrot.lane.b32.xlu0 %v2143_v58, %s5154_s3 }
 0x387   :  { %2035 = vmatpush.msra.mxu1 %v1158_v43  ;;  %1712 = vperm.xlu2 %4626, %v1702_v4  }
 0x388   :  { %1956 = vmatpush.msrb.mxu3 %v831_v23  ;;  %v2310_v23 = vperm.slane %v4184_v63, 0 }
 0x389   :  { %2036 = vmatpush.msra.mxu1 %v999_v53  ;;  %v2482_v53 = vperm.slane %v4185_v28, 2 }
 0x38a   :  { %1957 = vmatmul.f32.vlgmr.msrb.gmra.mxu3 %v6119_v9 }
 0x38b   :  { %2037 = vmatpush.msra.mxu1 %v995_v50  ;;  %2146 = vrot.lane.b32.xlu1 %v2141_v21, %s5154_s3  ;;  %v6301_v49 = vpop.permute.xlu2 %4586  ;;  %v6338_v50 = vld [vmem:[%s8204_s5 + $0x3] ss:$8 sm:$0xf] }
 0x38c   :  { %1928 = vmatmul.f32.vlgmr.msrb.gmra.mxu1 %v6196_v22  ;;  %v2650_v36 = vperm.slane %v6338_v50, 0  ;;  %v2651_v42 = vperm.slane %v6338_v50, 1  ;;  %v2653_v21 = vperm.slane %v6338_v50, 3  ;;  %v4589_v3 = vunpack.i.h.bf16 %v6301_v49 }
 0x38d   :  { %2038 = vmatpush.msra.mxu1 %v991_v35 }
 0x38e   :  { %2316 = vrot.lane.b32.xlu0 %v2311_v0, %s5155_s18  ;;  %v2313_v0 = vperm.slane %v4184_v63, 3  ;;  %v6380_v63 = vld [vmem:[%s8204_s5 + $0x5] ss:$8 sm:$0xf] }
 0x38f   :  { %2039 = vmatpush.msra.mxu1 %v987_v15  ;;  %2144 = vrot.lane.b32.xlu2 %v2140_v47, %s5154_s3  ;;  %v3218_v15 = vperm.slane %v6353_v61, 0 }
 0x392   :  { %1960 = vmatmul.f32.gmra.mxu3 %v6198_v16 }
 0x393   :  { %2318 = vrot.lane.b32.xlu1 %v2312_v56, %s5155_s18  ;;  %v6364_v56 = vld [vmem:[%s8204_s5 + $0x6] ss:$8 sm:$0xf] }
 0x394   :  { %1931 = vmatmul.f32.gmra.mxu1 %v6221_v11  ;;  %v3049_v47 = vperm.slane %v6364_v56, 1 }
 0x396   :  { %2488 = vrot.lane.b32.xlu0 %v2482_v53, %s5156_s21 }
 0x397   :  { %2148 = vrot.lane.b32.xlu2 %v2142_v51, %s5154_s3 }
 0x39a   :  { %1963 = vmatmul.f32.gmra.mxu3 %v6243_v13 }
 0x39b   :  { %2484 = vrot.lane.b32.xlu1 %v2480_v7, %s5156_s21  ;;  %v3048_v7 = vperm.slane %v6364_v56, 0 }
 0x39c   :  { %1934 = vmatmul.f32.gmra.mxu1 %v6238_v62 }
 0x39d   :  { %v6311_v1 = vpop.permute.xlu2 %4601 }
 0x39e   :  { %2654 = vrot.lane.b32.xlu0 %v2650_v36, %s5157_s24  ;;  %v4604_v53 = vunpack.i.h.bf16 %v6311_v1 }
 0x39f   :  { %2314 = vrot.lane.b32.xlu2 %v2310_v23, %s5155_s18  ;;  %v2481_v23 = vperm.slane %v4185_v28, 1  ;;  %v2879_v28 = vperm.slane %v6380_v63, 1 }
 0x3a2   :  { %1966 = vmatmul.f32.gmra.mxu3 %v6280_v40 }
 0x3a3   :  { %2490 = vrot.lane.b32.xlu1 %v2483_v2, %s5156_s21 }
 0x3a4   :  { %1937 = vmatmul.f32.gmra.mxu1 %v6265_v30 }
 0x3a5   :  { %v6323_v43 = vpop.permute.xlu2 %4616 }
 0x3a6   :  { %v8271_v55 = vunpack.i.h.bf16 %v6323_v43  ;;  %v4618_v14 = vunpack.i.l.bf16 %v6323_v43  ;;  %2660 = vrot.lane.b32.xlu0 %v2653_v21, %s5157_s24  ;;  %v2878_v21 = vperm.slane %v6380_v63, 0 }
 0x3a7   :  { %2320 = vrot.lane.b32.xlu2 %v2313_v0, %s5155_s18 }
 0x3a8   :  { %v1510_v37 = vsel %vm145_vm0, %v4618_v14, %v8271_v55 }
 0x3a9   :  { %1895 = vmatpush.msrb.mxu0 %v1510_v37 }
 0x3ab   :  { %2656 = vrot.lane.b32.xlu1 %v2651_v42, %s5157_s24 }
 0x3ae   :  { %3052 = vrot.lane.b32.xlu0 %v3048_v7, %s5160_s27  ;;  %v824_v7 = vperm.slane %v6056_v39, 3 }
 0x3af   :  { %2486 = vrot.lane.b32.xlu2 %v2481_v23, %s5156_s21 }
 0x3b0   :  { %v844_v20 = vmul.f32 %v6114_v26, %v824_v7  ;;  %v840_v26 = vmul.f32 %v5888_v48, %v824_v7 }
 0x3b2   :  { %2040 = vmatpush.msra.mxu1 %v844_v20 }
 0x3b3   :  { %3222 = vrot.lane.b32.xlu1 %v3218_v15, %s5158_s25  ;;  %v4603_v15 = vunpack.i.l.bf16 %v6311_v1 }
 0x3b4   :  { %v6345_v19 = vpop.permute.xlu0 %4576  ;;  %v6347_v35 = vpop.permute.xlu1 %4581  ;;  %2041 = vmatpush.msra.mxu1 %v840_v26  ;;  %v6435_v26 = vld [vmem:[%s8204_s5 + $0x20] ss:$8 sm:$0xf] }
 0x3b5   :  { %v4583_v55 = vunpack.i.l.bf16 %v6347_v35  ;;  %v4578_v23 = vunpack.i.l.bf16 %v6345_v19 }
 0x3b6   :  { %2882 = vrot.lane.b32.xlu0 %v2878_v21, %s5161_s28  ;;  %v6408_v21 = vld [vmem:[#allocation7 + $0x10] sm:$0xff] }
 0x3bb   :  { %3054 = vrot.lane.b32.xlu1 %v3049_v47, %s5160_s27  ;;  %v4579_v47 = vunpack.i.h.bf16 %v6345_v19 }
 0x3bc   :  { %v6359_v58 = vpop.permute.xlu0 %4591 }
 0x3bd   :  { %v8277_v2 = vunpack.i.h.bf16 %v6359_v58  ;;  %v4593_v51 = vunpack.i.l.bf16 %v6359_v58 }
 0x3be   :  { %v6366_v4 = vpop.permute.xlu1 %4596 }
 0x3bf   :  { %v1501_v19 = vsel %vm145_vm0, %v4589_v3, %v4593_v51 }
 0x3c3   :  { %2884 = vrot.lane.b32.xlu1 %v2879_v28, %s5161_s28 }
 0x3c4   :  { %v6375_v37 = vpop.permute.xlu0 %4606 }
 0x3c5   :  { %v8276_v36 = vunpack.i.l.bf16 %v6375_v37 }
 0x3c6   :  { %v6384_v42 = vpop.permute.xlu1 %4611 }
 0x3c7   :  { %v4614_v0 = vunpack.i.h.bf16 %v6384_v42  ;;  %v1506_v27 = vsel %vm145_vm0, %v4604_v53, %v8276_v36  ;;  %v1502_v36 = vsel %vm145_vm0, %v4593_v51, %v8277_v2  ;;  %v4613_v3 = vunpack.i.l.bf16 %v6384_v42  ;;  %v8447_v42 = vld [vmem:[#allocation22_spill] sm:$0xff] }
 0x3c8   :  { %1896 = vmatpush.msrb.mxu0 %v1506_v27  ;;  %v1505_v27 = vsel %vm145_vm0, %v4603_v15, %v4604_v53  ;;  %v836_v53 = vmul.f32 %v6040_v34, %v824_v7  ;;  %v2652_v15 = vperm.slane %v6338_v50, 2  ;;  %v1497_v34 = vsel %vm145_vm0, %v4578_v23, %v4579_v47 }
 0x3c9   :  { %v1509_v1 = vsel %vm145_vm0, %v4614_v0, %v4618_v14  ;;  %v1498_v14 = vsel %vm145_vm0, %v4579_v47, %v4583_v55  ;;  %v4399_v0 = vunpack.i.h.bf16 %v8413_v12  ;;  %v832_v51 = vmul.f32 %v5879_v41, %v824_v7  ;;  %v8448_v7 = vld [vmem:[#allocation47_spill] sm:$0xff] }
 0x3ca   :  { %1808 = vmatpush.msra.mxu2 %v1509_v1  ;;  %1897 = vmatpush.msrb.mxu0 %v1502_v36  ;;  %v8446_v1 = vld [vmem:[#allocation30_spill] sm:$0xff]  ;;  %v769_v36 = vsel %vm753_vm4, %v4423_v44, %v4424_v57  ;;  %v4599_v57 = vunpack.i.h.bf16 %v6366_v4  ;;  %v4598_v41 = vunpack.i.l.bf16 %v6366_v4  ;;  %v3389_v50 = vperm.slane %v6435_v26, 1 }
 0x3cb   :  { %v4413_v28 = vunpack.i.l.bf16 %v8446_v1  ;;  %2042 = vmatpush.msra.mxu1 %v836_v53  ;;  %2658 = vrot.lane.b32.xlu2 %v2652_v15, %s5157_s24  ;;  %v4258_v5 = vunpack.i.l.bf16 %v8447_v42  ;;  %v4379_v47 = vunpack.i.h.bf16 %v8417_v32  ;;  %v4584_v1 = vunpack.i.h.bf16 %v6347_v35  ;;  %v8457_v42 = vld [vmem:[#allocation19_spill] sm:$0xff] }
 0x3cc   :  { %1809 = vmatpush.msra.mxu2 %v1505_v27  ;;  %v6416_v2 = vpop.permute.xlu0 %4621  ;;  %1898 = vmatpush.msrb.mxu0 %v1498_v14  ;;  %v4609_v27 = vunpack.i.h.bf16 %v6375_v37  ;;  %v3220_v14 = vperm.slane %v6353_v61, 2  ;;  %v4588_v53 = vunpack.i.l.bf16 %v6301_v49 }
 0x3cd   :  { %v4624_v20 = vunpack.i.h.bf16 %v6416_v2  ;;  %v4623_v48 = vunpack.i.l.bf16 %v6416_v2  ;;  %4172 = vmatmul.msk.f32.vlgmr.msrb.gmra.mxu0 %vm1725_vm8, %v6408_v21  ;;  %v765_v31 = vsel %vm753_vm4, %v4409_v25, %v4413_v28  ;;  %v761_v25 = vsel %vm753_vm4, %v4398_v8, %v4399_v0  ;;  %2043 = vmatpush.msra.mxu1 %v832_v51  ;;  %v8449_v28 = vld [vmem:[#allocation46_spill] sm:$0xff]  ;;  %v6464_v8 = vld [vmem:[#allocation7 + $0x28] sm:$0xff] }
 0x3ce   :  { %1810 = vmatpush.msra.mxu2 %v1501_v19  ;;  %1999 = vmatpush.msra.mxu0 %v769_v36  ;;  %v1508_v23 = vsel %vm145_vm0, %v4609_v27, %v4613_v3  ;;  %v8450_v19 = vunpack.i.h.bf16 %v8412_v60  ;;  %v1504_v0 = vsel %vm145_vm0, %v4598_v41, %v4599_v57  ;;  %v8452_v36 = vld [vmem:[#allocation20_spill] sm:$0xff]  ;;  %v4359_v60 = vunpack.i.h.bf16 %v8419_v29  ;;  %v8454_v51 = vld [vmem:[#allocation43_spill] sm:$0xff] }
 0x3cf   :  { %v1512_v44 = vsel %vm145_vm0, %v4623_v48, %v4624_v20  ;;  %3394 = vrot.lane.b32.xlu0 %v3389_v50, %s5159_s26  ;;  %v8451_v20 = vld [vmem:[#allocation45_spill] sm:$0xff]  ;;  %v4253_v15 = vunpack.i.l.bf16 %v8452_v36  ;;  %v8453_v3 = vunpack.i.l.bf16 %v8417_v32  ;;  %3226 = vrot.lane.b32.xlu1 %v3220_v14, %s5158_s25  ;;  %v1500_v49 = vsel %vm145_vm0, %v4584_v1, %v4588_v53  ;;  %v6502_v14 = vld [vmem:[#allocation7 + $0x40] sm:$0xff] }
 0x3d0   :  { %1811 = vmatpush.msra.mxu2 %v1497_v34  ;;  %2000 = vmatpush.msra.mxu0 %v765_v31  ;;  %v757_v12 = vsel %vm753_vm4, %v8450_v19, %v4258_v5  ;;  %v8455_v31 = vunpack.i.h.bf16 %v5514_v46  ;;  %v3219_v32 = vperm.slane %v6353_v61, 1  ;;  %v3050_v57 = vperm.slane %v6364_v56, 2  ;;  %v8456_v50 = vld [vmem:[#allocation41_spill] sm:$0xff] }
 0x3d1   :  { %4168 = vmatmul.msk.f32.vlgmr.msra.gmra.mxu2 %vm1725_vm8, %v6408_v21  ;;  %2069 = vmatpush.msra.mxu3 %v1512_v44  ;;  %v596_v34 = vsel %vm580_vm5, %v8453_v3, %v4379_v47  ;;  %v4248_v5 = vunpack.i.l.bf16 %v8457_v42  ;;  %v3051_v47 = vperm.slane %v6364_v56, 3  ;;  %v4319_v56 = vunpack.i.h.bf16 %v8426_v18 }
 0x3d2   :  { %1854 = vmatpush.msrb.mxu2 %v8448_v7  ;;  %2001 = vmatpush.msra.mxu0 %v761_v25  ;;  %v592_v44 = vsel %vm580_vm5, %v8455_v31, %v4253_v15  ;;  %v4339_v7 = vunpack.i.h.bf16 %v8423_v54  ;;  %v8458_v25 = vunpack.i.l.bf16 %v8419_v29  ;;  %v8461_v29 = vld [vmem:[#allocation38_spill] sm:$0xff]  ;;  %v8463_v53 = vunpack.i.l.bf16 %v8423_v54 }
 0x3d3   :  { %2070 = vmatpush.msra.mxu3 %v1508_v23  ;;  %2044 = vmatmul.f32.vlgmr.msra.gmra.mxu1 %v6119_v9  ;;  %v8459_v23 = vld [vmem:[#allocation40_spill] sm:$0xff]  ;;  %v8465_v36 = vunpack.i.h.bf16 %v5530_v59  ;;  %v2880_v3 = vperm.slane %v6380_v63, 2  ;;  %v8466_v54 = vld [vmem:[#allocation34_spill] sm:$0xff]  ;;  %v4299_v31 = vunpack.i.h.bf16 %v8429_v17  ;;  %v8468_v59 = vunpack.i.l.bf16 %v8426_v18 }
 0x3d4   :  { %1855 = vmatpush.msrb.mxu2 %v8449_v28  ;;  %2002 = vmatpush.msra.mxu0 %v757_v12  ;;  %v588_v46 = vsel %vm580_vm5, %v8458_v25, %v4359_v60  ;;  %v8460_v28 = vunpack.i.h.bf16 %v5540_v6  ;;  %v8462_v12 = vld [vmem:[#allocation18_spill] sm:$0xff]  ;;  %v423_v6 = vsel %vm407_vm6, %v8463_v53, %v4339_v7  ;;  %v3388_v60 = vperm.slane %v6435_v26, 0  ;;  %v8471_v18 = vld [vmem:[#allocation36_spill] sm:$0xff] }
 0x3d5   :  { %2071 = vmatpush.msra.mxu3 %v1504_v0  ;;  %4173 = vmatmul.msk.f32.gmra.mxu0 %vm1725_vm8, %v6464_v8  ;;  %v4243_v0 = vunpack.i.l.bf16 %v8462_v12  ;;  %v2881_v26 = vperm.slane %v6380_v63, 3  ;;  %v4279_v7 = vunpack.i.h.bf16 %v8433_v38  ;;  %v8478_v12 = vunpack.i.l.bf16 %v8433_v38 }
 0x3d6   :  { %1856 = vmatpush.msrb.mxu2 %v8451_v20  ;;  %2003 = vmatpush.msra.mxu0 %v596_v34  ;;  %v584_v19 = vsel %vm580_vm5, %v8460_v28, %v4248_v5  ;;  %v8464_v20 = vld [vmem:[#allocation39_spill] sm:$0xff]  ;;  %v822_v34 = vperm.slane %v6056_v39, 1  ;;  %v8470_v39 = vunpack.i.h.bf16 %v5516_v52  ;;  %v8472_v5 = vld [vmem:[#allocation14_spill] sm:$0xff]  ;;  %v8473_v52 = vunpack.i.l.bf16 %v8429_v17  ;;  %v8476_v28 = vld [vmem:[#allocation17_spill] sm:$0xff] }
 0x3d7   :  { %2072 = vmatpush.msra.mxu3 %v1500_v49  ;;  %3224 = vrot.lane.b32.xlu2 %v3219_v32, %s5158_s25  ;;  %v419_v15 = vsel %vm407_vm6, %v8465_v36, %v4243_v0  ;;  %v8469_v32 = vld [vmem:[#allocation37_spill] sm:$0xff]  ;;  %v4233_v63 = vunpack.i.l.bf16 %v8472_v5  ;;  %v242_v0 = vsel %vm234_vm7, %v8478_v12, %v4279_v7  ;;  %v8480_v53 = vunpack.i.h.bf16 %v5479_v24 }
 0x3d8   :  { %1857 = vmatpush.msrb.mxu2 %v8454_v51  ;;  %2004 = vmatpush.msra.mxu0 %v592_v44  ;;  %v8467_v51 = vld [vmem:[#allocation15_spill] sm:$0xff]  ;;  %v415_v44 = vsel %vm407_vm6, %v8468_v59, %v4319_v56  ;;  %v842_v42 = vmul.f32 %v6029_v10, %v822_v34  ;;  %v250_v25 = vsel %vm234_vm7, %v8473_v52, %v4299_v31  ;;  %v4228_v10 = vunpack.i.l.bf16 %v8476_v28 }
 0x3d9   :  { %4169 = vmatmul.msk.f32.gmra.mxu2 %vm1725_vm8, %v6464_v8  ;;  %4180 = vmatmul.msk.f32.vlgmr.msra.gmra.mxu3 %vm1725_vm8, %v6408_v21  ;;  %v4238_v49 = vunpack.i.l.bf16 %v8467_v51  ;;  %v834_v17 = vmul.f32 %v6026_v33, %v822_v34  ;;  %v8481_v33 = vunpack.i.h.bf16 %v6323_v43  ;;  %v8482_v24 = vunpack.i.l.bf16 %v6375_v37 }
 0x3da   :  { %1858 = vmatpush.msrb.mxu2 %v8456_v50  ;;  %2005 = vmatpush.msra.mxu0 %v588_v46  ;;  %v8474_v46 = vld [vmem:[#allocation35_spill] sm:$0xff]  ;;  %v3221_v36 = vperm.slane %v6353_v61, 3  ;;  %v1499_v61 = vsel %vm145_vm0, %v4583_v55, %v4584_v1 }
 0x3db   :  { %3056 = vrot.lane.b32.xlu0 %v3050_v57, %s5160_s27  ;;  %3058 = vrot.lane.b32.xlu1 %v3051_v47, %s5160_s27  ;;  %v6538_v57 = vld [vmem:[#allocation7 + $0x58] sm:$0xff]  ;;  %v411_v50 = vsel %vm407_vm6, %v8470_v39, %v4238_v49  ;;  %v1511_v38 = vsel %vm145_vm0, %v8481_v33, %v4623_v48 }
 0x3dc   :  { %1859 = vmatpush.msrb.mxu2 %v8459_v23  ;;  %2006 = vmatpush.msra.mxu0 %v584_v19  ;;  %v8475_v47 = vld [vmem:[#allocation49_spill] sm:$0xff]  ;;  %v8477_v19 = vunpack.i.h.bf16 %v5504_v45  ;;  %v8479_v45 = vld [vmem:[#allocation48_spill] sm:$0xff] }
 0x3dd   :  { %4174 = vmatmul.msk.f32.gmra.mxu0 %vm1725_vm8, %v6502_v14  ;;  %2047 = vmatmul.f32.gmra.mxu1 %v6198_v16  ;;  %v838_v23 = vmul.f32 %v8475_v47, %v822_v34  ;;  %v830_v56 = vmul.f32 %v8479_v45, %v822_v34 }
 0x3de   :  { %1860 = vmatpush.msrb.mxu2 %v8461_v29  ;;  %2007 = vmatpush.msra.mxu0 %v423_v6  ;;  %v246_v29 = vsel %vm234_vm7, %v8477_v19, %v4233_v63  ;;  %v238_v6 = vsel %vm234_vm7, %v8480_v53, %v4228_v10 }
 0x3df   :  { %3392 = vrot.lane.b32.xlu2 %v3388_v60, %s5159_s26  ;;  %v1784_v60 = vpop.f32.mrf.mxu1 }
 0x3e0   :  { %1861 = vmatpush.msrb.mxu2 %v8464_v20  ;;  %2008 = vmatpush.msra.mxu0 %v419_v15  ;;  %v1507_v20 = vsel %vm145_vm0, %v8482_v24, %v4609_v27 }
 0x3e1   :  { %4170 = vmatmul.msk.f32.gmra.mxu2 %vm1725_vm8, %v6502_v14  ;;  %4181 = vmatmul.msk.f32.gmra.mxu3 %vm1725_vm8, %v6464_v8  ;;  %v6604_v4 = vpop.permute.xlu2 %1712 }
 0x3e2   :  { %1862 = vmatpush.msrb.mxu2 %v8466_v54  ;;  %2009 = vmatpush.msra.mxu0 %v415_v44  ;;  %v6647_v54 = vpop.f32.mrf.mxu3 }
 0x3e3   :  { %2886 = vrot.lane.b32.xlu0 %v2880_v3, %s5161_s28  ;;  %2888 = vrot.lane.b32.xlu1 %v2881_v26, %s5161_s28 }
 0x3e4   :  { %1863 = vmatpush.msrb.mxu2 %v8469_v32  ;;  %2010 = vmatpush.msra.mxu0 %v411_v50 }
 0x3e5   :  { %4175 = vmatmul.msk.f32.gmra.mxu0 %vm1725_vm8, %v6538_v57  ;;  %2050 = vmatmul.f32.gmra.mxu1 %v6243_v13 }
 0x3e6   :  { %1864 = vmatpush.msrb.mxu2 %v8471_v18  ;;  %2011 = vmatpush.msra.mxu0 %v250_v25 }
 0x3e7   :  { %3228 = vrot.lane.b32.xlu2 %v3221_v36, %s5158_s25  ;;  %v1787_v49 = vpop.f32.mrf.mxu1 }
 0x3e8   :  { %1865 = vmatpush.msrb.mxu2 %v8474_v46  ;;  %2012 = vmatpush.msra.mxu0 %v246_v29 }
 0x3e9   :  { %4171 = vmatmul.msk.f32.gmra.mxu2 %vm1725_vm8, %v6538_v57  ;;  %4182 = vmatmul.msk.f32.gmra.mxu3 %vm1725_vm8, %v6502_v14  ;;  %v2145_v37 = vpop.permute.xlu2 %2144 }
 0x3ea   :  { %1866 = vmatpush.msrb.mxu2 %v842_v42  ;;  %2013 = vmatpush.msra.mxu0 %v242_v0  ;;  %v6695_v45 = vmul.f32 0.0, %v2145_v37 }
 0x3ec   :  { %1867 = vmatpush.msrb.mxu2 %v838_v23  ;;  %2014 = vmatpush.msra.mxu0 %v238_v6  ;;  %8491 = vst [vmem:[#allocation29_spill] sm:$0xff] %v6695_v45 }
 0x3ed   :  { %2015 = vmatmul.f32.vlgmr.msra.gmra.mxu0 %v6196_v22  ;;  %v8483_v22 = vunpack.i.h.bf16 %v6359_v58  ;;  %2053 = vmatmul.f32.gmra.mxu1 %v6280_v40 }
 0x3ee   :  { %1868 = vmatpush.msrb.mxu2 %v834_v17 }
 0x3ef   :  { %v1503_v43 = vsel %vm145_vm0, %v8483_v22, %v4598_v41 }
 0x3f0   :  { %1869 = vmatpush.msrb.mxu2 %v830_v56  ;;  %v6610_v2 = vpop.permute.xlu0 %1717 }
 0x3f1   :  { %1870 = vmatmul.f32.vlgmr.msrb.gmra.mxu2 %v6119_v9  ;;  %4183 = vmatmul.msk.f32.gmra.mxu3 %vm1725_vm8, %v6538_v57  ;;  %v6596_v9 = vpop.permute.xlu1 %1707  ;;  %v6615_v55 = vpop.permute.xlu2 %2148 }
 0x3f2   :  { %1982 = vmatpush.msra.mxu2 %v1511_v38 }
 0x3f4   :  { %1983 = vmatpush.msra.mxu2 %v1507_v20 }
 0x3f5   :  { %2018 = vmatmul.f32.gmra.mxu0 %v6221_v11  ;;  %v6655_v59 = vpop.f32.mrf.mxu3 }
 0x3f6   :  { %1984 = vmatpush.msra.mxu2 %v1503_v43 }
 0x3f8   :  { %1985 = vmatpush.msra.mxu2 %v1499_v61  ;;  %v6617_v11 = vpop.permute.xlu0 %2150 }
 0x3f9   :  { %1873 = vmatmul.f32.gmra.mxu2 %v6198_v16  ;;  %v6608_v58 = vpop.permute.xlu1 %1722  ;;  %v2315_v48 = vpop.permute.xlu2 %2314 }
 0x3fa   :  { %v6689_v17 = vmul.f32 0.0, %v2315_v48 }
 0x3fc   :  { %8488 = vst [vmem:[#allocation24_spill] sm:$0xff] %v6689_v17 }
 0x3fd   :  { %2021 = vmatmul.f32.gmra.mxu0 %v6238_v62  ;;  %v6663_v50 = vpop.f32.mrf.mxu3 }
 0x400   :  { %v6625_v62 = vpop.permute.xlu0 %2316 }
 0x401   :  { %1876 = vmatmul.f32.gmra.mxu2 %v6243_v13  ;;  %v2147_v35 = vpop.permute.xlu1 %2146  ;;  %v6678_v28 = vsel %vm318_vm1, %v2315_v48, %v6625_v62 }
 0x402   :  { %v6621_v16 = vsel %vm145_vm0, %v2147_v35, %v6615_v55  ;;  %v6687_v29 = vsel %vm145_vm0, %v2145_v37, %v2147_v35 }
 0x405   :  { %2024 = vmatmul.f32.gmra.mxu0 %v6265_v30  ;;  %v6697_v53 = vpop.f32.mrf.mxu3 }
 0x408   :  { %v6629_v13 = vpop.permute.xlu0 %2488 }
 0x409   :  { %1879 = vmatmul.f32.gmra.mxu2 %v6280_v40  ;;  %v6631_v30 = vpop.permute.xlu1 %2318 }
 0x410   :  { %v2655_v40 = vpop.permute.xlu0 %2654 }
 0x411   :  { %4176 = vmatmul.msk.f32.vlgmr.msra.gmra.mxu2 %vm1725_vm8, %v6408_v21  ;;  %v2485_v27 = vpop.permute.xlu1 %2484  ;;  %v6639_v21 = vpop.permute.xlu2 %2320 }
 0x412   :  { %v6691_v12 = vmul.f32 0.0, %v2485_v27 }
 0x414   :  { %8489 = vst [vmem:[#allocation32_spill] sm:$0xff] %v6691_v12 }
 0x418   :  { %v6637_v41 = vpop.permute.xlu0 %2660 }
 0x419   :  { %4177 = vmatmul.msk.f32.gmra.mxu2 %vm1725_vm8, %v6464_v8  ;;  %8484 = vst [vmem:[#allocation33_spill] sm:$0xff] %v6637_v41  ;;  %v6641_v1 = vpop.permute.xlu1 %2490  ;;  %v1755_v8 = vpop.f32.mrf.mxu0 }
 0x41a   :  { %v6645_v3 = vpop.permute.xlu2 %2486  ;;  %v1756_v18 = vadd.f32 %v1755_v8, %v6596_v9 }
 0x41b   :  { %v6682_v10 = vsel %vm491_vm2, %v2485_v27, %v6645_v3 }
 0x41c   :  { %v1785_v52 = vadd.f32 %v1784_v60, %v1756_v18 }
 0x420   :  { %v6643_v15 = vpop.permute.xlu0 %3052 }
 0x421   :  { %4178 = vmatmul.msk.f32.gmra.mxu2 %vm1725_vm8, %v6502_v14  ;;  %v6649_v14 = vpop.permute.xlu1 %2656  ;;  %v1758_v34 = vpop.f32.mrf.mxu0 }
 0x422   :  { %v1759_v25 = vadd.f32 %v1758_v34, %v6604_v4  ;;  %v6722_v48 = vsel %vm664_vm3, %v2655_v40, %v6649_v14 }
 0x424   :  { %v1788_v56 = vadd.f32 %v1787_v49, %v1759_v25  ;;  %v6732_v49 = vmul.f32 0.0, %v2655_v40 }
 0x425   :  { %v6653_v31 = vpop.permute.xlu2 %2658 }
 0x426   :  { %8495 = vst [vmem:[#allocation21_spill] sm:$0xff] %v6732_v49 }
 0x428   :  { %v6651_v51 = vpop.permute.xlu0 %2882 }
 0x429   :  { %4179 = vmatmul.msk.f32.gmra.mxu2 %vm1725_vm8, %v6538_v57  ;;  %v6657_v44 = vpop.permute.xlu1 %3222  ;;  %v1761_v26 = vpop.f32.mrf.mxu0 }
 0x42a   :  { %v1790_v57 = vpop.f32.mrf.mxu1  ;;  %v1762_v8 = vadd.f32 %v1761_v26, %v6610_v2 }
 0x42c   :  { %v1791_v26 = vadd.f32 %v1790_v57, %v1762_v8 }
 0x431   :  { %v6661_v39 = vpop.permute.xlu2 %3224  ;;  %v6666_v42 = vpop.permute.xlu1 %3054 }
 0x432   :  { %8486 = vst [vmem:[#allocation27_spill] sm:$0xff] %v6661_v39  ;;  %v1764_v63 = vpop.f32.mrf.mxu0  ;;  %v1793_v23 = vpop.f32.mrf.mxu1 }
 0x439   :  { %v6684_v19 = vpop.permute.xlu2 %3392 }
 0x43a   :  { %v6730_v34 = vpop.f32.mrf.mxu1 }
 0x441   :  { %v6659_v32 = vpop.permute.xlu0 %3394 }
 0x442   :  { %8485 = vst [vmem:[#allocation26_spill] sm:$0xff] %v6659_v32 }
 0x44a   :  { %v1900_v20 = vpop.f32.mrf.mxu0 }
 0x44d   :  { %v6668_v5 = vpop.permute.xlu0 %3056 }
 0x44e   :  { %v6673_v7 = vsel %vm580_vm5, %v6666_v42, %v6668_v5 }
 0x44f   :  { %8487 = vst [vmem:[#allocation31_spill] sm:$0xff] %v6673_v7 }
 0x454   :  { %v1813_v46 = vpop.f32.mrf.mxu2 }
 0x455   :  { %v1814_v47 = vadd.f32 %v1813_v46, %v1785_v52  ;;  %v6744_v46 = vpop.f32.mrf.mxu3 }
 0x457   :  { %v6693_v0 = vmax.f32 %v1814_v47, 0.0  ;;  %v1903_v47 = vpop.f32.mrf.mxu0 }
 0x459   :  { %8490 = vst [vmem:[#allocation28_spill] sm:$0xff] %v6693_v0  ;;  %v6701_v6 = vmul.f32 %v6684_v19, %v6693_v0  ;;  %v6705_v33 = vmul.f32 %v6651_v51, %v6693_v0  ;;  %v2501_v38 = vmul.f32 %v6682_v10, %v6693_v0  ;;  %v2331_v24 = vmul.f32 %v6678_v28, %v6693_v0 }
 0x45a   :  { %v2161_v36 = vmul.f32 %v6687_v29, %v6693_v0  ;;  %v6717_v61 = vmul.f32 %v6657_v44, %v6693_v0  ;;  %v2671_v18 = vmul.f32 %v6722_v48, %v6693_v0 }
 0x45b   :  { %8492 = vst [vmem:[#allocation25_spill] sm:$0xff] %v6701_v6  ;;  %v4638_v22 = vpack.i.bf16 %v2501_v38, %v6691_v12  ;;  %v4633_v43 = vpack.i.bf16 %v2331_v24, %v6689_v17  ;;  %v1765_v24 = vadd.f32 %v1764_v63, %v6608_v58 }
 0x45c   :  { %8493 = vst [vmem:[#allocation23_spill] sm:$0xff] %v6705_v33  ;;  %v1816_v37 = vpop.f32.mrf.mxu2  ;;  %v4628_v35 = vpack.i.bf16 %v2161_v36, %v6695_v45  ;;  %v4643_v38 = vpack.i.bf16 %v2671_v18, %v6732_v49 }
 0x45d   :  { %v1817_v27 = vadd.f32 %v1816_v37, %v1788_v56  ;;  %4639 = vrot.lane.b32.xlu2 %v4638_v22, %s5160_s27  ;;  %4634 = vrot.lane.b32.xlu0 %v4633_v43, %s5158_s25  ;;  %v6757_v37 = vpop.f32.mrf.mxu1 }
 0x45e   :  { %4629 = vrot.lane.b32.xlu1 %v4628_v35, %s5159_s26 }
 0x45f   :  { %v6728_v60 = vmax.f32 %v1817_v27, 0.0  ;;  %v1794_v27 = vadd.f32 %v1793_v23, %v1765_v24  ;;  %v1906_v41 = vpop.f32.mrf.mxu0 }
 0x461   :  { %8494 = vst [vmem:[#allocation16_spill] sm:$0xff] %v6728_v60  ;;  %v6738_v52 = vmul.f32 %v6684_v19, %v6728_v60  ;;  %v6742_v25 = vmul.f32 %v6651_v51, %v6728_v60 }
 0x463   :  { %8496 = vst [vmem:[#allocation42_spill] sm:$0xff] %v6738_v52 }
 0x464   :  { %8497 = vst [vmem:[#allocation44_spill] sm:$0xff] %v6742_v25  ;;  %v1819_v56 = vpop.f32.mrf.mxu2 }
 0x465   :  { %v1820_v40 = vadd.f32 %v1819_v56, %v1791_v26 }
 0x466   :  { %4644 = vrot.lane.b32.xlu1 %v4643_v38, %s5161_s28 }
 0x467   :  { %v6749_v36 = vmax.f32 %v1820_v40, 0.0  ;;  %v6772_v40 = vpop.f32.mrf.mxu3 }
 0x469   :  { %v2341_v22 = vmul.f32 %v6678_v28, %v6749_v36  ;;  %v2171_v43 = vmul.f32 %v6687_v29, %v6749_v36  ;;  %v2511_v57 = vmul.f32 %v6682_v10, %v6749_v36  ;;  %v6761_v35 = vmul.f32 %v6643_v15, %v6749_v36 }
 0x46a   :  { %v6765_v63 = vmul.f32 %v6684_v19, %v6749_v36  ;;  %v2681_v23 = vmul.f32 %v6722_v48, %v6749_v36 }
 0x46b   :  { %v4653_v8 = vpack.i.bf16 %v2341_v22, %v6689_v17  ;;  %v4648_v18 = vpack.i.bf16 %v2171_v43, %v6695_v45  ;;  %v4658_v26 = vpack.i.bf16 %v2511_v57, %v6691_v12  ;;  %v6806_v12 = vsel %vm407_vm6, %v6657_v44, %v6661_v39 }
 0x46c   :  { %8498 = vst [vmem:[#allocation30_spill] sm:$0xff] %v6765_v63  ;;  %v1822_v56 = vpop.f32.mrf.mxu2  ;;  %v4663_v57 = vpack.i.bf16 %v2681_v23, %v6732_v49  ;;  %v1849_v45 = vadd.f32 %v6663_v50, %v6610_v2  ;;  %v2336_v50 = vmul.f32 %v6678_v28, %v6728_v60 }
 0x46d   :  { %v1823_v38 = vadd.f32 %v1822_v56, %v1794_v27  ;;  %4654 = vrot.lane.b32.xlu2 %v4653_v8, %s5158_s25  ;;  %4649 = vrot.lane.b32.xlu0 %v4648_v18, %s5159_s26  ;;  %v6791_v8 = vpop.f32.mrf.mxu1  ;;  %v1843_v18 = vadd.f32 %v6647_v54, %v6596_v9  ;;  %v6811_v54 = vsel %vm580_vm5, %v6643_v15, %v6666_v42 }
 0x46e   :  { %4659 = vrot.lane.b32.xlu1 %v4658_v26, %s5160_s27 }
 0x46f   :  { %v6775_v7 = vmax.f32 %v1823_v38, 0.0  ;;  %v6797_v38 = vpop.f32.mrf.mxu3 }
 0x470   :  { %8501 = vst [vmem:[#allocation46_spill] sm:$0xff] %v6797_v38 }
 0x471   :  { %v2686_v24 = vmul.f32 %v6722_v48, %v6775_v7  ;;  %v6783_v22 = vmul.f32 %v6678_v28, %v6775_v7  ;;  %v6789_v27 = vmul.f32 %v6684_v19, %v6775_v7  ;;  %v6890_v28 = vmul.f32 %v6643_v15, %v6728_v60 }
 0x473   :  { %8499 = vst [vmem:[#allocation22_spill] sm:$0xff] %v6783_v22  ;;  %v4668_v43 = vpack.i.bf16 %v2686_v24, %v6732_v49  ;;  %v6799_v24 = vpop.f32.mrf.mxu0  ;;  %v2506_v49 = vmul.f32 %v6682_v10, %v6728_v60 }
 0x474   :  { %8500 = vst [vmem:[#allocation47_spill] sm:$0xff] %v6789_v27  ;;  %v1871_v26 = vpop.f32.mrf.mxu2 }
 0x475   :  { %4669 = vrot.lane.b32.xlu2 %v4668_v43, %s5161_s28  ;;  %4664 = vrot.lane.b32.xlu0 %v4663_v57, %s5161_s28  ;;  %v1872_v56 = vadd.f32 %v1871_v26, %v1843_v18  ;;  %v6813_v43 = vpop.permute.xlu1 %2884  ;;  %v1846_v57 = vadd.f32 %v6655_v59, %v6604_v4  ;;  %v6825_v18 = vsel %vm234_vm7, %v6684_v19, %v6659_v32 }
 0x476   :  { %8503 = vst [vmem:[#allocation20_spill] sm:$0xff] %v6813_v43  ;;  %v6835_v59 = vmul.f32 %v6643_v15, %v6693_v0 }
 0x477   :  { %v1901_v23 = vadd.f32 %v1900_v20, %v1872_v56  ;;  %v6820_v20 = vsel %vm753_vm4, %v6651_v51, %v6813_v43  ;;  %v6827_v56 = vpop.f32.mrf.mxu1  ;;  %v6859_v22 = vpop.f32.mrf.mxu3 }
 0x478   :  { %8504 = vst [vmem:[#allocation43_spill] sm:$0xff] %v6827_v56 }
 0x479   :  { %v6801_v17 = vmax.f32 %v1901_v23, 0.0  ;;  %8505 = vst [vmem:[#allocation41_spill] sm:$0xff] %v6835_v59 }
 0x47b   :  { %8502 = vst [vmem:[#allocation45_spill] sm:$0xff] %v6801_v17  ;;  %v6831_v23 = vmul.f32 %v6806_v12, %v6801_v17  ;;  %v6839_v43 = vmul.f32 %v6811_v54, %v6801_v17  ;;  %v6843_v19 = vmul.f32 %v6820_v20, %v6801_v17  ;;  %v6847_v32 = vmul.f32 %v6825_v18, %v6801_v17  ;;  %v2016_v56 = vpop.f32.mrf.mxu0 }
 0x47c   :  { %v1874_v26 = vpop.f32.mrf.mxu2 }
 0x47d   :  { %v1875_v42 = vadd.f32 %v1874_v26, %v1846_v57  ;;  %8506 = vst [vmem:[#allocation19_spill] sm:$0xff] %v6839_v43 }
 0x47e   :  { %8507 = vst [vmem:[#allocation40_spill] sm:$0xff] %v6843_v19 }
 0x47f   :  { %8508 = vst [vmem:[#allocation38_spill] sm:$0xff] %v6847_v32  ;;  %v1904_v57 = vadd.f32 %v1903_v47, %v1875_v42  ;;  %v6866_v47 = vsel %vm318_vm1, %v6625_v62, %v6631_v30  ;;  %v6871_v42 = vsel %vm491_vm2, %v6645_v3, %v6629_v13  ;;  %v2166_v62 = vmul.f32 %v6687_v29, %v6728_v60  ;;  %v2045_v26 = vpop.f32.mrf.mxu1 }
 0x481   :  { %v6861_v38 = vmax.f32 %v1904_v57, 0.0 }
 0x483   :  { %8509 = vst [vmem:[#allocation18_spill] sm:$0xff] %v6861_v38  ;;  %v2507_v57 = vmul.f32 %v6871_v42, %v6861_v38  ;;  %v2337_v39 = vmul.f32 %v6866_v47, %v6861_v38  ;;  %v2167_v0 = vmul.f32 %v6621_v16, %v6861_v38  ;;  %v6894_v43 = vmul.f32 %v6811_v54, %v6861_v38 }
 0x484   :  { %v1877_v3 = vpop.f32.mrf.mxu2 }
 0x485   :  { %v1878_v6 = vadd.f32 %v1877_v3, %v1849_v45  ;;  %v4683_v32 = vpack.i.bf16 %v2507_v57, %v2506_v49  ;;  %v4678_v33 = vpack.i.bf16 %v2337_v39, %v2336_v50  ;;  %v4673_v19 = vpack.i.bf16 %v2167_v0, %v2166_v62  ;;  %v2074_v0 = vpop.f32.mrf.mxu3  ;;  %v6926_v62 = vpop.permute.xlu1 %3226 }
 0x486   :  { %v6898_v45 = vmul.f32 %v6825_v18, %v6861_v38  ;;  %v2017_v39 = vadd.f32 %v2016_v56, %v6596_v9  ;;  %v1852_v56 = vadd.f32 %v6697_v53, %v6608_v58  ;;  %v3243_v57 = vmul.f32 %v6657_v44, %v6728_v60  ;;  %8513 = vst [vmem:[#allocation37_spill] sm:$0xff] %v6926_v62 }
 0x487   :  { %v1907_v59 = vadd.f32 %v1906_v41, %v1878_v6  ;;  %4684 = vrot.lane.b32.xlu2 %v4683_v32, %s5160_s27  ;;  %4679 = vrot.lane.b32.xlu0 %v4678_v33, %s5158_s25  ;;  %v6902_v41 = vmul.f32 %v6820_v20, %v6861_v38  ;;  %v6907_v32 = vsel %vm664_vm3, %v6649_v14, %v6653_v31 }
 0x488   :  { %4674 = vrot.lane.b32.xlu1 %v4673_v19, %s5159_s26  ;;  %8510 = vst [vmem:[#allocation39_spill] sm:$0xff] %v6898_v45  ;;  %v3244_v33 = vmul.f32 %v6806_v12, %v6861_v38  ;;  %v2677_v49 = vmul.f32 %v6907_v32, %v6861_v38  ;;  %v2676_v38 = vmul.f32 %v6722_v48, %v6728_v60  ;;  %v2048_v60 = vpop.f32.mrf.mxu1 }
 0x489   :  { %8511 = vst [vmem:[#allocation34_spill] sm:$0xff] %v6902_v41  ;;  %v6910_v6 = vmax.f32 %v1907_v59, 0.0  ;;  %v2019_v59 = vpop.f32.mrf.mxu0  ;;  %v6932_v19 = vmul.f32 %v6651_v51, %v6749_v36  ;;  %v2046_v25 = vadd.f32 %v2045_v26, %v2017_v39  ;;  %v1930_v48 = vadd.f32 %v6730_v34, %v6596_v9 }
 0x48a   :  { %v4693_v52 = vpack.i.bf16 %v3244_v33, %v3243_v57  ;;  %v4688_v41 = vpack.i.bf16 %v2677_v49, %v2676_v38  ;;  %v2020_v9 = vadd.f32 %v2019_v59, %v6604_v4  ;;  %v8518_v38 = vld [vmem:[#allocation31_spill] sm:$0xff] }
 0x48b   :  { %8512 = vst [vmem:[#allocation15_spill] sm:$0xff] %v6910_v6  ;;  %v6936_v14 = vmul.f32 %v6820_v20, %v6910_v6  ;;  %v6940_v53 = vmul.f32 %v6811_v54, %v6910_v6  ;;  %v6944_v45 = vmul.f32 %v6825_v18, %v6910_v6  ;;  %v2075_v39 = vadd.f32 %v2074_v0, %v2046_v25 }
 0x48c   :  { %v1880_v3 = vpop.f32.mrf.mxu2  ;;  %v1959_v34 = vadd.f32 %v6744_v46, %v1930_v48 }
 0x48d   :  { %v1881_v50 = vadd.f32 %v1880_v3, %v1852_v56  ;;  %8514 = vst [vmem:[#allocation36_spill] sm:$0xff] %v6944_v45  ;;  %v6983_v3 = vpop.permute.xlu1 %3058  ;;  %v6985_v48 = vmax.f32 %v2075_v39, 0.0 }
 0x48e   :  { %8517 = vst [vmem:[#allocation49_spill] sm:$0xff] %v6983_v3  ;;  %v7001_v39 = vsel %vm580_vm5, %v6668_v5, %v6983_v3 }
 0x48f   :  { %v1910_v33 = vadd.f32 %v6799_v24, %v1881_v50  ;;  %4694 = vrot.lane.b32.xlu2 %v4693_v52, %s5155_s18  ;;  %v2077_v24 = vpop.f32.mrf.mxu3  ;;  %v6963_v52 = vmul.f32 %v6687_v29, %v6775_v7  ;;  %v6971_v50 = vmul.f32 %v6651_v51, %v6775_v7  ;;  %v7034_v51 = vmul.f32 %v7001_v39, %v6985_v48 }
 0x490   :  { %4689 = vrot.lane.b32.xlu1 %v4688_v41, %s5161_s28  ;;  %v2051_v5 = vpop.f32.mrf.mxu1 }
 0x491   :  { %v6957_v26 = vmax.f32 %v1910_v33, 0.0  ;;  %v2022_v0 = vpop.f32.mrf.mxu0  ;;  %v2049_v33 = vadd.f32 %v2048_v60, %v2020_v9  ;;  %v7008_v9 = vsel %vm318_vm1, %v6631_v30, %v6639_v21  ;;  %v2332_v30 = vmul.f32 %v6866_v47, %v6801_v17 }
 0x493   :  { %8515 = vst [vmem:[#allocation14_spill] sm:$0xff] %v6957_v26  ;;  %v6967_v49 = vmul.f32 %v6621_v16, %v6957_v26  ;;  %v6975_v25 = vmul.f32 %v6820_v20, %v6957_v26  ;;  %v6979_v46 = vmul.f32 %v6825_v18, %v6957_v26  ;;  %v6994_v18 = vsel %vm145_vm0, %v6615_v55, %v6617_v11 }
 0x494   :  { %v1987_v41 = vpop.f32.mrf.mxu2  ;;  %v7013_v55 = vsel %vm491_vm2, %v6629_v13, %v6641_v1 }
 0x495   :  { %8516 = vst [vmem:[#allocation35_spill] sm:$0xff] %v6979_v46  ;;  %v1988_v29 = vadd.f32 %v1987_v41, %v1959_v34  ;;  %v4723_v59 = vpack.i.bf16 %v6967_v49, %v6963_v52  ;;  %v1933_v34 = vadd.f32 %v6757_v37, %v6604_v4  ;;  %v2162_v4 = vmul.f32 %v6621_v16, %v6801_v17 }
 0x496   :  { %v2502_v37 = vmul.f32 %v6871_v42, %v6801_v17  ;;  %v2078_v41 = vadd.f32 %v2077_v24, %v2049_v33 }
 0x497   :  { %v7003_v60 = vmax.f32 %v1988_v29, 0.0  ;;  %v2023_v29 = vadd.f32 %v2022_v0, %v6610_v2  ;;  %v1962_v57 = vadd.f32 %v6772_v40, %v1933_v34  ;;  %v2080_v24 = vpop.f32.mrf.mxu3  ;;  %v8519_v0 = vld [vmem:[#allocation33_spill] sm:$0xff]  ;;  %v1936_v34 = vadd.f32 %v6791_v8, %v6610_v2 }
 0x498   :  { %v7044_v27 = vsel %vm664_vm3, %v6653_v31, %v8519_v0  ;;  %v7046_v46 = vmax.f32 %v2078_v41, 0.0  ;;  %v2672_v31 = vmul.f32 %v6907_v32, %v6801_v17 }
 0x499   :  { %v2163_v52 = vmul.f32 %v6994_v18, %v7003_v60  ;;  %v2503_v49 = vmul.f32 %v7013_v55, %v7003_v60  ;;  %v2333_v13 = vmul.f32 %v7008_v9, %v7003_v60  ;;  %v7030_v20 = vmul.f32 %v8518_v38, %v7003_v60 }
 0x49a   :  { %v2052_v40 = vadd.f32 %v2051_v5, %v2023_v29  ;;  %v7068_v8 = vmul.f32 %v7001_v39, %v7046_v46  ;;  %v8520_v5 = vld [vmem:[#allocation46_spill] sm:$0xff] }
 0x49b   :  { %v4698_v56 = vpack.i.bf16 %v2163_v52, %v2162_v4  ;;  %v4708_v3 = vpack.i.bf16 %v2503_v49, %v2502_v37  ;;  %v4703_v63 = vpack.i.bf16 %v2333_v13, %v2332_v30  ;;  %v4938_v62 = vpack.i.bf16 %v7034_v51, %v7030_v20  ;;  %v2025_v4 = vpop.f32.mrf.mxu0  ;;  %v2054_v49 = vpop.f32.mrf.mxu1 }
 0x49c   :  { %v1990_v45 = vpop.f32.mrf.mxu2  ;;  %v1965_v52 = vadd.f32 %v8520_v5, %v1936_v34 }
 0x49d   :  { %v1991_v33 = vadd.f32 %v1990_v45, %v1962_v57  ;;  %4699 = vrot.lane.b32.xlu2 %v4698_v56, %s5159_s26  ;;  %4709 = vrot.lane.b32.xlu0 %v4708_v3, %s5160_s27  ;;  %v2673_v45 = vmul.f32 %v7044_v27, %v7003_v60  ;;  %v2517_v56 = vmul.f32 %v6871_v42, %v6957_v26 }
 0x49e   :  { %4704 = vrot.lane.b32.xlu1 %v4703_v63, %s5158_s25  ;;  %v2516_v57 = vmul.f32 %v6682_v10, %v6775_v7  ;;  %v2081_v3 = vadd.f32 %v2080_v24, %v2052_v40  ;;  %v2026_v63 = vadd.f32 %v2025_v4, %v6608_v58  ;;  %v8521_v40 = vld [vmem:[#allocation43_spill] sm:$0xff] }
 0x49f   :  { %v7051_v37 = vmax.f32 %v1991_v33, 0.0  ;;  %v4713_v30 = vpack.i.bf16 %v2673_v45, %v2672_v31  ;;  %v1939_v34 = vadd.f32 %v8521_v40, %v6608_v58  ;;  %v2083_v4 = vpop.f32.mrf.mxu3  ;;  %v3248_v31 = vmul.f32 %v6657_v44, %v6749_v36 }
 0x4a0   :  { %v4733_v41 = vpack.i.bf16 %v2517_v56, %v2516_v57  ;;  %v7075_v24 = vmax.f32 %v2081_v3, 0.0  ;;  %v2055_v33 = vadd.f32 %v2054_v49, %v2026_v63  ;;  %v3249_v56 = vmul.f32 %v6806_v12, %v6910_v6 }
 0x4a1   :  { %v7064_v2 = vmul.f32 %v8518_v38, %v7051_v37  ;;  %v2342_v57 = vmul.f32 %v6866_v47, %v6910_v6  ;;  %v2172_v58 = vmul.f32 %v6621_v16, %v6910_v6 }
 0x4a2   :  { %v2084_v5 = vadd.f32 %v2083_v4, %v2055_v33 }
 0x4a4   :  { %v1993_v13 = vpop.f32.mrf.mxu2 }
 0x4a5   :  { %v1994_v29 = vadd.f32 %v1993_v13, %v1965_v52  ;;  %4714 = vrot.lane.b32.xlu2 %v4713_v30, %s5161_s28  ;;  %4724 = vrot.lane.b32.xlu0 %v4723_v59, %s5159_s26  ;;  %v3254_v59 = vmul.f32 %v6806_v12, %v6957_v26  ;;  %v3253_v52 = vmul.f32 %v6657_v44, %v6775_v7  ;;  %v7111_v44 = vmax.f32 %v2084_v5, 0.0 }
 0x4a6   :  { %4734 = vrot.lane.b32.xlu1 %v4733_v41, %s5160_s27  ;;  %v7104_v12 = vmul.f32 %v7001_v39, %v7075_v24  ;;  %v1968_v30 = vadd.f32 %v6859_v22, %v1939_v34  ;;  %v4718_v13 = vpack.i.bf16 %v3249_v56, %v3248_v31  ;;  %v2347_v22 = vmul.f32 %v6866_v47, %v6957_v26  ;;  %v7134_v47 = vpop.permute.xlu2 %3228 }
 0x4a7   :  { %v7080_v45 = vmax.f32 %v1994_v29, 0.0  ;;  %v4738_v40 = vpack.i.bf16 %v3254_v59, %v3253_v52  ;;  %v2164_v34 = vmul.f32 %v6617_v11, %v6985_v48  ;;  %v7126_v31 = vmul.f32 %v7001_v39, %v7111_v44  ;;  %v8522_v59 = vld [vmem:[#allocation22_spill] sm:$0xff] }
 0x4a8   :  { %v2674_v39 = vmul.f32 %v8519_v0, %v6985_v48  ;;  %v2504_v5 = vmul.f32 %v6641_v1, %v6985_v48  ;;  %v2512_v52 = vmul.f32 %v6871_v42, %v6910_v6  ;;  %v2338_v42 = vmul.f32 %v7008_v9, %v7051_v37 }
 0x4a9   :  { %v2343_v3 = vmul.f32 %v7008_v9, %v7080_v45  ;;  %v2173_v63 = vmul.f32 %v6994_v18, %v7080_v45  ;;  %v7100_v49 = vmul.f32 %v8518_v38, %v7080_v45 }
 0x4ab   :  { %v4748_v41 = vpack.i.bf16 %v2343_v3, %v2342_v57  ;;  %v4743_v16 = vpack.i.bf16 %v2173_v63, %v2172_v58  ;;  %v4928_v33 = vpack.i.bf16 %v7104_v12, %v7100_v49  ;;  %v4728_v57 = vpack.i.bf16 %v2347_v22, %v8522_v59  ;;  %v8523_v3 = vld [vmem:[#allocation29_spill] sm:$0xff] }
 0x4ac   :  { %v1996_v29 = vpop.f32.mrf.mxu2  ;;  %v4763_v58 = vpack.i.bf16 %v8523_v3, %v2164_v34  ;;  %v2682_v34 = vmul.f32 %v6907_v32, %v6910_v6  ;;  %v2687_v59 = vmul.f32 %v6907_v32, %v6957_v26  ;;  %v2508_v32 = vmul.f32 %v7013_v55, %v7051_v37 }
 0x4ad   :  { %v1997_v4 = vadd.f32 %v1996_v29, %v1968_v30  ;;  %4719 = vrot.lane.b32.xlu2 %v4718_v13, %s5155_s18  ;;  %4749 = vrot.lane.b32.xlu0 %v4748_v41, %s5158_s25  ;;  %v8524_v13 = vld [vmem:[#allocation21_spill] sm:$0xff]  ;;  %v8525_v29 = vld [vmem:[#allocation32_spill] sm:$0xff] }
 0x4ae   :  { %4739 = vrot.lane.b32.xlu1 %v4738_v40, %s5155_s18  ;;  %v4778_v41 = vpack.i.bf16 %v8524_v13, %v2674_v39  ;;  %v4773_v40 = vpack.i.bf16 %v8525_v29, %v2504_v5  ;;  %v2509_v13 = vmul.f32 %v6641_v1, %v7046_v46 }
 0x4af   :  { %v7114_v10 = vmax.f32 %v1997_v4, 0.0  ;;  %v2683_v4 = vmul.f32 %v7044_v27, %v7080_v45 }
 0x4b1   :  { %v7122_v56 = vmul.f32 %v8518_v38, %v7114_v10  ;;  %v2513_v38 = vmul.f32 %v7013_v55, %v7080_v45  ;;  %v2688_v22 = vmul.f32 %v7044_v27, %v7114_v10 }
 0x4b3   :  { %v4923_v63 = vpack.i.bf16 %v7126_v31, %v7122_v56  ;;  %v4753_v30 = vpack.i.bf16 %v2513_v38, %v2512_v52  ;;  %v4783_v38 = vpack.i.bf16 %v2688_v22, %v2687_v59  ;;  %v2334_v52 = vmul.f32 %v6639_v21, %v6985_v48 }
 0x4b5   :  { %4729 = vrot.lane.b32.xlu2 %v4728_v57, %s5158_s25  ;;  %4764 = vrot.lane.b32.xlu0 %v4763_v58, %s5159_s26  ;;  %v2339_v57 = vmul.f32 %v6639_v21, %v7046_v46  ;;  %v4758_v58 = vpack.i.bf16 %v2683_v4, %v2682_v34  ;;  %v4798_v4 = vpack.i.bf16 %v2509_v13, %v2508_v32 }
 0x4b6   :  { %4744 = vrot.lane.b32.xlu1 %v4743_v16, %s5159_s26  ;;  %v2169_v32 = vmul.f32 %v6617_v11, %v7046_v46 }
 0x4b7   :  { %v7149_v16 = vpop.permute.xlu2 %4639  ;;  %v4793_v39 = vpack.i.bf16 %v2339_v57, %v2338_v42  ;;  %v7181_v42 = vpop.permute.xlu0 %2886 }
 0x4bd   :  { %4754 = vrot.lane.b32.xlu2 %v4753_v30, %s5160_s27  ;;  %4779 = vrot.lane.b32.xlu0 %v4778_v41, %s5161_s28  ;;  %v2344_v30 = vmul.f32 %v6639_v21, %v7075_v24  ;;  %v8526_v41 = vld [vmem:[#allocation24_spill] sm:$0xff] }
 0x4be   :  { %4774 = vrot.lane.b32.xlu1 %v4773_v40, %s5160_s27  ;;  %v4768_v40 = vpack.i.bf16 %v8526_v41, %v2334_v52 }
 0x4bf   :  { %v4813_v22 = vpack.i.bf16 %v8526_v41, %v2344_v30  ;;  %v2179_v30 = vmul.f32 %v6617_v11, %v7111_v44 }
 0x4c5   :  { %4759 = vrot.lane.b32.xlu2 %v4758_v58, %s5161_s28  ;;  %4784 = vrot.lane.b32.xlu0 %v4783_v38, %s5161_s28  ;;  %v2168_v58 = vmul.f32 %v6994_v18, %v7051_v37  ;;  %v2514_v38 = vmul.f32 %v6641_v1, %v7075_v24 }
 0x4c6   :  { %4794 = vrot.lane.b32.xlu1 %v4793_v39, %s5158_s25  ;;  %v2178_v39 = vmul.f32 %v6994_v18, %v7114_v10 }
 0x4c7   :  { %v7167_v5 = vpop.permute.xlu2 %4654  ;;  %v4788_v13 = vpack.i.bf16 %v2169_v32, %v2168_v58  ;;  %v4818_v41 = vpack.i.bf16 %v8525_v29, %v2514_v38  ;;  %v2679_v29 = vmul.f32 %v8519_v0, %v7046_v46  ;;  %v2349_v58 = vmul.f32 %v6639_v21, %v7111_v44  ;;  %v7217_v38 = vpop.permute.xlu1 %2888 }
 0x4cd   :  { %4769 = vrot.lane.b32.xlu2 %v4768_v40, %s5158_s25  ;;  %4799 = vrot.lane.b32.xlu0 %v4798_v4, %s5160_s27  ;;  %v4823_v40 = vpack.i.bf16 %v2179_v30, %v2178_v39  ;;  %v2678_v4 = vmul.f32 %v7044_v27, %v7051_v37  ;;  %v3083_v39 = vmul.f32 %v6643_v15, %v6775_v7 }
 0x4ce   :  { %4814 = vrot.lane.b32.xlu1 %v4813_v22, %s5158_s25  ;;  %v2348_v22 = vmul.f32 %v7008_v9, %v7114_v10  ;;  %v2174_v9 = vmul.f32 %v6617_v11, %v7075_v24  ;;  %v8528_v15 = vpack.i.bf16 %v6831_v23, %v6717_v61  ;;  %v2519_v61 = vmul.f32 %v6641_v1, %v7111_v44 }
 0x4cf   :  { %v7184_v34 = vpop.permute.xlu2 %4669  ;;  %v7204_v18 = vpop.permute.xlu0 %4634  ;;  %v8534_v1 = vpack.i.bf16 %v6940_v53, %v6761_v35  ;;  %v5044_v53 = vld [vmem:[%s8204_s5 + $0x20] ss:$8 sm:$0xf] }
 0x4d0   :  { %v8312_v59 = vunpack.i.h.bf16 %v7184_v34  ;;  %v4671_v57 = vunpack.i.l.bf16 %v7184_v34  ;;  %v4828_v32 = vpack.i.bf16 %v2349_v58, %v2348_v22  ;;  %v7228_v21 = vpop.permute.xlu1 %4629  ;;  %v4808_v30 = vpack.i.bf16 %v8523_v3, %v2174_v9 }
 0x4d1   :  { %v3391_v49 = vperm.slane %v5044_v53, 3 }
 0x4d2   :  { %v2762_v52 = vsel %vm753_vm4, %v4671_v57, %v8312_v59  ;;  %v3084_v57 = vmul.f32 %v6811_v54, %v6957_v26  ;;  %v8552_v59 = vld [vmem:[#allocation30_spill] sm:$0xff] }
 0x4d3   :  { %3728 = vmatpush.msrb.mxu2 %v2762_v52  ;;  %v4803_v52 = vpack.i.bf16 %v2679_v29, %v2678_v4 }
 0x4d4   :  { %v4838_v27 = vpack.i.bf16 %v3084_v57, %v3083_v39  ;;  %v2518_v57 = vmul.f32 %v7013_v55, %v7114_v10  ;;  %v8532_v39 = vpack.i.bf16 %v6894_v43, %v6890_v28  ;;  %v8533_v55 = vpack.i.bf16 %v6936_v14, %v6932_v19  ;;  %v8536_v43 = vld [vmem:[#allocation35_spill] sm:$0xff] }
 0x4d5   :  { %4789 = vrot.lane.b32.xlu2 %v4788_v13, %s5159_s26  ;;  %4819 = vrot.lane.b32.xlu0 %v4818_v41, %s5160_s27  ;;  %v8529_v41 = vld [vmem:[#allocation19_spill] sm:$0xff]  ;;  %v8309_v14 = vunpack.i.h.bf16 %v7228_v21 }
 0x4d6   :  { %4824 = vrot.lane.b32.xlu1 %v4823_v40, %s5159_s26  ;;  %v8530_v40 = vld [vmem:[#allocation41_spill] sm:$0xff]  ;;  %v4843_v23 = vpack.i.bf16 %v2519_v61, %v2518_v57  ;;  %v8537_v28 = vld [vmem:[#allocation47_spill] sm:$0xff] }
 0x4d7   :  { %v8531_v4 = vpack.i.bf16 %v8529_v41, %v8530_v40  ;;  %v8538_v9 = vpack.i.bf16 %v8536_v43, %v8537_v28  ;;  %v8540_v41 = vld [vmem:[#allocation40_spill] sm:$0xff]  ;;  %v8541_v40 = vld [vmem:[#allocation23_spill] sm:$0xff] }
 0x4d8   :  { %v7253_v58 = vpop.permute.xlu1 %4644  ;;  %v8544_v57 = vld [vmem:[#allocation27_spill] sm:$0xff] }
 0x4dd   :  { %4804 = vrot.lane.b32.xlu2 %v4803_v52, %s5161_s28  ;;  %4829 = vrot.lane.b32.xlu0 %v4828_v32, %s5158_s25  ;;  %v8535_v32 = vpack.i.bf16 %v6975_v25, %v6971_v50  ;;  %v3390_v50 = vperm.slane %v5044_v53, 2  ;;  %v8559_v53 = vld [vmem:[#allocation20_spill] sm:$0xff] }
 0x4de   :  { %4839 = vrot.lane.b32.xlu1 %v4838_v27, %s5156_s21 }
 0x4df   :  { %v7224_v54 = vpop.permute.xlu0 %4649 }
 0x4e0   :  { %v7274_v27 = vpop.permute.xlu1 %4659 }
 0x4e1   :  { %v7231_v13 = vpop.permute.xlu2 %4684 }
 0x4e2   :  { %8527 = vst [vmem:[#allocation17_spill] sm:$0xff] %v7231_v13 }
 0x4e5   :  { %4809 = vrot.lane.b32.xlu2 %v4808_v30, %s5159_s26  ;;  %4834 = vrot.lane.b32.xlu0 %v8528_v15, %s5155_s18 }
 0x4e6   :  { %4859 = vrot.lane.b32.xlu1 %v8531_v4, %s5156_s21  ;;  %v8542_v4 = vpack.i.bf16 %v8540_v41, %v8541_v40 }
 0x4e7   :  { %v7242_v22 = vpop.permute.xlu0 %4664 }
 0x4e8   :  { %v8310_v11 = vunpack.i.h.bf16 %v7242_v22  ;;  %v4666_v3 = vunpack.i.l.bf16 %v7242_v22 }
 0x4e9   :  { %v7264_v52 = vpop.permute.xlu2 %4694 }
 0x4ea   :  { %v2758_v29 = vsel %vm753_vm4, %v4666_v3, %v8310_v11  ;;  %v8543_v3 = vld [vmem:[#allocation37_spill] sm:$0xff] }
 0x4eb   :  { %3729 = vmatpush.msrb.mxu2 %v2758_v29  ;;  %v3231_v29 = vsel %vm407_vm6, %v8544_v57, %v8543_v3  ;;  %v3232_v43 = vsel %vm407_vm6, %v8543_v3, %v7134_v47  ;;  %v8548_v3 = vld [vmem:[#allocation34_spill] sm:$0xff] }
 0x4ec   :  { %v3246_v41 = vmul.f32 %v3232_v43, %v7046_v46  ;;  %v3241_v31 = vmul.f32 %v3232_v43, %v6985_v48 }
 0x4ed   :  { %4844 = vrot.lane.b32.xlu2 %v4843_v23, %s5160_s27  ;;  %4854 = vrot.lane.b32.xlu0 %v8532_v39, %s5156_s21  ;;  %v8545_v23 = vld [vmem:[#allocation39_spill] sm:$0xff]  ;;  %v8546_v39 = vld [vmem:[#allocation42_spill] sm:$0xff] }
 0x4ee   :  { %4869 = vrot.lane.b32.xlu1 %v8533_v55, %s5157_s24  ;;  %v8547_v55 = vpack.i.bf16 %v8545_v23, %v8546_v39  ;;  %v8549_v23 = vld [vmem:[#allocation44_spill] sm:$0xff] }
 0x4ef   :  { %v8550_v39 = vpack.i.bf16 %v8548_v3, %v8549_v23  ;;  %v3250_v3 = vmul.f32 %v3231_v29, %v7080_v45 }
 0x4f5   :  { %4849 = vrot.lane.b32.xlu2 %v8534_v1, %s5156_s21  ;;  %4864 = vrot.lane.b32.xlu0 %v8535_v32, %s5157_s24  ;;  %v3255_v32 = vmul.f32 %v3231_v29, %v7114_v10 }
 0x4f6   :  { %4884 = vrot.lane.b32.xlu1 %v8538_v9, %s5154_s3 }
 0x4f7   :  { %v7280_v19 = vpop.permute.xlu2 %4699 }
 0x4f8   :  { %v8317_v30 = vunpack.i.h.bf16 %v7280_v19  ;;  %v4701_v35 = vunpack.i.l.bf16 %v7280_v19 }
 0x4fa   :  { %v7291_v25 = vsel %vm234_vm7, %v8309_v14, %v4701_v35  ;;  %v7296_v15 = vsel %vm234_vm7, %v4701_v35, %v8317_v30  ;;  %v7306_v61 = vpop.permute.xlu1 %4674  ;;  %v3245_v35 = vmul.f32 %v3231_v29, %v7051_v37 }
 0x4fb   :  { %8539 = vst [vmem:[#allocation48_spill] sm:$0xff] %v7296_v15  ;;  %v8561_v15 = vpack.i.bf16 %v7068_v8, %v7064_v2 }
 0x4fc   :  { %v4913_v57 = vpack.i.bf16 %v3246_v41, %v3245_v35  ;;  %v8554_v35 = vld [vmem:[#allocation38_spill] sm:$0xff] }
 0x4fd   :  { %3396 = vrot.lane.b32.xlu2 %v3390_v50, %s5159_s26  ;;  %4879 = vrot.lane.b32.xlu0 %v8542_v4, %s5157_s24  ;;  %v3256_v50 = vmul.f32 %v3232_v43, %v7111_v44 }
 0x4fe   :  { %4899 = vrot.lane.b32.xlu1 %v8547_v55, %s5154_s3  ;;  %v7336_v55 = vpop.permute.xlu0 %4679 }
 0x4ff   :  { %v7312_v1 = vpop.permute.xlu2 %4714  ;;  %v4893_v4 = vpack.i.bf16 %v3256_v50, %v3255_v32  ;;  %v8555_v50 = vld [vmem:[#allocation25_spill] sm:$0xff] }
 0x500   :  { %v8316_v28 = vunpack.i.h.bf16 %v7312_v1  ;;  %v8311_v9 = vunpack.i.l.bf16 %v7312_v1  ;;  %v8556_v41 = vpack.i.bf16 %v8554_v35, %v8555_v50  ;;  %v3251_v35 = vmul.f32 %v3232_v43, %v7075_v24 }
 0x502   :  { %v7328_v40 = vsel %vm753_vm4, %v8311_v9, %v8316_v28  ;;  %v7340_v11 = vpop.permute.xlu1 %4689  ;;  %v8551_v9 = vld [vmem:[#allocation36_spill] sm:$0xff] }
 0x503   :  { %v8553_v32 = vpack.i.bf16 %v8551_v9, %v8552_v59 }
 0x505   :  { %4874 = vrot.lane.b32.xlu2 %v8550_v39, %s5157_s24  ;;  %4894 = vrot.lane.b32.xlu0 %v4893_v4, %s5155_s18 }
 0x506   :  { %4914 = vrot.lane.b32.xlu1 %v4913_v57, %s5155_s18 }
 0x507   :  { %v7338_v14 = vpop.permute.xlu2 %4719 }
 0x50d   :  { %4889 = vrot.lane.b32.xlu2 %v8553_v32, %s5154_s3  ;;  %4909 = vrot.lane.b32.xlu0 %v8556_v41, %s5154_s3  ;;  %v2891_v41 = vsel %vm753_vm4, %v8559_v53, %v7181_v42 }
 0x50e   :  { %4929 = vrot.lane.b32.xlu1 %v4928_v33, %s5156_s21  ;;  %v4903_v33 = vpack.i.bf16 %v3251_v35, %v3250_v3  ;;  %v3240_v35 = vmul.f32 %v3231_v29, %v7003_v60  ;;  %v2905_v56 = vmul.f32 %v2891_v41, %v7051_v37  ;;  %v2910_v30 = vmul.f32 %v2891_v41, %v7080_v45 }
 0x50f   :  { %v7354_v4 = vpop.permute.xlu2 %4729  ;;  %v7356_v57 = vpop.permute.xlu0 %4709 }
 0x510   :  { %v8315_v23 = vunpack.i.h.bf16 %v7356_v57  ;;  %v8313_v59 = vunpack.i.l.bf16 %v7356_v57  ;;  %v7361_v9 = vpop.permute.xlu1 %4704  ;;  %v4918_v53 = vpack.i.bf16 %v3241_v31, %v3240_v35 }
 0x511   :  { %v4707_v39 = vunpack.i.h.bf16 %v7361_v9  ;;  %v8314_v32 = vunpack.i.l.bf16 %v7361_v9 }
 0x512   :  { %v7371_v12 = vsel %vm580_vm5, %v8313_v59, %v8315_v23 }
 0x513   :  { %8557 = vst [vmem:[#allocation31_spill] sm:$0xff] %v7371_v12  ;;  %v7376_v50 = vsel %vm407_vm6, %v8314_v32, %v4707_v39 }
 0x514   :  { %8558 = vst [vmem:[#allocation33_spill] sm:$0xff] %v7376_v50 }
 0x515   :  { %4904 = vrot.lane.b32.xlu2 %v4903_v33, %s5155_s18  ;;  %4924 = vrot.lane.b32.xlu0 %v4923_v63, %s5156_s21  ;;  %v2892_v63 = vsel %vm753_vm4, %v7181_v42, %v7217_v38 }
 0x516   :  { %3398 = vrot.lane.b32.xlu1 %v3391_v49, %s5159_s26  ;;  %v2906_v49 = vmul.f32 %v2892_v63, %v7046_v46  ;;  %v2911_v31 = vmul.f32 %v2892_v63, %v7075_v24 }
 0x517   :  { %v7387_v59 = vpop.permute.xlu2 %4754  ;;  %v7389_v3 = vpop.permute.xlu0 %4724 }
 0x518   :  { %v8318_v32 = vunpack.i.h.bf16 %v7387_v59  ;;  %v8319_v33 = vunpack.i.l.bf16 %v7387_v59  ;;  %v7394_v23 = vpop.permute.xlu1 %4734  ;;  %v4953_v28 = vpack.i.bf16 %v2906_v49, %v2905_v56  ;;  %v4948_v17 = vpack.i.bf16 %v2911_v31, %v2910_v30 }
 0x519   :  { %v2915_v31 = vmul.f32 %v2891_v41, %v7114_v10 }
 0x51a   :  { %v7407_v29 = vsel %vm580_vm5, %v8319_v33, %v8318_v32  ;;  %v4696_v33 = vunpack.i.l.bf16 %v7264_v52 }
 0x51d   :  { %4919 = vrot.lane.b32.xlu2 %v4918_v53, %s5155_s18  ;;  %4939 = vrot.lane.b32.xlu0 %v4938_v62, %s5156_s21  ;;  %v4721_v62 = vunpack.i.l.bf16 %v7338_v14 }
 0x51e   :  { %4954 = vrot.lane.b32.xlu1 %v4953_v28, %s5157_s24 }
 0x51f   :  { %v7415_v42 = vpop.permute.xlu2 %4759  ;;  %v7417_v43 = vpop.permute.xlu0 %4749 }
 0x520   :  { %v8322_v32 = vunpack.i.h.bf16 %v7417_v43  ;;  %v8321_v35 = vunpack.i.l.bf16 %v7417_v43  ;;  %v7422_v56 = vpop.permute.xlu1 %4739 }
 0x521   :  { %v8324_v51 = vunpack.i.h.bf16 %v7422_v56  ;;  %v4741_v20 = vunpack.i.l.bf16 %v7422_v56 }
 0x522   :  { %v7434_v28 = vsel %vm407_vm6, %v8321_v35, %v8322_v32  ;;  %v8562_v35 = vunpack.i.h.bf16 %v7338_v14 }
 0x523   :  { %8560 = vst [vmem:[#allocation46_spill] sm:$0xff] %v7434_v28  ;;  %v3330_v49 = vsel %vm318_vm1, %v4741_v20, %v8324_v51  ;;  %v8563_v20 = vunpack.i.h.bf16 %v7264_v52  ;;  %v2900_v51 = vmul.f32 %v2891_v41, %v7003_v60 }
 0x524   :  { %3757 = vmatpush.msrb.mxu0 %v3330_v49  ;;  %v3326_v32 = vsel %vm318_vm1, %v4721_v62, %v8562_v35  ;;  %v2916_v35 = vmul.f32 %v2892_v63, %v7111_v44 }
 0x525   :  { %4934 = vrot.lane.b32.xlu2 %v8561_v15, %s5156_s21  ;;  %4949 = vrot.lane.b32.xlu0 %v4948_v17, %s5157_s24  ;;  %v3322_v30 = vsel %vm318_vm1, %v4696_v33, %v8563_v20  ;;  %v8565_v33 = vunpack.i.h.bf16 %v7280_v19  ;;  %v8328_v19 = vunpack.i.h.bf16 %v7306_v61 }
 0x526   :  { %3758 = vmatpush.msrb.mxu0 %v3326_v32  ;;  %v4943_v20 = vpack.i.bf16 %v2916_v35, %v2915_v31 }
 0x527   :  { %v7449_v53 = vpop.permute.xlu2 %4769  ;;  %v7451_v6 = vpop.permute.xlu0 %4764 }
 0x528   :  { %v4771_v2 = vunpack.i.l.bf16 %v7449_v53  ;;  %v4766_v8 = vunpack.i.l.bf16 %v7451_v6  ;;  %v7459_v17 = vpop.permute.xlu1 %4744  ;;  %3759 = vmatpush.msrb.mxu0 %v3322_v30 }
 0x529   :  { %v8327_v15 = vunpack.i.h.bf16 %v7459_v17  ;;  %v8326_v32 = vunpack.i.l.bf16 %v7459_v17 }
 0x52a   :  { %v7465_v49 = vsel %vm407_vm6, %v4707_v39, %v4771_v2  ;;  %v7470_v62 = vsel %vm234_vm7, %v8565_v33, %v4766_v8  ;;  %v4647_v39 = vunpack.i.h.bf16 %v7253_v58  ;;  %v4646_v2 = vunpack.i.l.bf16 %v7253_v58 }
 0x52b   :  { %8564 = vst [vmem:[#allocation43_spill] sm:$0xff] %v7465_v49  ;;  %v7477_v30 = vsel %vm234_vm7, %v8326_v32, %v8327_v15  ;;  %v4691_v8 = vunpack.i.l.bf16 %v7340_v11 }
 0x52c   :  { %8566 = vst [vmem:[#allocation22_spill] sm:$0xff] %v7470_v62 }
 0x52d   :  { %8567 = vst [vmem:[#allocation29_spill] sm:$0xff] %v7477_v30  ;;  %4944 = vrot.lane.b32.xlu2 %v4943_v20, %s5157_s24  ;;  %v2901_v20 = vmul.f32 %v2892_v63, %v6985_v48  ;;  %v8569_v30 = vunpack.i.h.bf16 %v7312_v1  ;;  %v8572_v63 = vunpack.i.h.bf16 %v7356_v57 }
 0x52f   :  { %v4790_v31 = vpop.permute.xlu2 %4789  ;;  %v4780_v35 = vpop.permute.xlu0 %4779 }
 0x530   :  { %v4792_v33 = vunpack.i.h.bf16 %v4790_v31  ;;  %v4791_v62 = vunpack.i.l.bf16 %v4790_v31  ;;  %v4782_v49 = vunpack.i.h.bf16 %v4780_v35  ;;  %v4781_v26 = vunpack.i.l.bf16 %v4780_v35  ;;  %v7485_v32 = vpop.permute.xlu1 %4774 }
 0x531   :  { %v4776_v41 = vunpack.i.l.bf16 %v7485_v32  ;;  %v4958_v35 = vpack.i.bf16 %v2901_v20, %v2900_v51 }
 0x532   :  { %v2754_v15 = vsel %vm753_vm4, %v4782_v49, %v4691_v8  ;;  %v7493_v58 = vsel %vm234_vm7, %v8328_v19, %v4791_v62  ;;  %v7498_v50 = vsel %vm753_vm4, %v8569_v30, %v4781_v26  ;;  %v7501_v31 = vsel %vm234_vm7, %v4791_v62, %v4792_v33 }
 0x533   :  { %8568 = vst [vmem:[#allocation21_spill] sm:$0xff] %v7493_v58  ;;  %3730 = vmatpush.msrb.mxu2 %v2754_v15  ;;  %v7506_v28 = vsel %vm580_vm5, %v8572_v63, %v4776_v41  ;;  %v2750_v49 = vsel %vm753_vm4, %v4646_v2, %v4647_v39  ;;  %v4692_v19 = vunpack.i.h.bf16 %v7340_v11  ;;  %v2689_v62 = vmul.f32 %v8519_v0, %v7111_v44 }
 0x534   :  { %8570 = vst [vmem:[#allocation32_spill] sm:$0xff] %v7498_v50  ;;  %v8330_v2 = vunpack.i.h.bf16 %v7336_v55  ;;  %v2684_v11 = vmul.f32 %v8519_v0, %v7075_v24  ;;  %v8574_v63 = vunpack.i.h.bf16 %v7184_v34  ;;  %v8578_v34 = vunpack.i.l.bf16 %v7415_v42 }
 0x535   :  { %8571 = vst [vmem:[#allocation24_spill] sm:$0xff] %v7501_v31  ;;  %4959 = vrot.lane.b32.xlu2 %v4958_v35, %s5157_s24  ;;  %3731 = vmatpush.msrb.mxu2 %v2750_v49 }
 0x536   :  { %8573 = vst [vmem:[#allocation19_spill] sm:$0xff] %v7506_v28  ;;  %v4973_v31 = vpack.i.bf16 %v2684_v11, %v2689_v62  ;;  %v8580_v28 = vld [vmem:[#allocation49_spill] sm:$0xff]  ;;  %v4737_v62 = vunpack.i.h.bf16 %v7394_v23 }
 0x537   :  { %v4805_v58 = vpop.permute.xlu2 %4804  ;;  %v7511_v26 = vpop.permute.xlu0 %4784  ;;  %v3072_v50 = vmul.f32 0.0, %v8580_v28 }
 0x538   :  { %v4807_v15 = vunpack.i.h.bf16 %v4805_v58  ;;  %v4806_v30 = vunpack.i.l.bf16 %v4805_v58  ;;  %v8329_v33 = vunpack.i.l.bf16 %v7511_v26  ;;  %v4795_v20 = vpop.permute.xlu1 %4794 }
 0x539   :  { %v4797_v41 = vunpack.i.h.bf16 %v4795_v20  ;;  %v4796_v35 = vunpack.i.l.bf16 %v4795_v20 }
 0x53a   :  { %v2763_v49 = vsel %vm753_vm4, %v8574_v63, %v8329_v33  ;;  %v7526_v51 = vsel %vm753_vm4, %v4692_v19, %v4806_v30  ;;  %v7529_v58 = vsel %vm753_vm4, %v4806_v30, %v4807_v15  ;;  %v8579_v63 = vunpack.i.h.bf16 %v7242_v22 }
 0x53b   :  { %8575 = vst [vmem:[#allocation41_spill] sm:$0xff] %v7529_v58  ;;  %3815 = vmatpush.msrb.mxu3 %v2763_v49  ;;  %v7534_v20 = vsel %vm407_vm6, %v8330_v2, %v4796_v35  ;;  %v7537_v0 = vsel %vm407_vm6, %v4796_v35, %v4797_v41  ;;  %v4736_v15 = vunpack.i.l.bf16 %v7394_v23  ;;  %v2755_v30 = vsel %vm753_vm4, %v4691_v8, %v4692_v19 }
 0x53c   :  { %8576 = vst [vmem:[#allocation35_spill] sm:$0xff] %v7534_v20  ;;  %v2759_v33 = vsel %vm753_vm4, %v8579_v63, %v8578_v34  ;;  %v7561_v23 = vpack.i.bf16 %v3072_v50, %v3072_v50  ;;  %v4662_v19 = vunpack.i.h.bf16 %v7274_v27  ;;  %v4686_v63 = vunpack.i.l.bf16 %v7231_v13 }
 0x53d   :  { %8577 = vst [vmem:[#allocation47_spill] sm:$0xff] %v7537_v0  ;;  %4974 = vrot.lane.b32.xlu2 %v4973_v31, %s5161_s28  ;;  %3816 = vmatpush.msrb.mxu3 %v2759_v33  ;;  %v8582_v31 = vunpack.i.l.bf16 %v7312_v1  ;;  %v8584_v1 = vunpack.i.h.bf16 %v7459_v17  ;;  %v8586_v8 = vunpack.i.h.bf16 %v7417_v43 }
 0x53f   :  { %v7549_v11 = vpop.permute.xlu2 %4809  ;;  %v7551_v41 = vpop.permute.xlu0 %4799  ;;  %3817 = vmatpush.msrb.mxu3 %v2755_v30  ;;  %v2751_v33 = vsel %vm753_vm4, %v4647_v39, %v8582_v31  ;;  %v2593_v30 = vsel %vm580_vm5, %v4736_v15, %v4737_v62  ;;  %v2902_v39 = vmul.f32 0.0, %v7217_v38  ;;  %v4732_v31 = vunpack.i.h.bf16 %v7354_v4 }
 0x540   :  { %8581 = vst [vmem:[#allocation40_spill] sm:$0xff] %v7551_v41  ;;  %v4811_v22 = vunpack.i.l.bf16 %v7549_v11  ;;  %v4802_v35 = vunpack.i.h.bf16 %v7551_v41  ;;  %v8331_v28 = vunpack.i.l.bf16 %v7551_v41  ;;  %v7556_v49 = vpop.permute.xlu1 %4814  ;;  %v8589_v38 = vunpack.i.h.bf16 %v7231_v13 }
 0x541   :  { %v4816_v34 = vunpack.i.l.bf16 %v7556_v49  ;;  %3818 = vmatpush.msrb.mxu3 %v2751_v33  ;;  %v4731_v33 = vunpack.i.l.bf16 %v7354_v4  ;;  %v4657_v41 = vunpack.i.h.bf16 %v7167_v5 }
 0x542   :  { %v7571_v2 = vsel %vm580_vm5, %v8331_v28, %v4802_v35  ;;  %v7576_v50 = vsel %vm234_vm7, %v8584_v1, %v4811_v22  ;;  %v8588_v35 = vunpack.i.l.bf16 %v7387_v59  ;;  %v2585_v4 = vsel %vm580_vm5, %v4686_v63, %v8589_v38 }
 0x543   :  { %8583 = vst [vmem:[#allocation23_spill] sm:$0xff] %v7571_v2  ;;  %3819 = vmatpush.msrb.mxu3 %v2593_v30  ;;  %v7584_v0 = vsel %vm407_vm6, %v8586_v8, %v4816_v34  ;;  %v4642_v2 = vunpack.i.h.bf16 %v7149_v16  ;;  %v7595_v22 = vpack.i.bf16 %v2902_v39, %v2902_v39  ;;  %v4661_v30 = vunpack.i.l.bf16 %v7274_v27 }
 0x544   :  { %8585 = vst [vmem:[#allocation37_spill] sm:$0xff] %v7576_v50  ;;  %v2589_v28 = vsel %vm580_vm5, %v4662_v19, %v8588_v35  ;;  %v8590_v1 = vunpack.i.l.bf16 %v7356_v57  ;;  %v2423_v50 = vsel %vm407_vm6, %v4731_v33, %v4732_v31  ;;  %v4727_v38 = vunpack.i.h.bf16 %v7389_v3 }
 0x545   :  { %8587 = vst [vmem:[#allocation27_spill] sm:$0xff] %v7584_v0  ;;  %4989 = vrot.lane.b32.xlu2 %v7561_v23, %s5156_s21  ;;  %3820 = vmatpush.msrb.mxu3 %v2589_v28  ;;  %v4777_v39 = vunpack.i.h.bf16 %v7485_v32  ;;  %v4681_v32 = vunpack.i.l.bf16 %v7336_v55 }
 0x546   :  { %v2581_v35 = vsel %vm580_vm5, %v4642_v2, %v8590_v1 }
 0x547   :  { %v4845_v8 = vpop.permute.xlu2 %4844  ;;  %v4820_v34 = vpop.permute.xlu0 %4819  ;;  %3821 = vmatpush.msrb.mxu3 %v2585_v4 }
 0x548   :  { %v4847_v0 = vunpack.i.h.bf16 %v4845_v8  ;;  %v4846_v58 = vunpack.i.l.bf16 %v4845_v8  ;;  %v4822_v28 = vunpack.i.h.bf16 %v4820_v34  ;;  %v4821_v20 = vunpack.i.l.bf16 %v4820_v34  ;;  %v4825_v12 = vpop.permute.xlu1 %4824 }
 0x549   :  { %v4827_v13 = vunpack.i.h.bf16 %v4825_v12  ;;  %v4826_v27 = vunpack.i.l.bf16 %v4825_v12  ;;  %3822 = vmatpush.msrb.mxu3 %v2581_v35  ;;  %v8591_v8 = vunpack.i.h.bf16 %v7387_v59  ;;  %v8592_v59 = vunpack.i.l.bf16 %v7417_v43 }
 0x54a   :  { %v2592_v4 = vsel %vm580_vm5, %v4822_v28, %v4736_v15  ;;  %v7606_v57 = vsel %vm580_vm5, %v4737_v62, %v4846_v58  ;;  %v7609_v1 = vsel %vm580_vm5, %v4846_v58, %v4847_v0  ;;  %v4641_v58 = vunpack.i.l.bf16 %v7149_v16 }
 0x54b   :  { %v7614_v34 = vsel %vm580_vm5, %v8591_v8, %v4821_v20  ;;  %3732 = vmatpush.msrb.mxu2 %v2592_v4  ;;  %3823 = vmatpush.msrb.mxu3 %v2423_v50  ;;  %v7619_v12 = vsel %vm234_vm7, %v4727_v38, %v4826_v27  ;;  %v7622_v62 = vsel %vm234_vm7, %v4826_v27, %v4827_v13  ;;  %v4817_v15 = vunpack.i.h.bf16 %v7556_v49 }
 0x54c   :  { %v2588_v0 = vsel %vm580_vm5, %v4661_v30, %v4662_v19  ;;  %v2419_v20 = vsel %vm407_vm6, %v4657_v41, %v8592_v59  ;;  %v2584_v50 = vsel %vm580_vm5, %v4777_v39, %v4686_v63  ;;  %v4637_v13 = vunpack.i.h.bf16 %v7204_v18 }
 0x54d   :  { %5004 = vrot.lane.b32.xlu2 %v7595_v22, %s5157_s24  ;;  %3733 = vmatpush.msrb.mxu2 %v2588_v0  ;;  %v4726_v35 = vunpack.i.l.bf16 %v7389_v3  ;;  %v8593_v30 = vunpack.i.h.bf16 %v7336_v55  ;;  %v4656_v43 = vunpack.i.l.bf16 %v7167_v5  ;;  %v2580_v63 = vsel %vm580_vm5, %v4641_v58, %v4642_v2 }
 0x54e   :  { %3824 = vmatpush.msrb.mxu3 %v2419_v20  ;;  %v8594_v3 = vunpack.i.l.bf16 %v7361_v9  ;;  %v4772_v8 = vunpack.i.h.bf16 %v7449_v53  ;;  %v2422_v55 = vsel %vm407_vm6, %v4817_v15, %v4731_v33  ;;  %v4636_v59 = vunpack.i.l.bf16 %v7204_v18 }
 0x54f   :  { %v7635_v16 = vpop.permute.xlu2 %4849  ;;  %v4830_v19 = vpop.permute.xlu0 %4829  ;;  %3734 = vmatpush.msrb.mxu2 %v2584_v50  ;;  %v2415_v28 = vsel %vm407_vm6, %v4681_v32, %v8593_v30  ;;  %v4652_v2 = vunpack.i.h.bf16 %v7224_v54  ;;  %v4676_v58 = vunpack.i.l.bf16 %v7306_v61  ;;  %v2253_v9 = vsel %vm234_vm7, %v4726_v35, %v4727_v38 }
 0x550   :  { %v4832_v27 = vunpack.i.h.bf16 %v4830_v19  ;;  %v4831_v4 = vunpack.i.l.bf16 %v4830_v19  ;;  %v7641_v49 = vpop.permute.xlu1 %4839  ;;  %3825 = vmatpush.msrb.mxu3 %v2415_v28  ;;  %v2411_v39 = vsel %vm407_vm6, %v4637_v13, %v8594_v3  ;;  %v2418_v53 = vsel %vm407_vm6, %v4656_v43, %v4657_v41  ;;  %v8597_v28 = vld [vmem:[#allocation26_spill] sm:$0xff] }
 0x551   :  { %3735 = vmatpush.msrb.mxu2 %v2580_v63  ;;  %v8595_v33 = vunpack.i.l.bf16 %v7459_v17  ;;  %v4812_v20 = vunpack.i.h.bf16 %v7549_v11  ;;  %v2414_v18 = vsel %vm407_vm6, %v4772_v8, %v4681_v32  ;;  %v4651_v15 = vunpack.i.l.bf16 %v7224_v54  ;;  %v7687_v3 = vld [vmem:[#allocation9] sm:$0xff] }
 0x552   :  { %3826 = vmatpush.msrb.mxu3 %v2411_v39  ;;  %v7650_v0 = vsel %vm407_vm6, %v4732_v31, %v4831_v4  ;;  %v7653_v5 = vsel %vm407_vm6, %v4831_v4, %v4832_v27  ;;  %v4842_v50 = vunpack.i.h.bf16 %v7641_v49  ;;  %v8596_v41 = vunpack.i.h.bf16 %v7306_v61 }
 0x553   :  { %3736 = vmatpush.msrb.mxu2 %v2422_v55  ;;  %v2249_v31 = vsel %vm234_vm7, %v4652_v2, %v8595_v33  ;;  %v2410_v30 = vsel %vm407_vm6, %v4636_v59, %v4637_v13  ;;  %v4841_v11 = vunpack.i.l.bf16 %v7641_v49  ;;  %v4767_v39 = vunpack.i.h.bf16 %v7451_v6 }
 0x554   :  { %3827 = vmatpush.msrb.mxu3 %v2253_v9  ;;  %v2245_v17 = vsel %vm234_vm7, %v4676_v58, %v8596_v41  ;;  %v2252_v8 = vsel %vm234_vm7, %v4812_v20, %v4726_v35  ;;  %v8350_v59 = vunpack.i.h.bf16 %v7635_v16  ;;  %v4851_v9 = vunpack.i.l.bf16 %v7635_v16 }
 0x555   :  { %3737 = vmatpush.msrb.mxu2 %v2418_v53  ;;  %v4631_v6 = vunpack.i.l.bf16 %v7228_v21  ;;  %v3160_v35 = vsel %vm491_vm2, %v4841_v11, %v4842_v50  ;;  %v2244_v41 = vsel %vm234_vm7, %v4767_v39, %v4676_v58  ;;  %v8606_v49 = vunpack.i.h.bf16 %v7635_v16 }
 0x556   :  { %3828 = vmatpush.msrb.mxu3 %v2249_v31  ;;  %v3242_v31 = vmul.f32 0.0, %v7134_v47 }
 0x557   :  { %v7667_v19 = vpop.permute.xlu2 %3396  ;;  %v7669_v38 = vpop.permute.xlu0 %4834  ;;  %3738 = vmatpush.msrb.mxu2 %v2414_v18 }
 0x558   :  { %v3401_v32 = vsel %vm234_vm7, %v8597_v28, %v7667_v19  ;;  %v4837_v54 = vunpack.i.h.bf16 %v7669_v38  ;;  %v4836_v43 = vunpack.i.l.bf16 %v7669_v38  ;;  %v7681_v27 = vpop.permute.xlu1 %4859  ;;  %3829 = vmatpush.msrb.mxu3 %v2245_v17  ;;  %v3156_v17 = vsel %vm491_vm2, %v4851_v9, %v8350_v59 }
 0x559   :  { %v3410_v4 = vmul.f32 %v3401_v32, %v7003_v60  ;;  %v3415_v61 = vmul.f32 %v3401_v32, %v7051_v37  ;;  %v3420_v63 = vmul.f32 %v3401_v32, %v7080_v45  ;;  %v3425_v13 = vmul.f32 %v3401_v32, %v7114_v10  ;;  %3739 = vmatpush.msrb.mxu2 %v2410_v30  ;;  %v7723_v32 = vld [vmem:[#allocation9 + $0x18] sm:$0xff] }
 0x55a   :  { %3830 = vmatpush.msrb.mxu3 %v7291_v25  ;;  %v3318_v55 = vsel %vm318_vm1, %v4836_v43, %v4837_v54  ;;  %v2248_v25 = vsel %vm234_vm7, %v4651_v15, %v4652_v2  ;;  %v8348_v47 = vunpack.i.h.bf16 %v7681_v27  ;;  %v4861_v11 = vunpack.i.l.bf16 %v7681_v27 }
 0x55b   :  { %3740 = vmatpush.msrb.mxu2 %v2252_v8  ;;  %3760 = vmatpush.msrb.mxu0 %v3318_v55  ;;  %v4963_v53 = vpack.i.bf16 %v3420_v63, %v3425_v13  ;;  %v4968_v33 = vpack.i.bf16 %v3410_v4, %v3415_v61  ;;  %v8598_v28 = vunpack.i.h.bf16 %v7228_v21  ;;  %v4983_v4 = vpack.i.bf16 %v3242_v31, %v3242_v31 }
 0x55c   :  { %3831 = vmatmul.f32.vlgmr.msrb.gmra.mxu3 %v7687_v3  ;;  %v3148_v21 = vsel %vm491_vm2, %v4861_v11, %v8348_v47 }
 0x55d   :  { %4964 = vrot.lane.b32.xlu0 %v4963_v53, %s5154_s3  ;;  %4969 = vrot.lane.b32.xlu1 %v4968_v33, %s5154_s3  ;;  %v2240_v58 = vsel %vm234_vm7, %v4631_v6, %v8598_v28 }
 0x55e   :  { %3741 = vmatpush.msrb.mxu2 %v2248_v25  ;;  %3761 = vmatpush.msrb.mxu0 %v3160_v35  ;;  %v7749_v35 = vld [vmem:[#allocation9 + $0x30] sm:$0xff] }
 0x55f   :  { %v7706_v20 = vpop.permute.xlu2 %4874  ;;  %v7708_v18 = vpop.permute.xlu0 %4854 }
 0x560   :  { %v8349_v2 = vunpack.i.h.bf16 %v7708_v18  ;;  %v4856_v15 = vunpack.i.l.bf16 %v7708_v18  ;;  %v7716_v30 = vpop.permute.xlu1 %4869  ;;  %3742 = vmatpush.msrb.mxu2 %v2244_v41  ;;  %3762 = vmatpush.msrb.mxu0 %v3156_v17  ;;  %v8338_v41 = vunpack.i.h.bf16 %v7706_v20  ;;  %v4876_v17 = vunpack.i.l.bf16 %v7706_v20 }
 0x561   :  { %v8339_v13 = vunpack.i.h.bf16 %v7716_v30  ;;  %v4871_v39 = vunpack.i.l.bf16 %v7716_v30  ;;  %v8608_v16 = vunpack.i.h.bf16 %v7708_v18 }
 0x562   :  { %3743 = vmatpush.msrb.mxu2 %v2240_v58  ;;  %v3152_v43 = vsel %vm491_vm2, %v4856_v15, %v8349_v2  ;;  %v7774_v58 = vld [vmem:[%s8204_s5 + $0x4] ss:$8 sm:$0xf] }
 0x563   :  { %3763 = vmatpush.msrb.mxu0 %v3152_v43  ;;  %3744 = vmatmul.f32.vlgmr.msrb.gmra.mxu2 %v7687_v3  ;;  %v2986_v11 = vsel %vm664_vm3, %v4871_v39, %v8339_v13 }
 0x564   :  { %3834 = vmatmul.f32.gmra.mxu3 %v7723_v32 }
 0x565   :  { %4979 = vrot.lane.b32.xlu0 %v4983_v4, %s5155_s18  ;;  %4984 = vrot.lane.b32.xlu1 %v4983_v4, %s5155_s18 }
 0x566   :  { %3764 = vmatpush.msrb.mxu0 %v3148_v21 }
 0x567   :  { %v7735_v61 = vpop.permute.xlu2 %4889  ;;  %v7737_v63 = vpop.permute.xlu0 %4864 }
 0x568   :  { %v8340_v8 = vunpack.i.h.bf16 %v7737_v63  ;;  %v4866_v55 = vunpack.i.l.bf16 %v7737_v63  ;;  %v7743_v9 = vpop.permute.xlu1 %4884  ;;  %v8334_v53 = vunpack.i.h.bf16 %v7735_v61  ;;  %v4891_v33 = vunpack.i.l.bf16 %v7735_v61 }
 0x569   :  { %v8335_v6 = vunpack.i.h.bf16 %v7743_v9  ;;  %v4886_v25 = vunpack.i.l.bf16 %v7743_v9 }
 0x56a   :  { %v2990_v31 = vsel %vm664_vm3, %v4866_v55, %v8340_v8  ;;  %v3496_v28 = vsel %vm145_vm0, %v4891_v33, %v8334_v53  ;;  %v8599_v53 = vld [vmem:[#allocation16_spill] sm:$0xff] }
 0x56b   :  { %3765 = vmatpush.msrb.mxu0 %v2990_v31  ;;  %v3500_v15 = vsel %vm145_vm0, %v4886_v25, %v8335_v6  ;;  %3747 = vmatmul.f32.gmra.mxu2 %v7723_v32  ;;  %v2816_v25 = vperm.slane %v7774_v58, 0  ;;  %v7790_v31 = vld [vmem:[#allocation9 + $0x48] sm:$0xff] }
 0x56c   :  { %3798 = vmatpush.msrb.mxu1 %v3500_v15  ;;  %3837 = vmatmul.f32.gmra.mxu3 %v7749_v35 }
 0x56d   :  { %4994 = vrot.lane.b32.xlu0 %v7561_v23, %s5156_s21  ;;  %4999 = vrot.lane.b32.xlu1 %v7595_v22, %s5157_s24  ;;  %v2982_v22 = vsel %vm664_vm3, %v4876_v17, %v8338_v41 }
 0x56e   :  { %3766 = vmatpush.msrb.mxu0 %v2986_v11  ;;  %3799 = vmatpush.msrb.mxu1 %v3496_v28  ;;  %v2836_v11 = vmul.f32 %v2816_v25, %v6775_v7  ;;  %v2832_v28 = vmul.f32 %v2816_v25, %v6749_v36 }
 0x56f   :  { %v7776_v43 = vpop.permute.xlu2 %4904  ;;  %v7778_v23 = vpop.permute.xlu0 %4879 }
 0x570   :  { %v8337_v4 = vunpack.i.h.bf16 %v7778_v23  ;;  %v4881_v21 = vunpack.i.l.bf16 %v7778_v23  ;;  %v7785_v39 = vpop.permute.xlu1 %4899  ;;  %3767 = vmatpush.msrb.mxu0 %v2982_v22 }
 0x571   :  { %v8336_v55 = vunpack.i.h.bf16 %v7785_v39  ;;  %v4901_v33 = vunpack.i.l.bf16 %v7785_v39 }
 0x572   :  { %v2978_v15 = vsel %vm664_vm3, %v4881_v21, %v8337_v4  ;;  %v2828_v21 = vmul.f32 %v2816_v25, %v8599_v53  ;;  %v7814_v4 = vld [vmem:[#allocation9 + $0x8] sm:$0xff]  ;;  %v8601_v53 = vunpack.i.h.bf16 %v7422_v56 }
 0x573   :  { %3768 = vmatpush.msrb.mxu0 %v2978_v15  ;;  %v3492_v17 = vsel %vm145_vm0, %v4901_v33, %v8336_v55  ;;  %3750 = vmatmul.f32.gmra.mxu2 %v7749_v35  ;;  %v4906_v15 = vunpack.i.l.bf16 %v7776_v43 }
 0x574   :  { %3800 = vmatpush.msrb.mxu1 %v3492_v17  ;;  %3840 = vmatmul.f32.gmra.mxu3 %v7790_v31  ;;  %v8343_v17 = vunpack.i.h.bf16 %v7776_v43 }
 0x575   :  { %3769 = vmatpush.msrb.mxu0 %v2836_v11  ;;  %v8600_v11 = vld [vmem:[#allocation28_spill] sm:$0xff] }
 0x576   :  { %v2824_v36 = vmul.f32 %v2816_v25, %v8600_v11  ;;  %v8602_v25 = vunpack.i.h.bf16 %v7338_v14 }
 0x577   :  { %v7802_v22 = vpop.permute.xlu0 %4894  ;;  %3770 = vmatpush.msrb.mxu0 %v2832_v28  ;;  %v7811_v55 = vpop.permute.xlu2 %4919 }
 0x578   :  { %v8344_v6 = vunpack.i.h.bf16 %v7802_v22  ;;  %v4896_v33 = vunpack.i.l.bf16 %v7802_v22  ;;  %v7808_v7 = vpop.permute.xlu1 %4914  ;;  %v3327_v11 = vsel %vm318_vm1, %v8602_v25, %v4906_v15  ;;  %v8341_v56 = vunpack.i.h.bf16 %v7811_v55 }
 0x579   :  { %3771 = vmatpush.msrb.mxu0 %v2828_v21  ;;  %v4916_v28 = vunpack.i.l.bf16 %v7808_v7  ;;  %v8342_v8 = vunpack.i.h.bf16 %v7808_v7  ;;  %v4921_v21 = vunpack.i.l.bf16 %v7811_v55 }
 0x57a   :  { %v3331_v41 = vsel %vm318_vm1, %v8601_v53, %v4896_v33  ;;  %v3332_v13 = vsel %vm318_vm1, %v4896_v33, %v8344_v6  ;;  %v3328_v33 = vsel %vm318_vm1, %v4906_v15, %v8343_v17  ;;  %v8346_v53 = vunpack.i.h.bf16 %v7511_v26 }
 0x57b   :  { %3772 = vmatpush.msrb.mxu0 %v2824_v36  ;;  %3844 = vmatpush.msra.mxu2 %v3331_v41  ;;  %v8603_v36 = vunpack.i.h.bf16 %v7264_v52  ;;  %v3324_v14 = vsel %vm318_vm1, %v4916_v28, %v8342_v8  ;;  %v3319_v52 = vsel %vm318_vm1, %v4837_v54, %v4921_v21  ;;  %v8604_v54 = vunpack.i.l.bf16 %v7511_v26 }
 0x57c   :  { %3931 = vmatpush.msra.mxu3 %v3332_v13  ;;  %3773 = vmatmul.f32.vlgmr.msrb.gmra.mxu0 %v7814_v4 }
 0x57d   :  { %3845 = vmatpush.msra.mxu2 %v3327_v11  ;;  %v3323_v41 = vsel %vm318_vm1, %v8603_v36, %v4916_v28  ;;  %v7853_v36 = vld [vmem:[#allocation9 + $0x20] sm:$0xff]  ;;  %v7855_v28 = vld [vmem:[#allocation9 + $0x10] sm:$0xff] }
 0x57e   :  { %3932 = vmatpush.msra.mxu3 %v3328_v33  ;;  %3753 = vmatmul.f32.gmra.mxu2 %v7790_v31  ;;  %v3320_v33 = vsel %vm318_vm1, %v4921_v21, %v8341_v56  ;;  %v2764_v21 = vsel %vm753_vm4, %v8604_v54, %v8346_v53 }
 0x57f   :  { %v7837_v13 = vpop.permute.xlu0 %4909  ;;  %3846 = vmatpush.msra.mxu2 %v3323_v41  ;;  %v8345_v41 = vunpack.i.h.bf16 %v7415_v42  ;;  %v7861_v38 = vpop.permute.xlu2 %4934 }
 0x580   :  { %v8347_v25 = vunpack.i.h.bf16 %v7837_v13  ;;  %v4911_v15 = vunpack.i.l.bf16 %v7837_v13  ;;  %v7845_v11 = vpop.permute.xlu1 %4929  ;;  %3933 = vmatpush.msra.mxu3 %v3324_v14  ;;  %v4937_v59 = vunpack.i.h.bf16 %v7861_v38  ;;  %v4936_v53 = vunpack.i.l.bf16 %v7861_v38 }
 0x581   :  { %3847 = vmatpush.msra.mxu2 %v3319_v52  ;;  %v8605_v52 = vunpack.i.l.bf16 %v7415_v42 }
 0x582   :  { %3934 = vmatpush.msra.mxu3 %v3320_v33  ;;  %v3488_v14 = vsel %vm145_vm0, %v4911_v15, %v8347_v25  ;;  %v4931_v25 = vunpack.i.l.bf16 %v7845_v11 }
 0x583   :  { %3801 = vmatpush.msrb.mxu1 %v3488_v14  ;;  %v2760_v15 = vsel %vm753_vm4, %v8605_v52, %v8345_v41  ;;  %v7888_v41 = vld [vmem:[#allocation9 + $0x28] sm:$0xff] }
 0x584   :  { %3776 = vmatmul.f32.gmra.mxu0 %v7853_v36  ;;  %4192 = vmatmul.msk.f32.vlgmr.msrb.gmra.mxu1 %vm1725_vm8, %v7855_v28 }
 0x585   :  { %3902 = vmatpush.msra.mxu1 %v2764_v21 }
 0x587   :  { %3903 = vmatpush.msra.mxu1 %v2760_v15  ;;  %v7876_v33 = vpop.permute.xlu0 %4924  ;;  %v7886_v15 = vld [vmem:[#allocation9 + $0x38] sm:$0xff] }
 0x588   :  { %v4927_v14 = vunpack.i.h.bf16 %v7876_v33  ;;  %v4926_v56 = vunpack.i.l.bf16 %v7876_v33  ;;  %v3399_v8 = vpop.permute.xlu1 %3398 }
 0x589   :  { %v3402_v17 = vsel %vm234_vm7, %v7667_v19, %v3399_v8  ;;  %v3412_v6 = vmul.f32 0.0, %v3399_v8  ;;  %3904 = vmatpush.msra.mxu1 %v7526_v51 }
 0x58a   :  { %v3416_v54 = vmul.f32 %v3402_v17, %v7046_v46  ;;  %v3421_v21 = vmul.f32 %v3402_v17, %v7075_v24  ;;  %v3426_v52 = vmul.f32 %v3402_v17, %v7111_v44  ;;  %v3161_v51 = vsel %vm491_vm2, %v4842_v50, %v4926_v56 }
 0x58b   :  { %3905 = vmatpush.msra.mxu1 %v7328_v40  ;;  %v3162_v19 = vsel %vm491_vm2, %v4926_v56, %v4927_v14  ;;  %3848 = vmatpush.msra.mxu2 %v3161_v51  ;;  %v7904_v40 = vpop.permute.xlu2 %4944  ;;  %v3157_v50 = vsel %vm491_vm2, %v8606_v49, %v4931_v25  ;;  %v8607_v56 = vunpack.i.h.bf16 %v7845_v11  ;;  %v8609_v51 = vld [vmem:[#allocation40_spill] sm:$0xff] }
 0x58c   :  { %3935 = vmatpush.msra.mxu3 %v3162_v19  ;;  %v5008_v8 = vpack.i.bf16 %v3412_v6, %v3426_v52  ;;  %v5013_v47 = vpack.i.bf16 %v3412_v6, %v3421_v21  ;;  %v5018_v2 = vpack.i.bf16 %v3412_v6, %v3416_v54  ;;  %3779 = vmatmul.f32.gmra.mxu0 %v7886_v15  ;;  %v8611_v19 = vld [vmem:[#allocation17_spill] sm:$0xff] }
 0x58d   :  { %4193 = vmatmul.msk.f32.gmra.mxu1 %vm1725_vm8, %v7888_v41  ;;  %v3158_v54 = vsel %vm491_vm2, %v4931_v25, %v8607_v56  ;;  %v3411_v52 = vmul.f32 %v3402_v17, %v6985_v48  ;;  %3849 = vmatpush.msra.mxu2 %v3157_v50  ;;  %v3154_v25 = vsel %vm491_vm2, %v4936_v53, %v4937_v59  ;;  %v8610_v17 = vunpack.i.l.bf16 %v8609_v51  ;;  %v7939_v56 = vld [vmem:[#allocation9 + $0x50] sm:$0xff]  ;;  %v8614_v51 = vld [vmem:[#allocation31_spill] sm:$0xff] }
 0x58e   :  { %3906 = vmatpush.msra.mxu1 %v7606_v57  ;;  %5009 = vrot.lane.b32.xlu0 %v5008_v8, %s5154_s3  ;;  %v8612_v8 = vunpack.i.h.bf16 %v8611_v19  ;;  %v8613_v50 = vunpack.i.h.bf16 %v7681_v27  ;;  %v3692_v27 = vld [vmem:[%s8203_s4] sm:$0xff] }
 0x58f   :  { %5014 = vrot.lane.b32.xlu1 %v5013_v47, %s5154_s3  ;;  %5019 = vrot.lane.b32.xlu2 %v5018_v2, %s5154_s3  ;;  %v7916_v21 = vpop.permute.xlu0 %4939  ;;  %v3153_v2 = vsel %vm491_vm2, %v8608_v16, %v4936_v53  ;;  %v4946_v53 = vunpack.i.l.bf16 %v7904_v40  ;;  %v4947_v16 = vunpack.i.h.bf16 %v7904_v40  ;;  %v2819_v40 = vperm.slane %v7774_v58, 3 }
 0x590   :  { %3936 = vmatpush.msra.mxu3 %v3158_v54  ;;  %v4942_v57 = vunpack.i.h.bf16 %v7916_v21  ;;  %v4941_v47 = vunpack.i.l.bf16 %v7916_v21  ;;  %3907 = vmatpush.msra.mxu1 %v7407_v29  ;;  %v2586_v49 = vsel %vm580_vm5, %v8612_v8, %v8610_v17  ;;  %v7942_v54 = vld [vmem:[#allocation9 + $0x40] sm:$0xff]  ;;  %v8644_v21 = vld [vmem:[#allocation27_spill] sm:$0xff] }
 0x591   :  { %3850 = vmatpush.msra.mxu2 %v3153_v2  ;;  %v5023_v2 = vpack.i.bf16 %v3412_v6, %v3411_v52  ;;  %v8615_v6 = vunpack.i.h.bf16 %v7737_v63  ;;  %v8616_v63 = vld [vmem:[#allocation46_spill] sm:$0xff] }
 0x592   :  { %3937 = vmatpush.msra.mxu3 %v3154_v25  ;;  %v3149_v29 = vsel %vm491_vm2, %v8613_v50, %v4941_v47  ;;  %v3150_v18 = vsel %vm491_vm2, %v4941_v47, %v4942_v57  ;;  %3908 = vmatpush.msra.mxu1 %v2586_v49  ;;  %v7948_v25 = vpop.permute.xlu1 %4954  ;;  %v3693_v47 = vld [vmem:[%s8203_s4 + $0x8] sm:$0xff]  ;;  %v2992_v49 = vsel %vm664_vm3, %v4946_v53, %v4947_v16 }
 0x593   :  { %3851 = vmatpush.msra.mxu2 %v3149_v29  ;;  %v2991_v52 = vsel %vm664_vm3, %v8615_v6, %v4946_v53  ;;  %v7964_v19 = vpop.permute.xlu2 %4959  ;;  %v4956_v8 = vunpack.i.l.bf16 %v7948_v25  ;;  %v8617_v29 = vunpack.i.h.bf16 %v7716_v30  ;;  %v8618_v53 = vld [vmem:[#allocation35_spill] sm:$0xff]  ;;  %v3694_v6 = vld [vmem:[%s8203_s4 + $0x10] sm:$0xff]  ;;  %v3695_v30 = vld [vmem:[%s8203_s4 + $0x18] sm:$0xff]  ;;  %s5163_s4 = smov [#allocation10]  }
 0x594   :  { %3938 = vmatpush.msra.mxu3 %v3150_v18  ;;  %3909 = vmatpush.msra.mxu1 %v8614_v51  ;;  %v4957_v51 = vunpack.i.h.bf16 %v7948_v25  ;;  %v2835_v25 = vmul.f32 %v2819_v40, %v7075_v24  ;;  %s4144_s7 = sshll.u32 %s5163_s4, 4  ;;  %s4145_s7 = int_to_ptr.vmem [resolvable:$true] %s4144_s7 }
 0x595   :  { %3782 = vmatmul.f32.gmra.mxu0 %v7939_v56  ;;  %4194 = vmatmul.msk.f32.gmra.mxu1 %vm1725_vm8, %v7942_v54 }
 0x596   :  { %5024 = vrot.lane.b32.xlu0 %v5023_v2, %s5154_s3  ;;  %3910 = vmatpush.msra.mxu1 %v7650_v0  ;;  %v4961_v2 = vunpack.i.l.bf16 %v7964_v19 }
 0x597   :  { %3698 = vperm.xlu1 %4625, %v3692_v27   ;;  %v7962_v17 = vpop.permute.xlu0 %4949  ;;  %3703 = vperm.xlu2 %4626, %v3693_v47   ;;  %v7982_v47 = vld [vmem:[#allocation9 + $0x58] sm:$0xff] }
 0x598   :  { %3852 = vmatpush.msra.mxu2 %v2991_v52  ;;  %v4952_v50 = vunpack.i.h.bf16 %v7962_v17  ;;  %v4951_v0 = vunpack.i.l.bf16 %v7962_v17  ;;  %3939 = vmatpush.msra.mxu3 %v2992_v49  ;;  %v8619_v52 = vunpack.i.h.bf16 %v7706_v20  ;;  %v2984_v20 = vsel %vm664_vm3, %v4956_v8, %v4957_v51 }
 0x599   :  { %3911 = vmatpush.msra.mxu1 %v8616_v63  ;;  %v8620_v63 = vld [vmem:[#allocation33_spill] sm:$0xff]  ;;  %v2839_v17 = vmul.f32 %v2819_v40, %v7111_v44  ;;  %v8649_v44 = vld [vmem:[#allocation22_spill] sm:$0xff] }
 0x59a   :  { %v2987_v18 = vsel %vm664_vm3, %v8617_v29, %v4951_v0  ;;  %v2988_v27 = vsel %vm664_vm3, %v4951_v0, %v4952_v50  ;;  %v2983_v49 = vsel %vm664_vm3, %v8619_v52, %v4956_v8  ;;  %v4962_v0 = vunpack.i.h.bf16 %v7964_v19 }
 0x59b   :  { %3912 = vmatpush.msra.mxu1 %v8618_v53  ;;  %3853 = vmatpush.msra.mxu2 %v2987_v18  ;;  %v2817_v29 = vperm.slane %v7774_v58, 1  ;;  %v8621_v18 = vunpack.i.h.bf16 %v7778_v23  ;;  %v8622_v53 = vld [vmem:[#allocation14_spill] sm:$0xff] }
 0x59c   :  { %3940 = vmatpush.msra.mxu3 %v2988_v27 }
 0x59d   :  { %3913 = vmatpush.msra.mxu1 %v8620_v63  ;;  %3854 = vmatpush.msra.mxu2 %v2983_v49  ;;  %v2979_v27 = vsel %vm664_vm3, %v8621_v18, %v4961_v2  ;;  %v2837_v52 = vmul.f32 %v2817_v29, %v8622_v53  ;;  %v2818_v49 = vperm.slane %v7774_v58, 2  ;;  %v8625_v63 = vld [vmem:[#allocation21_spill] sm:$0xff]  ;;  %v8626_v18 = vld [vmem:[#allocation48_spill] sm:$0xff]  ;;  %v2831_v58 = vmul.f32 %v2819_v40, %v7046_v46 }
 0x59e   :  { %4195 = vmatmul.msk.f32.gmra.mxu1 %vm1725_vm8, %v7982_v47  ;;  %3708 = vperm.xlu0 %4627, %v3694_v6   ;;  %v8623_v6 = vld [vmem:[#allocation29_spill] sm:$0xff] }
 0x59f   :  { %3914 = vmatpush.msra.mxu1 %v7619_v12  ;;  %3713 = vperm.xlu1 %4625, %v3695_v30   ;;  %v2980_v12 = vsel %vm664_vm3, %v4961_v2, %v4962_v0  ;;  %v2838_v8 = vmul.f32 %v2818_v49, %v7114_v10  ;;  %v8624_v30 = vld [vmem:[#allocation15_spill] sm:$0xff]  ;;  %v2830_v2 = vmul.f32 %v2818_v49, %v7051_v37 }
 0x5a0   :  { %3941 = vmatpush.msra.mxu3 %v2984_v20  ;;  %3855 = vmatpush.msra.mxu2 %v2979_v27  ;;  %v2833_v23 = vmul.f32 %v2817_v29, %v8624_v30  ;;  %v2834_v20 = vmul.f32 %v2818_v49, %v7080_v45  ;;  %v8627_v27 = vld [vmem:[#allocation18_spill] sm:$0xff] }
 0x5a1   :  { %3915 = vmatpush.msra.mxu1 %v8623_v6  ;;  %v2829_v53 = vmul.f32 %v2817_v29, %v8627_v27  ;;  %v2826_v6 = vmul.f32 %v2818_v49, %v7003_v60  ;;  %v4975_v49 = vpop.permute.xlu2 %4974  ;;  %v8631_v27 = vunpack.i.h.bf16 %v7785_v39  ;;  %v8633_v39 = vunpack.i.h.bf16 %v7511_v26 }
 0x5a2   :  { %3942 = vmatpush.msra.mxu3 %v2980_v12  ;;  %3856 = vmatpush.msra.mxu2 %v2837_v52  ;;  %v8628_v52 = vld [vmem:[#allocation45_spill] sm:$0xff] }
 0x5a3   :  { %3916 = vmatpush.msra.mxu1 %v8625_v63  ;;  %v2825_v10 = vmul.f32 %v2817_v29, %v8628_v52  ;;  %v8630_v63 = vunpack.i.h.bf16 %v7735_v61  ;;  %v4977_v52 = vunpack.i.h.bf16 %v4975_v49  ;;  %v8632_v61 = vunpack.i.h.bf16 %v7837_v13 }
 0x5a4   :  { %3943 = vmatpush.msra.mxu3 %v2838_v8  ;;  %3857 = vmatpush.msra.mxu2 %v2833_v23  ;;  %v8629_v8 = vunpack.i.h.bf16 %v7743_v9  ;;  %v8635_v13 = vunpack.i.h.bf16 %v7415_v42  ;;  %v8639_v42 = vunpack.i.h.bf16 %v7811_v55  ;;  %v8641_v55 = vunpack.i.h.bf16 %v7845_v11  ;;  %v8643_v11 = vld [vmem:[#allocation19_spill] sm:$0xff] }
 0x5a5   :  { %3917 = vmatpush.msra.mxu1 %v8626_v18  ;;  %v4976_v18 = vunpack.i.l.bf16 %v4975_v49 }
 0x5a6   :  { %3944 = vmatpush.msra.mxu3 %v2834_v20  ;;  %3918 = vmatmul.f32.vlgmr.msra.gmra.mxu1 %v7687_v3 }
 0x5a7   :  { %3858 = vmatpush.msra.mxu2 %v2829_v53 }
 0x5a8   :  { %3945 = vmatpush.msra.mxu3 %v2830_v2 }
 0x5a9   :  { %3859 = vmatpush.msra.mxu2 %v2825_v10 }
 0x5aa   :  { %3946 = vmatpush.msra.mxu3 %v2826_v6  ;;  %3860 = vmatmul.f32.vlgmr.msra.gmra.mxu2 %v7814_v4 }
 0x5ab   :  { %3947 = vmatmul.f32.vlgmr.msra.gmra.mxu3 %v7814_v4 }
 0x5ae   :  { %3921 = vmatmul.f32.gmra.mxu1 %v7723_v32 }
 0x5b2   :  { %3863 = vmatmul.f32.gmra.mxu2 %v7853_v36 }
 0x5b3   :  { %3950 = vmatmul.f32.gmra.mxu3 %v7853_v36 }
 0x5b6   :  { %3924 = vmatmul.f32.gmra.mxu1 %v7749_v35 }
 0x5ba   :  { %3866 = vmatmul.f32.gmra.mxu2 %v7886_v15 }
 0x5bb   :  { %3953 = vmatmul.f32.gmra.mxu3 %v7886_v15 }
 0x5be   :  { %3927 = vmatmul.f32.gmra.mxu1 %v7790_v31 }
 0x5c2   :  { %3869 = vmatmul.f32.gmra.mxu2 %v7939_v56 }
 0x5c3   :  { %3956 = vmatmul.f32.gmra.mxu3 %v7939_v56 }
 0x5cf   :  { %v8032_v60 = vpop.permute.xlu0 %4964  ;;  %v8034_v37 = vpop.permute.xlu1 %4969 }
 0x5d0   :  { %v4967_v45 = vunpack.i.h.bf16 %v8032_v60  ;;  %v4966_v29 = vunpack.i.l.bf16 %v8032_v60  ;;  %v4971_v12 = vunpack.i.l.bf16 %v8034_v37  ;;  %v4972_v23 = vunpack.i.h.bf16 %v8034_v37 }
 0x5d2   :  { %v3501_v30 = vsel %vm145_vm0, %v8629_v8, %v4966_v29  ;;  %v3497_v20 = vsel %vm145_vm0, %v8630_v63, %v4967_v45  ;;  %v3493_v53 = vsel %vm145_vm0, %v8631_v27, %v4971_v12  ;;  %v3489_v8 = vsel %vm145_vm0, %v8632_v61, %v4972_v23  ;;  %v4990_v27 = vpop.permute.xlu2 %4989 }
 0x5d3   :  { %3885 = vmatpush.msra.mxu0 %v3501_v30  ;;  %v2765_v63 = vsel %vm753_vm4, %v8633_v39, %v4976_v18  ;;  %v8636_v61 = vunpack.i.h.bf16 %v7776_v43  ;;  %v4991_v26 = vunpack.i.l.bf16 %v4990_v27  ;;  %v8637_v18 = vunpack.i.h.bf16 %v7808_v7 }
 0x5d5   :  { %3886 = vmatpush.msra.mxu0 %v3497_v20  ;;  %v8634_v20 = vunpack.i.h.bf16 %v7802_v22  ;;  %v3163_v7 = vsel %vm491_vm2, %v4927_v14, %v4991_v26 }
 0x5d7   :  { %v4980_v9 = vpop.permute.xlu0 %4979  ;;  %v4985_v2 = vpop.permute.xlu1 %4984  ;;  %3887 = vmatpush.msra.mxu0 %v3493_v53 }
 0x5d8   :  { %v4982_v10 = vunpack.i.h.bf16 %v4980_v9  ;;  %v4981_v6 = vunpack.i.l.bf16 %v4980_v9  ;;  %v4986_v30 = vunpack.i.l.bf16 %v4985_v2  ;;  %v4987_v53 = vunpack.i.h.bf16 %v4985_v2 }
 0x5d9   :  { %3888 = vmatpush.msra.mxu0 %v3489_v8  ;;  %v2761_v9 = vsel %vm753_vm4, %v8635_v13, %v4977_v52  ;;  %v4992_v2 = vunpack.i.h.bf16 %v4990_v27 }
 0x5da   :  { %4196 = vmatmul.msk.f32.vlgmr.msra.gmra.mxu0 %vm1725_vm8, %v7855_v28  ;;  %v3333_v49 = vsel %vm318_vm1, %v8634_v20, %v4981_v6  ;;  %v3329_v8 = vsel %vm318_vm1, %v8636_v61, %v4982_v10  ;;  %v3325_v22 = vsel %vm318_vm1, %v8637_v18, %v4986_v30  ;;  %v8638_v6 = vld [vmem:[#allocation41_spill] sm:$0xff]  ;;  %v3321_v52 = vsel %vm318_vm1, %v8639_v42, %v4987_v53  ;;  %v5005_v33 = vpop.permute.xlu2 %5004  ;;  %v8642_v53 = vld [vmem:[#allocation23_spill] sm:$0xff] }
 0x5db   :  { %3989 = vmatpush.msrb.mxu0 %v2765_v63  ;;  %4018 = vmatpush.msrb.mxu1 %v3333_v49  ;;  %v8640_v63 = vld [vmem:[#allocation32_spill] sm:$0xff]  ;;  %v3159_v20 = vsel %vm491_vm2, %v8641_v55, %v4992_v2  ;;  %v5006_v13 = vunpack.i.l.bf16 %v5005_v33 }
 0x5dd   :  { %3990 = vmatpush.msrb.mxu0 %v2761_v9  ;;  %4019 = vmatpush.msrb.mxu1 %v3329_v8  ;;  %v8645_v9 = vld [vmem:[#allocation47_spill] sm:$0xff] }
 0x5df   :  { %3991 = vmatpush.msrb.mxu0 %v8638_v6  ;;  %v4995_v39 = vpop.permute.xlu0 %4994  ;;  %4020 = vmatpush.msrb.mxu1 %v3325_v22  ;;  %v5000_v10 = vpop.permute.xlu1 %4999 }
 0x5e0   :  { %v4996_v43 = vunpack.i.l.bf16 %v4995_v39  ;;  %v4997_v30 = vunpack.i.h.bf16 %v4995_v39  ;;  %v5001_v49 = vunpack.i.l.bf16 %v5000_v10  ;;  %v5002_v14 = vunpack.i.h.bf16 %v5000_v10 }
 0x5e1   :  { %3992 = vmatpush.msrb.mxu0 %v8640_v63  ;;  %4021 = vmatpush.msrb.mxu1 %v3321_v52 }
 0x5e2   :  { %4197 = vmatmul.msk.f32.gmra.mxu0 %vm1725_vm8, %v7888_v41  ;;  %v3155_v27 = vsel %vm491_vm2, %v4937_v59, %v4996_v43  ;;  %v5007_v59 = vunpack.i.h.bf16 %v5005_v33  ;;  %v2989_v38 = vsel %vm664_vm3, %v4952_v50, %v5002_v14  ;;  %v8647_v50 = vld [vmem:[#allocation37_spill] sm:$0xff] }
 0x5e3   :  { %3993 = vmatpush.msrb.mxu0 %v7609_v1  ;;  %4022 = vmatpush.msrb.mxu1 %v3163_v7  ;;  %v3151_v1 = vsel %vm491_vm2, %v4942_v57, %v4997_v30  ;;  %v2985_v57 = vsel %vm664_vm3, %v4957_v51, %v5006_v13  ;;  %v8648_v51 = vld [vmem:[#allocation24_spill] sm:$0xff] }
 0x5e5   :  { %3994 = vmatpush.msrb.mxu0 %v7614_v34  ;;  %4023 = vmatpush.msrb.mxu1 %v3159_v20  ;;  %v2993_v34 = vsel %vm664_vm3, %v4947_v16, %v5001_v49  ;;  %v8646_v16 = vld [vmem:[#allocation43_spill] sm:$0xff] }
 0x5e6   :  { %v3745_v19 = vpop.f32.mrf.mxu2 }
 0x5e7   :  { %3995 = vmatpush.msrb.mxu0 %v8642_v53  ;;  %4024 = vmatpush.msrb.mxu1 %v3155_v27  ;;  %v4080_v27 = vld [vmem:[#allocation4 + $0x20] sm:$0xff] }
 0x5e9   :  { %3996 = vmatpush.msrb.mxu0 %v8643_v11  ;;  %4025 = vmatpush.msrb.mxu1 %v3151_v1  ;;  %v5020_v8 = vpop.permute.xlu2 %5019  ;;  %v4076_v1 = vld [vmem:[#allocation4] sm:$0xff] }
 0x5ea   :  { %4198 = vmatmul.msk.f32.gmra.mxu0 %vm1725_vm8, %v7942_v54  ;;  %v5021_v2 = vunpack.i.l.bf16 %v5020_v8 }
 0x5eb   :  { %3997 = vmatpush.msrb.mxu0 %v7653_v5  ;;  %4026 = vmatpush.msrb.mxu1 %v2993_v34  ;;  %v2981_v5 = vsel %vm664_vm3, %v4962_v0, %v5007_v59  ;;  %v2827_v0 = vmul.f32 %v2819_v40, %v6985_v48  ;;  %v5022_v48 = vunpack.i.h.bf16 %v5020_v8 }
 0x5ed   :  { %3998 = vmatpush.msrb.mxu0 %v8644_v21  ;;  %4027 = vmatpush.msrb.mxu1 %v2989_v38  ;;  %v3495_v43 = vsel %vm145_vm0, %v5021_v2, %v5022_v48 }
 0x5ee   :  { %v3748_v24 = vpop.f32.mrf.mxu2 }
 0x5ef   :  { %3999 = vmatpush.msrb.mxu0 %v8645_v9  ;;  %4028 = vmatpush.msrb.mxu1 %v2985_v57 }
 0x5f1   :  { %4000 = vmatpush.msrb.mxu0 %v8646_v16  ;;  %4029 = vmatpush.msrb.mxu1 %v2981_v5  ;;  %v8137_v52 = vpop.permute.xlu2 %3703 }
 0x5f2   :  { %4199 = vmatmul.msk.f32.gmra.mxu0 %vm1725_vm8, %v7982_v47 }
 0x5f3   :  { %4001 = vmatpush.msrb.mxu0 %v7622_v62  ;;  %4030 = vmatpush.msrb.mxu1 %v2839_v17 }
 0x5f5   :  { %4002 = vmatpush.msrb.mxu0 %v8647_v50  ;;  %4031 = vmatpush.msrb.mxu1 %v2835_v25  ;;  %v4088_v50 = vld [vmem:[#allocation4 + $0x60] sm:$0xff] }
 0x5f6   :  { %v3751_v10 = vpop.f32.mrf.mxu2 }
 0x5f7   :  { %4003 = vmatpush.msrb.mxu0 %v8648_v51  ;;  %4032 = vmatpush.msrb.mxu1 %v2831_v58 }
 0x5f9   :  { %4004 = vmatpush.msrb.mxu0 %v8649_v44  ;;  %v3774_v61 = vpop.f32.mrf.mxu0  ;;  %4033 = vmatpush.msrb.mxu1 %v2827_v0 }
 0x5fa   :  { %4005 = vmatmul.f32.vlgmr.msrb.gmra.mxu0 %v7687_v3  ;;  %4034 = vmatmul.f32.vlgmr.msrb.gmra.mxu1 %v7814_v4 }
 0x600   :  { %v5010_v62 = vpop.permute.xlu0 %5009 }
 0x601   :  { %v5012_v26 = vunpack.i.h.bf16 %v5010_v62  ;;  %v5011_v18 = vunpack.i.l.bf16 %v5010_v62  ;;  %v5015_v46 = vpop.permute.xlu1 %5014  ;;  %v3803_v39 = vpop.f32.mrf.mxu1 }
 0x602   :  { %v5017_v22 = vunpack.i.h.bf16 %v5015_v46  ;;  %v5016_v6 = vunpack.i.l.bf16 %v5015_v46  ;;  %4008 = vmatmul.f32.gmra.mxu0 %v7723_v32  ;;  %4037 = vmatmul.f32.gmra.mxu1 %v7853_v36  ;;  %v3777_v42 = vpop.f32.mrf.mxu0  ;;  %v3749_v36 = vadd.f32 %v3748_v24, %v8137_v52  ;;  %v3754_v38 = vpop.f32.mrf.mxu2 }
 0x603   :  { %v3502_v3 = vsel %vm145_vm0, %v4966_v29, %v5011_v18  ;;  %v3503_v4 = vsel %vm145_vm0, %v5011_v18, %v5012_v26  ;;  %v3494_v29 = vsel %vm145_vm0, %v4971_v12, %v5021_v2  ;;  %v4077_v26 = vld [vmem:[#allocation4 + $0x8] sm:$0xff] }
 0x604   :  { %3972 = vmatpush.msrb.mxu2 %v3502_v3  ;;  %4059 = vmatpush.msrb.mxu3 %v3503_v4  ;;  %v3498_v63 = vsel %vm145_vm0, %v4967_v45, %v5016_v6  ;;  %v3499_v32 = vsel %vm145_vm0, %v5016_v6, %v5017_v22  ;;  %v3778_v30 = vadd.f32 %v3777_v42, %v3749_v36 }
 0x606   :  { %3973 = vmatpush.msrb.mxu2 %v3498_v63  ;;  %4060 = vmatpush.msrb.mxu3 %v3499_v32 }
 0x608   :  { %v5025_v7 = vpop.permute.xlu0 %5024  ;;  %3974 = vmatpush.msrb.mxu2 %v3494_v29  ;;  %4061 = vmatpush.msrb.mxu3 %v3495_v43 }
 0x609   :  { %v5027_v60 = vunpack.i.h.bf16 %v5025_v7  ;;  %v5026_v55 = vunpack.i.l.bf16 %v5025_v7  ;;  %v8148_v45 = vpop.permute.xlu1 %3698  ;;  %v4085_v7 = vld [vmem:[#allocation4 + $0x48] sm:$0xff] }
 0x60a   :  { %v3746_v20 = vadd.f32 %v3745_v19, %v8148_v45  ;;  %v3806_v49 = vpop.f32.mrf.mxu1  ;;  %4011 = vmatmul.f32.gmra.mxu0 %v7749_v35  ;;  %4040 = vmatmul.f32.gmra.mxu1 %v7886_v15  ;;  %v3780_v11 = vpop.f32.mrf.mxu0 }
 0x60b   :  { %v3807_v12 = vadd.f32 %v3806_v49, %v3778_v30  ;;  %v3490_v33 = vsel %vm145_vm0, %v4972_v23, %v5026_v55  ;;  %v3491_v53 = vsel %vm145_vm0, %v5026_v55, %v5027_v60 }
 0x60c   :  { %v3775_v14 = vadd.f32 %v3774_v61, %v3746_v20  ;;  %3975 = vmatpush.msrb.mxu2 %v3490_v33  ;;  %4062 = vmatpush.msrb.mxu3 %v3491_v53  ;;  %v4089_v53 = vld [vmem:[#allocation4 + $0x68] sm:$0xff] }
 0x60d   :  { %v4096_v13 = vadd.f32 %v4080_v27, %v3807_v12  ;;  %4200 = vmatmul.msk.f32.vlgmr.msrb.gmra.mxu2 %vm1725_vm8, %v7855_v28  ;;  %4204 = vmatmul.msk.f32.vlgmr.msrb.gmra.mxu3 %vm1725_vm8, %v7855_v28  ;;  %v4084_v28 = vld [vmem:[#allocation4 + $0x40] sm:$0xff] }
 0x60e   :  { %v3804_v35 = vadd.f32 %v3803_v39, %v3775_v14 }
 0x60f   :  { %v4112_v15 = vmax.f32 %v4096_v13, 0.0 }
 0x610   :  { %v4092_v34 = vadd.f32 %v4076_v1, %v3804_v35  ;;  %v8161_v37 = vpop.permute.xlu0 %3708 }
 0x611   :  { %4128 = vst [vmem:[#allocation10 + $0x20] sm:$0xff] %v4112_v15  ;;  %v3752_v23 = vadd.f32 %v3751_v10, %v8161_v37  ;;  %v8166_v21 = vpop.permute.xlu1 %3713 }
 0x612   :  { %v4108_v59 = vmax.f32 %v4092_v34, 0.0  ;;  %4014 = vmatmul.f32.gmra.mxu0 %v7790_v31  ;;  %4043 = vmatmul.f32.gmra.mxu1 %v7939_v56  ;;  %v3809_v9 = vpop.f32.mrf.mxu1  ;;  %v3755_v5 = vadd.f32 %v3754_v38, %v8166_v21  ;;  %v3783_v16 = vpop.f32.mrf.mxu0 }
 0x613   :  { %v3781_v57 = vadd.f32 %v3780_v11, %v3752_v23 }
 0x614   :  { %4124 = vst [vmem:[#allocation10] sm:$0xff] %v4108_v59  ;;  %v3784_v25 = vadd.f32 %v3783_v16, %v3755_v5 }
 0x615   :  { %v3810_v40 = vadd.f32 %v3809_v9, %v3781_v57  ;;  %4201 = vmatmul.msk.f32.gmra.mxu2 %vm1725_vm8, %v7888_v41  ;;  %4205 = vmatmul.msk.f32.gmra.mxu3 %vm1725_vm8, %v7888_v41  ;;  %v3832_v41 = vpop.f32.mrf.mxu3 }
 0x616   :  { %v3833_v61 = vadd.f32 %v3832_v41, %v8148_v45 }
 0x617   :  { %v4100_v17 = vadd.f32 %v4084_v28, %v3810_v40 }
 0x619   :  { %v4116_v31 = vmax.f32 %v4100_v17, 0.0 }
 0x61b   :  { %4132 = vst [vmem:[#allocation10 + $0x40] sm:$0xff] %v4116_v31  ;;  %v3812_v56 = vpop.f32.mrf.mxu1  ;;  %v4078_v31 = vld [vmem:[#allocation4 + $0x10] sm:$0xff] }
 0x61c   :  { %v3813_v58 = vadd.f32 %v3812_v56, %v3784_v25  ;;  %v4079_v56 = vld [vmem:[#allocation4 + $0x18] sm:$0xff] }
 0x61d   :  { %4202 = vmatmul.msk.f32.gmra.mxu2 %vm1725_vm8, %v7942_v54  ;;  %4206 = vmatmul.msk.f32.gmra.mxu3 %vm1725_vm8, %v7942_v54  ;;  %v3835_v44 = vpop.f32.mrf.mxu3 }
 0x61e   :  { %v4104_v19 = vadd.f32 %v4088_v50, %v3813_v58  ;;  %v3836_v22 = vadd.f32 %v3835_v44, %v8137_v52 }
 0x620   :  { %v4120_v51 = vmax.f32 %v4104_v19, 0.0 }
 0x622   :  { %4136 = vst [vmem:[#allocation10 + $0x60] sm:$0xff] %v4120_v51 }
 0x623   :  { %v3919_v48 = vpop.f32.mrf.mxu1 }
 0x624   :  { %v3920_v28 = vadd.f32 %v3919_v48, %v8148_v45 }
 0x625   :  { %4203 = vmatmul.msk.f32.gmra.mxu2 %vm1725_vm8, %v7982_v47  ;;  %4207 = vmatmul.msk.f32.gmra.mxu3 %vm1725_vm8, %v7982_v47  ;;  %v3838_v18 = vpop.f32.mrf.mxu3  ;;  %v4081_v47 = vld [vmem:[#allocation4 + $0x28] sm:$0xff] }
 0x626   :  { %v3839_v32 = vadd.f32 %v3838_v18, %v8161_v37 }
 0x62b   :  { %v3922_v30 = vpop.f32.mrf.mxu1 }
 0x62d   :  { %v3861_v0 = vpop.f32.mrf.mxu2  ;;  %v3841_v4 = vpop.f32.mrf.mxu3 }
 0x62e   :  { %v3862_v8 = vadd.f32 %v3861_v0, %v3833_v61  ;;  %v3842_v49 = vadd.f32 %v3841_v4, %v8166_v21  ;;  %v3923_v0 = vadd.f32 %v3922_v30, %v8137_v52 }
 0x633   :  { %v3925_v11 = vpop.f32.mrf.mxu1 }
 0x635   :  { %v3864_v24 = vpop.f32.mrf.mxu2  ;;  %v3948_v60 = vpop.f32.mrf.mxu3 }
 0x636   :  { %v3865_v39 = vadd.f32 %v3864_v24, %v3836_v22  ;;  %v3949_v40 = vadd.f32 %v3948_v60, %v3920_v28 }
 0x63b   :  { %v3928_v15 = vpop.f32.mrf.mxu1 }
 0x63d   :  { %v3867_v3 = vpop.f32.mrf.mxu2  ;;  %v3951_v13 = vpop.f32.mrf.mxu3 }
 0x63e   :  { %v3868_v29 = vadd.f32 %v3867_v3, %v3839_v32  ;;  %v3952_v24 = vadd.f32 %v3951_v13, %v3923_v0 }
 0x645   :  { %v3870_v20 = vpop.f32.mrf.mxu2  ;;  %v3954_v34 = vpop.f32.mrf.mxu3 }
 0x646   :  { %v3871_v12 = vadd.f32 %v3870_v20, %v3842_v49 }
 0x64d   :  { %v3957_v38 = vpop.f32.mrf.mxu3 }
 0x657   :  { %v3890_v62 = vpop.f32.mrf.mxu0 }
 0x658   :  { %v3891_v54 = vadd.f32 %v3890_v62, %v3862_v8 }
 0x65a   :  { %v4093_v46 = vadd.f32 %v4077_v26, %v3891_v54  ;;  %v4082_v26 = vld [vmem:[#allocation4 + $0x30] sm:$0xff]  ;;  %v4083_v54 = vld [vmem:[#allocation4 + $0x38] sm:$0xff] }
 0x65c   :  { %v4109_v6 = vmax.f32 %v4093_v46, 0.0 }
 0x65e   :  { %4125 = vst [vmem:[#allocation10 + $0x8] sm:$0xff] %v4109_v6 }
 0x65f   :  { %v3893_v2 = vpop.f32.mrf.mxu0 }
 0x660   :  { %v3894_v42 = vadd.f32 %v3893_v2, %v3865_v39 }
 0x662   :  { %v4097_v63 = vadd.f32 %v4081_v47, %v3894_v42 }
 0x664   :  { %v4113_v36 = vmax.f32 %v4097_v63, 0.0 }
 0x666   :  { %4129 = vst [vmem:[#allocation10 + $0x28] sm:$0xff] %v4113_v36  ;;  %v4086_v36 = vld [vmem:[#allocation4 + $0x50] sm:$0xff] }
 0x667   :  { %v3896_v43 = vpop.f32.mrf.mxu0 }
 0x668   :  { %v3897_v10 = vadd.f32 %v3896_v43, %v3868_v29  ;;  %v4087_v43 = vld [vmem:[#allocation4 + $0x58] sm:$0xff] }
 0x66a   :  { %v4101_v55 = vadd.f32 %v4085_v7, %v3897_v10 }
 0x66c   :  { %v4117_v27 = vmax.f32 %v4101_v55, 0.0 }
 0x66e   :  { %4133 = vst [vmem:[#allocation10 + $0x48] sm:$0xff] %v4117_v27 }
 0x66f   :  { %v3899_v33 = vpop.f32.mrf.mxu0 }
 0x670   :  { %v3900_v14 = vadd.f32 %v3899_v33, %v3871_v12 }
 0x672   :  { %v4105_v1 = vadd.f32 %v4089_v53, %v3900_v14  ;;  %v4090_v14 = vld [vmem:[#allocation4 + $0x70] sm:$0xff] }
 0x674   :  { %v4121_v35 = vmax.f32 %v4105_v1, 0.0 }
 0x676   :  { %4137 = vst [vmem:[#allocation10 + $0x68] sm:$0xff] %v4121_v35 }
 0x677   :  { %v4006_v23 = vpop.f32.mrf.mxu0  ;;  %v4035_v59 = vpop.f32.mrf.mxu1 }
 0x678   :  { %v4007_v57 = vadd.f32 %v4006_v23, %v8148_v45 }
 0x67a   :  { %v4036_v5 = vadd.f32 %v4035_v59, %v4007_v57 }
 0x67f   :  { %v4009_v9 = vpop.f32.mrf.mxu0  ;;  %v4038_v16 = vpop.f32.mrf.mxu1 }
 0x680   :  { %v4010_v19 = vadd.f32 %v4009_v9, %v8137_v52  ;;  %v3926_v52 = vadd.f32 %v3925_v11, %v8161_v37  ;;  %v4091_v11 = vld [vmem:[#allocation4 + $0x78] sm:$0xff] }
 0x682   :  { %v4039_v45 = vadd.f32 %v4038_v16, %v4010_v19  ;;  %v3955_v3 = vadd.f32 %v3954_v34, %v3926_v52 }
 0x687   :  { %v4012_v44 = vpop.f32.mrf.mxu0  ;;  %v4041_v6 = vpop.f32.mrf.mxu1 }
 0x688   :  { %v4013_v39 = vadd.f32 %v4012_v44, %v8161_v37  ;;  %v3929_v37 = vadd.f32 %v3928_v15, %v8166_v21 }
 0x68a   :  { %v4042_v4 = vadd.f32 %v4041_v6, %v4013_v39  ;;  %v3958_v12 = vadd.f32 %v3957_v38, %v3929_v37 }
 0x68f   :  { %v4015_v63 = vpop.f32.mrf.mxu0  ;;  %v4044_v20 = vpop.f32.mrf.mxu1 }
 0x690   :  { %v3977_v17 = vpop.f32.mrf.mxu2  ;;  %v4064_v25 = vpop.f32.mrf.mxu3  ;;  %v4016_v30 = vadd.f32 %v4015_v63, %v8166_v21 }
 0x691   :  { %v3978_v50 = vadd.f32 %v3977_v17, %v3949_v40  ;;  %v4065_v58 = vadd.f32 %v4064_v25, %v4036_v5 }
 0x692   :  { %v4045_v33 = vadd.f32 %v4044_v20, %v4016_v30 }
 0x693   :  { %v4094_v51 = vadd.f32 %v4078_v31, %v3978_v50  ;;  %v4095_v41 = vadd.f32 %v4079_v56, %v4065_v58 }
 0x695   :  { %v4110_v61 = vmax.f32 %v4094_v51, 0.0  ;;  %v4111_v8 = vmax.f32 %v4095_v41, 0.0 }
 0x697   :  { %4126 = vst [vmem:[#allocation10 + $0x10] sm:$0xff] %v4110_v61 }
 0x698   :  { %4127 = vst [vmem:[#allocation10 + $0x18] sm:$0xff] %v4111_v8  ;;  %v3980_v62 = vpop.f32.mrf.mxu2  ;;  %v4067_v18 = vpop.f32.mrf.mxu3 }
 0x699   :  { %v3981_v46 = vadd.f32 %v3980_v62, %v3952_v24  ;;  %v4068_v22 = vadd.f32 %v4067_v18, %v4039_v45 }
 0x69b   :  { %v4098_v48 = vadd.f32 %v4082_v26, %v3981_v46  ;;  %v4099_v2 = vadd.f32 %v4083_v54, %v4068_v22 }
 0x69d   :  { %v4114_v47 = vmax.f32 %v4098_v48, 0.0  ;;  %v4115_v42 = vmax.f32 %v4099_v2, 0.0 }
 0x69f   :  { %4130 = vst [vmem:[#allocation10 + $0x30] sm:$0xff] %v4114_v47 }
 0x6a0   :  { %4131 = vst [vmem:[#allocation10 + $0x38] sm:$0xff] %v4115_v42  ;;  %v3983_v32 = vpop.f32.mrf.mxu2  ;;  %v4070_v29 = vpop.f32.mrf.mxu3 }
 0x6a1   :  { %v3984_v7 = vadd.f32 %v3983_v32, %v3955_v3  ;;  %v4071_v10 = vadd.f32 %v4070_v29, %v4042_v4 }
 0x6a3   :  { %v4102_v60 = vadd.f32 %v4086_v36, %v3984_v7  ;;  %v4103_v55 = vadd.f32 %v4087_v43, %v4071_v10 }
 0x6a5   :  { %v4118_v49 = vmax.f32 %v4102_v60, 0.0  ;;  %v4119_v27 = vmax.f32 %v4103_v55, 0.0 }
 0x6a7   :  { %4134 = vst [vmem:[#allocation10 + $0x50] sm:$0xff] %v4118_v49 }
 0x6a8   :  { %4135 = vst [vmem:[#allocation10 + $0x58] sm:$0xff] %v4119_v27  ;;  %v3986_v53 = vpop.f32.mrf.mxu2  ;;  %v4073_v1 = vpop.f32.mrf.mxu3 }
 0x6a9   :  { %v3987_v13 = vadd.f32 %v3986_v53, %v3958_v12  ;;  %v4074_v35 = vadd.f32 %v4073_v1, %v4045_v33 }
 0x6ab   :  { %v4106_v34 = vadd.f32 %v4090_v14, %v3987_v13  ;;  %v4107_v23 = vadd.f32 %v4091_v11, %v4074_v35 }
 0x6ad   :  { %v4122_v21 = vmax.f32 %v4106_v34, 0.0  ;;  %v4123_v15 = vmax.f32 %v4107_v23, 0.0 }
 0x6af   :  { %4138 = vst [vmem:[#allocation10 + $0x70] sm:$0xff] %v4122_v21 }
 0x6b0   :  { %4139 = vst [vmem:[#allocation10 + $0x78] sm:$0xff] %v4123_v15 }
 0x6b1   :  { %4152 = dma.vmem_to_hbm [thread:$0]  %s4145_s7, 2048, %s4147_s11, [#allocation6], %s5151_s9, %s5151_s9, %s5152_s10  }
 0x6b2   :  { %5145 = dma.done.wait [#allocation6], 2048  }
 0x6b3   :  { %5146 = vsyncadd [#allocation6], 4294965248 }
 0x6b4   :  { %4157 = vsyncpa [#allocation5], 1 }
 0x6b5   :  { %4158 = vsyncpa [#allocation8], 1 }
 0x6b6   :  { %4159 = vsyncpa [#allocation6], 1 }

</bundles_post_ra>
